<compile_context>
chip_gen: v7x
topology: tpu7x:2x2x1
jax: 0.10.0
libtpu: 0.0.40
codegen_flags: <defaults>
</compile_context>

<pallas_src>
import jax
import jax.numpy as jnp
from jax import lax
from jax.experimental import pallas as pl
from jax.experimental.pallas import tpu as pltpu

EPS = 1e-5
LANE = 128


def _round_up(x, m):
    return (x + m - 1) // m * m


def _bn_relu_rows(h):
    """Training-mode BatchNorm2d(affine=False) + ReLU over rows of (M, C).

    Two-pass: mean first, then centered sum-of-squares (biased variance,
    matching PyTorch's normalization), all on the resident VMEM block.
    """
    m = h.shape[0]
    mean = jnp.sum(h, axis=0, keepdims=True) * (1.0 / m)
    cent = h - mean
    var = jnp.sum(cent * cent, axis=0, keepdims=True) * (1.0 / m)
    return jnp.maximum(cent * lax.rsqrt(var + EPS), 0.0)


def _tap_index(off, n, stride):
    if stride == 1:
        return slice(off, off + n)
    # TODO(synk): strided tap reads (stride > 1) are not exercised by the demo.
    return pl.ds(off, n, stride)


def _make_conv_branch_kernel(*, separable, N, H, W, Cp, k, stride, padding, Ho, Wo):
    """Build the fused kernel body for a fixed (static) configuration."""
    Hp = H + 2 * padding
    Wp = W + 2 * padding
    M_out = N * Ho * Wo

    def preproc_into_pad(x_ref, wpre_ref, hpad_ref):
        # 1x1 conv (no bias) on the MXU, then BN + ReLU, then write into the
        # zeroed halo-padded scratch (in-kernel "im2col" source).
        h = jnp.dot(x_ref[...], wpre_ref[...], preferred_element_type=jnp.float32)
        h = _bn_relu_rows(h)
        hpad_ref[...] = jnp.zeros((N, Hp, Wp, Cp), jnp.float32)
        hpad_ref[:, padding:padding + H, padding:padding + W, :] = h.reshape(N, H, W, Cp)

    def tap(hpad_ref, ky, kx):
        return hpad_ref[:, _tap_index(ky, Ho, stride), _tap_index(kx, Wo, stride), :]

    if separable:
        def kernel(x_ref, wpre_ref, wdw_ref, wpw_ref, o_ref, hpad_ref):
            preproc_into_pad(x_ref, wpre_ref, hpad_ref)
            # depthwise kxk: pure VPU per-channel fused multiply-adds over taps
            acc4 = jnp.zeros((N, Ho, Wo, Cp), jnp.float32)
            for ky in range(k):
                for kx in range(k):
                    idx = ky * k + kx
                    w_t = wdw_ref[idx:idx + 1, :].reshape(1, 1, 1, Cp)
                    acc4 = acc4 + tap(hpad_ref, ky, kx) * w_t
            # pointwise 1x1 on the MXU
            h2 = jnp.dot(acc4.reshape(M_out, Cp), wpw_ref[...],
                         preferred_element_type=jnp.float32)
            o_ref[...] = _bn_relu_rows(h2)
        return kernel

    def kernel(x_ref, wpre_ref, wconv_ref, bconv_ref, o_ref, hpad_ref):
        preproc_into_pad(x_ref, wpre_ref, hpad_ref)
        # dense kxk conv: one (rows, C) @ (C, C) MXU matmul per tap, accumulated
        acc = jnp.zeros((M_out, Cp), jnp.float32)
        for ky in range(k):
            for kx in range(k):
                t2 = tap(hpad_ref, ky, kx).reshape(M_out, Cp)
                acc = acc + jnp.dot(t2, wconv_ref[ky * k + kx],
                                    preferred_element_type=jnp.float32)
        acc = acc + bconv_ref[...]          # real conv bias, added in-kernel
        o_ref[...] = _bn_relu_rows(acc)
    return kernel


def conv_branch_forward(x_nchw, params, *, separable, kernel_size, stride, padding):
    N, C_in, H, W = x_nchw.shape
    C_out = params["w_pre"].shape[0]
    k = kernel_size
    Ho = (H + 2 * padding - k) // stride + 1
    Wo = (W + 2 * padding - k) // stride + 1
    Cip = _round_up(C_in, LANE)             # lane-dense padded channel counts
    Cop = _round_up(C_out, LANE)
    M0 = N * H * W
    M_out = N * Ho * Wo
    f32 = jnp.float32

    # crude VMEM budget guard for the fully-fused path
    hpad_elems = N * (H + 2 * padding) * (W + 2 * padding) * Cop
    est_bytes = 4 * (M0 * Cip + 3 * M_out * Cop + 2 * hpad_elems
                     + k * k * Cop * Cop + 2 * Cip * Cop)
    if est_bytes > 20 * 1024 * 1024:
        # TODO(synk): add a grid-tiled (M/K blocked) path for production shapes.
        raise ValueError("ConvBranch fused kernel exceeds the VMEM budget")

    # ---- host-side layout prep (tiny, plain JAX) ----
    x = jnp.transpose(x_nchw, (0, 2, 3, 1)).astype(f32).reshape(M0, C_in)
    x = jnp.pad(x, ((0, 0), (0, Cip - C_in)))

    w_pre = jnp.transpose(params["w_pre"][:, :, 0, 0]).astype(f32)      # (C_in, C_out)
    w_pre = jnp.pad(w_pre, ((0, Cip - C_in), (0, Cop - C_out)))

    if separable:
        w_dw = jnp.transpose(params["w_dw"][:, 0, :, :], (1, 2, 0))      # (k,k,C)
        w_dw = jnp.pad(w_dw.reshape(k * k, C_out).astype(f32),
                       ((0, 0), (0, Cop - C_out)))
        w_pw = jnp.transpose(params["w_pw"][:, :, 0, 0]).astype(f32)     # (C, C)
        w_pw = jnp.pad(w_pw, ((0, Cop - C_out), (0, Cop - C_out)))
        args = (x, w_pre, w_dw, w_pw)
    else:
        w_conv = jnp.transpose(params["w_conv"], (2, 3, 1, 0))           # (k,k,Cin,Cout)
        w_conv = jnp.pad(w_conv.reshape(k * k, C_out, C_out).astype(f32),
                         ((0, 0), (0, Cop - C_out), (0, Cop - C_out)))
        b_conv = jnp.pad(params["b_conv"].astype(f32).reshape(1, C_out),
                         ((0, 0), (0, Cop - C_out)))
        args = (x, w_pre, w_conv, b_conv)

    kernel = _make_conv_branch_kernel(separable=separable, N=N, H=H, W=W, Cp=Cop,
                                      k=k, stride=stride, padding=padding,
                                      Ho=Ho, Wo=Wo)

    vmem_spec = pl.BlockSpec(memory_space=pltpu.MemorySpace.VMEM)
    out = pl.pallas_call(
        kernel,
        out_shape=jax.ShapeDtypeStruct((M_out, Cop), f32),   # lane-dense output
        in_specs=[vmem_spec] * len(args),
        out_specs=vmem_spec,
        scratch_shapes=[pltpu.VMEM((N, H + 2 * padding, W + 2 * padding, Cop), f32)],
        compiler_params=pltpu.CompilerParams(vmem_limit_bytes=32 * 1024 * 1024),
    )(*args)

    out = out[:, :C_out].reshape(N, Ho, Wo, C_out)
    return jnp.transpose(out, (0, 3, 1, 2))                  # back to NCHW


# ----------------------------- reference (pure JAX) --------------------------

def ref_forward(x_nchw, params, separable, k, stride, padding):
    dn = ("NCHW", "OIHW", "NCHW")
    C_out = params["w_pre"].shape[0]

    def bn_relu(y):
        mean = y.mean(axis=(0, 2, 3), keepdims=True)
        var = ((y - mean) ** 2).mean(axis=(0, 2, 3), keepdims=True)
        return jnp.maximum((y - mean) / jnp.sqrt(var + EPS), 0.0)

    y = lax.conv_general_dilated(x_nchw, params["w_pre"], (1, 1), "VALID",
                                 dimension_numbers=dn)
    y = bn_relu(y)
    pad = [(padding, padding), (padding, padding)]
    if separable:
        y = lax.conv_general_dilated(y, params["w_dw"], (stride, stride), pad,
                                     dimension_numbers=dn, feature_group_count=C_out)
        y = lax.conv_general_dilated(y, params["w_pw"], (1, 1), "VALID",
                                     dimension_numbers=dn)
    else:
        y = lax.conv_general_dilated(y, params["w_conv"], (stride, stride), pad,
                                     dimension_numbers=dn)
        y = y + params["b_conv"][None, :, None, None]
    return bn_relu(y)


# ----------------------------------- main ------------------------------------

if __name__ == "__main__":
    key = jax.random.PRNGKey(0)
    N, C_in, H, W = 2, 4, 16, 16
    C_out, ksz, stride, padding = 8, 3, 1, 1

    k1, k2, k3, k4, k5, kx = jax.random.split(key, 6)
    params = {
        "w_pre": 0.2 * jax.random.normal(k1, (C_out, C_in, 1, 1), jnp.float32),
        "w_conv": 0.2 * jax.random.normal(k2, (C_out, C_out, ksz, ksz), jnp.float32),
        "b_conv": 0.2 * jax.random.normal(k3, (C_out,), jnp.float32),
        "w_dw": 0.2 * jax.random.normal(k4, (C_out, 1, ksz, ksz), jnp.float32),
        "w_pw": 0.2 * jax.random.normal(k5, (C_out, C_out, 1, 1), jnp.float32),
    }
    x = jax.random.normal(kx, (N, C_in, H, W), jnp.float32)

    for separable in (False, True):
        out = conv_branch_forward(x, params, separable=separable,
                                  kernel_size=ksz, stride=stride, padding=padding)
        out = jax.block_until_ready(out)
        ref = ref_forward(x, params, separable, ksz, stride, padding)
        assert out.shape == ref.shape, (out.shape, ref.shape)
        err = float(jnp.max(jnp.abs(out - ref)))
        assert err < 2e-4, f"mismatch (separable={separable}): {err}"

    # TODO(synk): BatchNorm running-stat (momentum) updates are training-time
    # state mutation with no effect on the forward output; not reproduced.
    print("KERNEL_OK")
</pallas_src>

<mosaic_0001>
module attributes {stable_mosaic.version = 11 : i64} {
  func.func @kernel(%arg0: memref<512x128xf32, #tpu.memory_space<vmem>>, %arg1: memref<128x128xf32, #tpu.memory_space<vmem>>, %arg2: memref<9x128x128xf32, #tpu.memory_space<vmem>>, %arg3: memref<1x128xf32, #tpu.memory_space<vmem>>, %arg4: memref<512x128xf32, #tpu.memory_space<vmem>>, %arg5: memref<2x18x18x128xf32, #tpu.memory_space<vmem>>) attributes {dimension_semantics = [], scalar_prefetch = 0 : i64, scratch_operands = 1 : i64, tpu.core_type = #tpu.core_type<tc>} {
    %c0 = arith.constant 0 : index
    %c0_0 = arith.constant 0 : index
    %0 = vector.load %arg0[%c0, %c0_0] : memref<512x128xf32, #tpu.memory_space<vmem>>, vector<512x128xf32>
    %c0_1 = arith.constant 0 : index
    %c0_2 = arith.constant 0 : index
    %1 = vector.load %arg1[%c0_1, %c0_2] : memref<128x128xf32, #tpu.memory_space<vmem>>, vector<128x128xf32>
    %cst = arith.constant dense<0.000000e+00> : vector<512x128xf32>
    %2 = tpu.matmul %0, %1, %cst {dimension_numbers = #tpu.dot_dimension_numbers<[1], [0], [0], [1], [0, 0, 1, 1], [], []>} : vector<512x128xf32>, vector<128x128xf32>, vector<512x128xf32> -> vector<512x128xf32>
    %cst_3 = arith.constant dense<0.000000e+00> : vector<128xf32>
    %3 = vector.multi_reduction <add>, %2, %cst_3 [0] : vector<512x128xf32> to vector<128xf32>
    %4 = vector.shape_cast %3 : vector<128xf32> to vector<1x128xf32>
    %cst_4 = arith.constant 0.001953125 : f32
    %5 = vector.broadcast %cst_4 : f32 to vector<1x128xf32>
    %6 = arith.mulf %4, %5 : vector<1x128xf32>
    %7 = vector.broadcast %6 : vector<1x128xf32> to vector<512x128xf32>
    %8 = arith.subf %2, %7 : vector<512x128xf32>
    %9 = arith.mulf %8, %8 : vector<512x128xf32>
    %cst_5 = arith.constant dense<0.000000e+00> : vector<128xf32>
    %10 = vector.multi_reduction <add>, %9, %cst_5 [0] : vector<512x128xf32> to vector<128xf32>
    %11 = vector.shape_cast %10 : vector<128xf32> to vector<1x128xf32>
    %cst_6 = arith.constant 0.001953125 : f32
    %12 = vector.broadcast %cst_6 : f32 to vector<1x128xf32>
    %13 = arith.mulf %11, %12 : vector<1x128xf32>
    %cst_7 = arith.constant 9.99999974E-6 : f32
    %14 = vector.broadcast %cst_7 : f32 to vector<1x128xf32>
    %15 = arith.addf %13, %14 : vector<1x128xf32>
    %16 = math.rsqrt %15 : vector<1x128xf32>
    %17 = vector.broadcast %16 : vector<1x128xf32> to vector<512x128xf32>
    %18 = arith.mulf %8, %17 : vector<512x128xf32>
    %cst_8 = arith.constant 0.000000e+00 : f32
    %19 = vector.broadcast %cst_8 : f32 to vector<512x128xf32>
    %20 = arith.maximumf %18, %19 : vector<512x128xf32>
    %cst_9 = arith.constant 0.000000e+00 : f32
    %21 = vector.broadcast %cst_9 : f32 to vector<2x18x18x128xf32>
    %c0_10 = arith.constant 0 : index
    %c0_11 = arith.constant 0 : index
    %c0_12 = arith.constant 0 : index
    %c0_13 = arith.constant 0 : index
    %22 = vector.load %arg5[%c0_10, %c0_11, %c0_12, %c0_13] : memref<2x18x18x128xf32, #tpu.memory_space<vmem>>, vector<2x18x18x128xf32>
    tpu.vector_store %arg5[%c0_10, %c0_11, %c0_12, %c0_13], %21 {strides = array<i32>} : memref<2x18x18x128xf32, #tpu.memory_space<vmem>>, vector<2x18x18x128xf32>,
    %23 = vector.shape_cast %20 : vector<512x128xf32> to vector<2x16x16x128xf32>
    %c0_14 = arith.constant 0 : index
    %c1 = arith.constant 1 : index
    %c1_15 = arith.constant 1 : index
    %c0_16 = arith.constant 0 : index
    %24 = vector.load %arg5[%c0_14, %c1, %c1_15, %c0_16] : memref<2x18x18x128xf32, #tpu.memory_space<vmem>>, vector<2x16x16x128xf32>
    tpu.vector_store %arg5[%c0_14, %c1, %c1_15, %c0_16], %23 {strides = array<i32>} : memref<2x18x18x128xf32, #tpu.memory_space<vmem>>, vector<2x16x16x128xf32>,
    %cst_17 = arith.constant 0.000000e+00 : f32
    %25 = vector.broadcast %cst_17 : f32 to vector<512x128xf32>
    %c0_18 = arith.constant 0 : index
    %c0_19 = arith.constant 0 : index
    %c0_20 = arith.constant 0 : index
    %c0_21 = arith.constant 0 : index
    %26 = vector.load %arg5[%c0_18, %c0_19, %c0_20, %c0_21] : memref<2x18x18x128xf32, #tpu.memory_space<vmem>>, vector<2x16x16x128xf32>
    %27 = vector.shape_cast %26 : vector<2x16x16x128xf32> to vector<512x128xf32>
    %c0_22 = arith.constant 0 : index
    %c0_23 = arith.constant 0 : index
    %c0_24 = arith.constant 0 : index
    %28 = vector.load %arg2[%c0_22, %c0_23, %c0_24] : memref<9x128x128xf32, #tpu.memory_space<vmem>>, vector<1x128x128xf32>
    %29 = vector.shape_cast %28 : vector<1x128x128xf32> to vector<128x128xf32>
    %cst_25 = arith.constant dense<0.000000e+00> : vector<512x128xf32>
    %30 = tpu.matmul %27, %29, %cst_25 {dimension_numbers = #tpu.dot_dimension_numbers<[1], [0], [0], [1], [0, 0, 1, 1], [], []>} : vector<512x128xf32>, vector<128x128xf32>, vector<512x128xf32> -> vector<512x128xf32>
    %31 = arith.addf %25, %30 : vector<512x128xf32>
    %c0_26 = arith.constant 0 : index
    %c0_27 = arith.constant 0 : index
    %c1_28 = arith.constant 1 : index
    %c0_29 = arith.constant 0 : index
    %32 = vector.load %arg5[%c0_26, %c0_27, %c1_28, %c0_29] : memref<2x18x18x128xf32, #tpu.memory_space<vmem>>, vector<2x16x16x128xf32>
    %33 = vector.shape_cast %32 : vector<2x16x16x128xf32> to vector<512x128xf32>
    %c1_30 = arith.constant 1 : index
    %c0_31 = arith.constant 0 : index
    %c0_32 = arith.constant 0 : index
    %34 = vector.load %arg2[%c1_30, %c0_31, %c0_32] : memref<9x128x128xf32, #tpu.memory_space<vmem>>, vector<1x128x128xf32>
    %35 = vector.shape_cast %34 : vector<1x128x128xf32> to vector<128x128xf32>
    %cst_33 = arith.constant dense<0.000000e+00> : vector<512x128xf32>
    %36 = tpu.matmul %33, %35, %cst_33 {dimension_numbers = #tpu.dot_dimension_numbers<[1], [0], [0], [1], [0, 0, 1, 1], [], []>} : vector<512x128xf32>, vector<128x128xf32>, vector<512x128xf32> -> vector<512x128xf32>
    %37 = arith.addf %31, %36 : vector<512x128xf32>
    %c0_34 = arith.constant 0 : index
    %c0_35 = arith.constant 0 : index
    %c2 = arith.constant 2 : index
    %c0_36 = arith.constant 0 : index
    %38 = vector.load %arg5[%c0_34, %c0_35, %c2, %c0_36] : memref<2x18x18x128xf32, #tpu.memory_space<vmem>>, vector<2x16x16x128xf32>
    %39 = vector.shape_cast %38 : vector<2x16x16x128xf32> to vector<512x128xf32>
    %c2_37 = arith.constant 2 : index
    %c0_38 = arith.constant 0 : index
    %c0_39 = arith.constant 0 : index
    %40 = vector.load %arg2[%c2_37, %c0_38, %c0_39] : memref<9x128x128xf32, #tpu.memory_space<vmem>>, vector<1x128x128xf32>
    %41 = vector.shape_cast %40 : vector<1x128x128xf32> to vector<128x128xf32>
    %cst_40 = arith.constant dense<0.000000e+00> : vector<512x128xf32>
    %42 = tpu.matmul %39, %41, %cst_40 {dimension_numbers = #tpu.dot_dimension_numbers<[1], [0], [0], [1], [0, 0, 1, 1], [], []>} : vector<512x128xf32>, vector<128x128xf32>, vector<512x128xf32> -> vector<512x128xf32>
    %43 = arith.addf %37, %42 : vector<512x128xf32>
    %c0_41 = arith.constant 0 : index
    %c1_42 = arith.constant 1 : index
    %c0_43 = arith.constant 0 : index
    %c0_44 = arith.constant 0 : index
    %44 = vector.load %arg5[%c0_41, %c1_42, %c0_43, %c0_44] : memref<2x18x18x128xf32, #tpu.memory_space<vmem>>, vector<2x16x16x128xf32>
    %45 = vector.shape_cast %44 : vector<2x16x16x128xf32> to vector<512x128xf32>
    %c3 = arith.constant 3 : index
    %c0_45 = arith.constant 0 : index
    %c0_46 = arith.constant 0 : index
    %46 = vector.load %arg2[%c3, %c0_45, %c0_46] : memref<9x128x128xf32, #tpu.memory_space<vmem>>, vector<1x128x128xf32>
    %47 = vector.shape_cast %46 : vector<1x128x128xf32> to vector<128x128xf32>
    %cst_47 = arith.constant dense<0.000000e+00> : vector<512x128xf32>
    %48 = tpu.matmul %45, %47, %cst_47 {dimension_numbers = #tpu.dot_dimension_numbers<[1], [0], [0], [1], [0, 0, 1, 1], [], []>} : vector<512x128xf32>, vector<128x128xf32>, vector<512x128xf32> -> vector<512x128xf32>
    %49 = arith.addf %43, %48 : vector<512x128xf32>
    %c0_48 = arith.constant 0 : index
    %c1_49 = arith.constant 1 : index
    %c1_50 = arith.constant 1 : index
    %c0_51 = arith.constant 0 : index
    %50 = vector.load %arg5[%c0_48, %c1_49, %c1_50, %c0_51] : memref<2x18x18x128xf32, #tpu.memory_space<vmem>>, vector<2x16x16x128xf32>
    %51 = vector.shape_cast %50 : vector<2x16x16x128xf32> to vector<512x128xf32>
    %c4 = arith.constant 4 : index
    %c0_52 = arith.constant 0 : index
    %c0_53 = arith.constant 0 : index
    %52 = vector.load %arg2[%c4, %c0_52, %c0_53] : memref<9x128x128xf32, #tpu.memory_space<vmem>>, vector<1x128x128xf32>
    %53 = vector.shape_cast %52 : vector<1x128x128xf32> to vector<128x128xf32>
    %cst_54 = arith.constant dense<0.000000e+00> : vector<512x128xf32>
    %54 = tpu.matmul %51, %53, %cst_54 {dimension_numbers = #tpu.dot_dimension_numbers<[1], [0], [0], [1], [0, 0, 1, 1], [], []>} : vector<512x128xf32>, vector<128x128xf32>, vector<512x128xf32> -> vector<512x128xf32>
    %55 = arith.addf %49, %54 : vector<512x128xf32>
    %c0_55 = arith.constant 0 : index
    %c1_56 = arith.constant 1 : index
    %c2_57 = arith.constant 2 : index
    %c0_58 = arith.constant 0 : index
    %56 = vector.load %arg5[%c0_55, %c1_56, %c2_57, %c0_58] : memref<2x18x18x128xf32, #tpu.memory_space<vmem>>, vector<2x16x16x128xf32>
    %57 = vector.shape_cast %56 : vector<2x16x16x128xf32> to vector<512x128xf32>
    %c5 = arith.constant 5 : index
    %c0_59 = arith.constant 0 : index
    %c0_60 = arith.constant 0 : index
    %58 = vector.load %arg2[%c5, %c0_59, %c0_60] : memref<9x128x128xf32, #tpu.memory_space<vmem>>, vector<1x128x128xf32>
    %59 = vector.shape_cast %58 : vector<1x128x128xf32> to vector<128x128xf32>
    %cst_61 = arith.constant dense<0.000000e+00> : vector<512x128xf32>
    %60 = tpu.matmul %57, %59, %cst_61 {dimension_numbers = #tpu.dot_dimension_numbers<[1], [0], [0], [1], [0, 0, 1, 1], [], []>} : vector<512x128xf32>, vector<128x128xf32>, vector<512x128xf32> -> vector<512x128xf32>
    %61 = arith.addf %55, %60 : vector<512x128xf32>
    %c0_62 = arith.constant 0 : index
    %c2_63 = arith.constant 2 : index
    %c0_64 = arith.constant 0 : index
    %c0_65 = arith.constant 0 : index
    %62 = vector.load %arg5[%c0_62, %c2_63, %c0_64, %c0_65] : memref<2x18x18x128xf32, #tpu.memory_space<vmem>>, vector<2x16x16x128xf32>
    %63 = vector.shape_cast %62 : vector<2x16x16x128xf32> to vector<512x128xf32>
    %c6 = arith.constant 6 : index
    %c0_66 = arith.constant 0 : index
    %c0_67 = arith.constant 0 : index
    %64 = vector.load %arg2[%c6, %c0_66, %c0_67] : memref<9x128x128xf32, #tpu.memory_space<vmem>>, vector<1x128x128xf32>
    %65 = vector.shape_cast %64 : vector<1x128x128xf32> to vector<128x128xf32>
    %cst_68 = arith.constant dense<0.000000e+00> : vector<512x128xf32>
    %66 = tpu.matmul %63, %65, %cst_68 {dimension_numbers = #tpu.dot_dimension_numbers<[1], [0], [0], [1], [0, 0, 1, 1], [], []>} : vector<512x128xf32>, vector<128x128xf32>, vector<512x128xf32> -> vector<512x128xf32>
    %67 = arith.addf %61, %66 : vector<512x128xf32>
    %c0_69 = arith.constant 0 : index
    %c2_70 = arith.constant 2 : index
    %c1_71 = arith.constant 1 : index
    %c0_72 = arith.constant 0 : index
    %68 = vector.load %arg5[%c0_69, %c2_70, %c1_71, %c0_72] : memref<2x18x18x128xf32, #tpu.memory_space<vmem>>, vector<2x16x16x128xf32>
    %69 = vector.shape_cast %68 : vector<2x16x16x128xf32> to vector<512x128xf32>
    %c7 = arith.constant 7 : index
    %c0_73 = arith.constant 0 : index
    %c0_74 = arith.constant 0 : index
    %70 = vector.load %arg2[%c7, %c0_73, %c0_74] : memref<9x128x128xf32, #tpu.memory_space<vmem>>, vector<1x128x128xf32>
    %71 = vector.shape_cast %70 : vector<1x128x128xf32> to vector<128x128xf32>
    %cst_75 = arith.constant dense<0.000000e+00> : vector<512x128xf32>
    %72 = tpu.matmul %69, %71, %cst_75 {dimension_numbers = #tpu.dot_dimension_numbers<[1], [0], [0], [1], [0, 0, 1, 1], [], []>} : vector<512x128xf32>, vector<128x128xf32>, vector<512x128xf32> -> vector<512x128xf32>
    %73 = arith.addf %67, %72 : vector<512x128xf32>
    %c0_76 = arith.constant 0 : index
    %c2_77 = arith.constant 2 : index
    %c2_78 = arith.constant 2 : index
    %c0_79 = arith.constant 0 : index
    %74 = vector.load %arg5[%c0_76, %c2_77, %c2_78, %c0_79] : memref<2x18x18x128xf32, #tpu.memory_space<vmem>>, vector<2x16x16x128xf32>
    %75 = vector.shape_cast %74 : vector<2x16x16x128xf32> to vector<512x128xf32>
    %c8 = arith.constant 8 : index
    %c0_80 = arith.constant 0 : index
    %c0_81 = arith.constant 0 : index
    %76 = vector.load %arg2[%c8, %c0_80, %c0_81] : memref<9x128x128xf32, #tpu.memory_space<vmem>>, vector<1x128x128xf32>
    %77 = vector.shape_cast %76 : vector<1x128x128xf32> to vector<128x128xf32>
    %cst_82 = arith.constant dense<0.000000e+00> : vector<512x128xf32>
    %78 = tpu.matmul %75, %77, %cst_82 {dimension_numbers = #tpu.dot_dimension_numbers<[1], [0], [0], [1], [0, 0, 1, 1], [], []>} : vector<512x128xf32>, vector<128x128xf32>, vector<512x128xf32> -> vector<512x128xf32>
    %79 = arith.addf %73, %78 : vector<512x128xf32>
    %c0_83 = arith.constant 0 : index
    %c0_84 = arith.constant 0 : index
    %80 = vector.load %arg3[%c0_83, %c0_84] : memref<1x128xf32, #tpu.memory_space<vmem>>, vector<1x128xf32>
    %81 = vector.broadcast %80 : vector<1x128xf32> to vector<512x128xf32>
    %82 = arith.addf %79, %81 : vector<512x128xf32>
    %cst_85 = arith.constant dense<0.000000e+00> : vector<128xf32>
    %83 = vector.multi_reduction <add>, %82, %cst_85 [0] : vector<512x128xf32> to vector<128xf32>
    %84 = vector.shape_cast %83 : vector<128xf32> to vector<1x128xf32>
    %cst_86 = arith.constant 0.001953125 : f32
    %85 = vector.broadcast %cst_86 : f32 to vector<1x128xf32>
    %86 = arith.mulf %84, %85 : vector<1x128xf32>
    %87 = vector.broadcast %86 : vector<1x128xf32> to vector<512x128xf32>
    %88 = arith.subf %82, %87 : vector<512x128xf32>
    %89 = arith.mulf %88, %88 : vector<512x128xf32>
    %cst_87 = arith.constant dense<0.000000e+00> : vector<128xf32>
    %90 = vector.multi_reduction <add>, %89, %cst_87 [0] : vector<512x128xf32> to vector<128xf32>
    %91 = vector.shape_cast %90 : vector<128xf32> to vector<1x128xf32>
    %cst_88 = arith.constant 0.001953125 : f32
    %92 = vector.broadcast %cst_88 : f32 to vector<1x128xf32>
    %93 = arith.mulf %91, %92 : vector<1x128xf32>
    %cst_89 = arith.constant 9.99999974E-6 : f32
    %94 = vector.broadcast %cst_89 : f32 to vector<1x128xf32>
    %95 = arith.addf %93, %94 : vector<1x128xf32>
    %96 = math.rsqrt %95 : vector<1x128xf32>
    %97 = vector.broadcast %96 : vector<1x128xf32> to vector<512x128xf32>
    %98 = arith.mulf %88, %97 : vector<512x128xf32>
    %cst_90 = arith.constant 0.000000e+00 : f32
    %99 = vector.broadcast %cst_90 : f32 to vector<512x128xf32>
    %100 = arith.maximumf %98, %99 : vector<512x128xf32>
    %c0_91 = arith.constant 0 : index
    %c0_92 = arith.constant 0 : index
    %101 = vector.load %arg4[%c0_91, %c0_92] : memref<512x128xf32, #tpu.memory_space<vmem>>, vector<512x128xf32>
    tpu.vector_store %arg4[%c0_91, %c0_92], %100 {strides = array<i32>} : memref<512x128xf32, #tpu.memory_space<vmem>>, vector<512x128xf32>,
    return
  }
}

</mosaic_0001>

<bundles_post_ra>
// kernel: tpu_custom_call.1
= control target key start
LH: loop header
LB: loop body
LE: loop exit
PB: predicated region body
PF: predicated region fallthrough
CT: control target
= control target key end

     0   :  { %9 = vsyncpa [#allocation4], 0  ;;  %s12337_s0 = inlined_call_operand.hbm [shape: f32[512,128], index: 0, kind: input, shape index: {}]   ;;  %s12338_s1 = inlined_call_operand.hbm [shape: f32[128,128], index: 1, kind: input, shape index: {}]   ;;  %s12339_s2 = inlined_call_operand.hbm [shape: f32[9,128,128], index: 2, kind: input, shape index: {}]   ;;  %s12340_s3 = inlined_call_operand.vmem [shape: f32[1,128], index: 3, kind: input, shape index: {}]   ;;  %s12341_s4 = inlined_call_operand.hbm [shape: f32[512,128], index: 4, kind: output, shape index: {}]  }
   0x1   :  { %10 = vsyncpa [#allocation7], 0 }
   0x2   :  { %11 = vsyncpa [#allocation5], 0  ;;  %s9308_s15 = smov [#allocation6]   ;;  %s9309_s17 = smov [#allocation3]  }
   0x3   :  { %s29_s16 = sshll.u32 %s9308_s15, 4  ;;  %s17_s18 = sshll.u32 %s9309_s17, 4  ;;  %s30_s16 = int_to_ptr.vmem [resolvable:$true] %s29_s16  ;;  %s9340_s18 = int_to_ptr.vmem [resolvable:$true] %s17_s18 }
   0x4   :  { %s9214_s21 = scalar_lea.hbm %s12338_s1, 2048 }
   0x5   :  { %p9215_p0 = scmp.ne.s32.totalorder %s12338_s1, %s9214_s21  ;;  %p9218_p1 = scmp.lt.u32.totalorder %s9214_s21, %s12338_s1 }
   0x7   :  { %p9220_p2 = pnand %p9218_p1, %p9215_p0 }
   0x9   :  { %9223 = shalt.err (!%p9220_p2)
}
   0xa   :  { %s9224_s26 = scalar_lea.vmem %s30_s16, 2048  ;;  %p9229_p4 = scmp.lt.s32.totalorder %s30_s16, %s30_s16 }
   0xb   :  { %p9225_p3 = scmp.ne.s32.totalorder %s30_s16, %s9224_s26  ;;  %p9230_p5 = scmp.lt.s32.totalorder %s9224_s26, %s9224_s26 }
   0xd   :  { %p9231_p6 = por %p9230_p5, %p9229_p4 }
   0xf   :  { %p9232_p7 = pnand %p9231_p6, %p9225_p3 }
  0x11   :  { %9235 = shalt.err (!%p9232_p7)
}
  0x12   :  { %s9310_s27 = smov 128   ;;  %s9311_s28 = smov 8  }
  0x13   :  { %35 = dma.hbm_to_vmem [thread:$0]  %s12338_s1, 2048, %s30_s16, [#allocation7], %s9310_s27, %s9310_s27, %s9311_s28  }
  0x14   :  { %s9236_s7 = scalar_lea.hbm %s12337_s0, 8192 }
  0x15   :  { %p9237_p8 = scmp.ne.s32.totalorder %s12337_s0, %s9236_s7  ;;  %p9240_p9 = scmp.lt.u32.totalorder %s9236_s7, %s12337_s0 }
  0x17   :  { %p9242_p10 = pnand %p9240_p9, %p9237_p8 }
  0x19   :  { %9245 = shalt.err (!%p9242_p10)
}
  0x1a   :  { %s9246_s12 = scalar_lea.vmem %s9340_s18, 8192  ;;  %p9251_p12 = scmp.lt.s32.totalorder %s9340_s18, %s9340_s18 }
  0x1b   :  { %p9247_p11 = scmp.ne.s32.totalorder %s9340_s18, %s9246_s12  ;;  %p9252_p13 = scmp.lt.s32.totalorder %s9246_s12, %s9246_s12 }
  0x1d   :  { %p9253_p0 = por %p9252_p13, %p9251_p12 }
  0x1f   :  { %p9254_p1 = pnand %p9253_p0, %p9247_p11 }
  0x21   :  { %9257 = shalt.err (!%p9254_p1)
}
  0x22   :  { %23 = dma.hbm_to_vmem [thread:$0]  %s12337_s0, 8192, %s9340_s18, [#allocation4], %s9310_s27, %s9310_s27, %s9311_s28  }
  0x23   :  { %s9312_s14 = smov [#allocation8]   ;;  %s9258_s19 = scalar_lea.hbm %s12339_s2, 18432 }
  0x24   :  { %s41_s15 = sshll.u32 %s9312_s14, 4  ;;  %p9259_p2 = scmp.ne.s32.totalorder %s12339_s2, %s9258_s19  ;;  %s42_s15 = int_to_ptr.vmem [resolvable:$true] %s41_s15 }
  0x25   :  { %p9262_p3 = scmp.lt.u32.totalorder %s9258_s19, %s12339_s2 }
  0x27   :  { %p9264_p4 = pnand %p9262_p3, %p9259_p2 }
  0x29   :  { %9267 = shalt.err (!%p9264_p4)
}
  0x2a   :  { %s9268_s24 = scalar_lea.vmem %s42_s15, 18432  ;;  %p9273_p6 = scmp.lt.s32.totalorder %s42_s15, %s42_s15 }
  0x2b   :  { %p9269_p5 = scmp.ne.s32.totalorder %s42_s15, %s9268_s24  ;;  %p9274_p7 = scmp.lt.s32.totalorder %s9268_s24, %s9268_s24 }
  0x2d   :  { %p9275_p8 = por %p9274_p7, %p9273_p6 }
  0x2f   :  { %p9276_p9 = pnand %p9275_p8, %p9269_p5 }
  0x31   :  { %9279 = shalt.err (!%p9276_p9)
}
  0x32   :  { %47 = dma.hbm_to_vmem [thread:$0]  %s12339_s2, 18432, %s42_s15, [#allocation7], %s9310_s27, %s9310_s27, %s9311_s28  }
  0x33   :  { %9302 = dma.done.wait [#allocation4], 8192  }
  0x34   :  { %9303 = vsyncadd [#allocation4], 4294959104 }
  0x35   :  { %9304 = dma.done.wait [#allocation7], 20480  }
  0x36   :  { %9305 = vsyncadd [#allocation7], 4294946816  ;;  %v123_v0 = vld [vmem:[#allocation6] sm:$0xff]  ;;  %v124_v1 = vld [vmem:[#allocation6 + $0x8] sm:$0xff] }
  0x37   :  { %v125_v2 = vld [vmem:[#allocation6 + $0x10] sm:$0xff]  ;;  %v8369_v3 = vpack.c.bf16 %v124_v1, %v123_v0  ;;  %v126_v4 = vld [vmem:[#allocation6 + $0x18] sm:$0xff]  ;;  %v127_v6 = vld [vmem:[#allocation6 + $0x20] sm:$0xff] }
  0x38   :  { %v8373_v5 = vpack.c.bf16 %v126_v4, %v125_v2  ;;  %v128_v7 = vld [vmem:[#allocation6 + $0x28] sm:$0xff]  ;;  %v59_v9 = vld [vmem:[#allocation3] sm:$0xff]  ;;  %v129_v10 = vld [vmem:[#allocation6 + $0x30] sm:$0xff] }
  0x39   :  { %8370 = vmatprep.subr.bf16.mxu0 %v8369_v3  ;;  %v8377_v8 = vpack.c.bf16 %v128_v7, %v127_v6  ;;  %v130_v11 = vld [vmem:[#allocation6 + $0x38] sm:$0xff]  ;;  %7121 = vmatprep.mubr.f32.mxu0 %v59_v9  ;;  %v131_v13 = vld [vmem:[#allocation6 + $0x40] sm:$0xff]  ;;  %v132_v14 = vld [vmem:[#allocation6 + $0x48] sm:$0xff] }
  0x3a   :  { %8372 = vmatpush3.bf16.msra.mxu0 %v8369_v3  ;;  %v8381_v12 = vpack.c.bf16 %v130_v11, %v129_v10  ;;  %v8385_v15 = vpack.c.bf16 %v132_v14, %v131_v13  ;;  %v133_v16 = vld [vmem:[#allocation6 + $0x50] sm:$0xff]  ;;  %v134_v17 = vld [vmem:[#allocation6 + $0x58] sm:$0xff]  ;;  %v135_v19 = vld [vmem:[#allocation6 + $0x60] sm:$0xff] }
  0x3b   :  { %8374 = vmatprep.subr.bf16.mxu0 %v8373_v5  ;;  %v8389_v18 = vpack.c.bf16 %v134_v17, %v133_v16  ;;  %v136_v20 = vld [vmem:[#allocation6 + $0x68] sm:$0xff]  ;;  %v137_v22 = vld [vmem:[#allocation6 + $0x70] sm:$0xff]  ;;  %v138_v23 = vld [vmem:[#allocation6 + $0x78] sm:$0xff] }
  0x3c   :  { %v8393_v21 = vpack.c.bf16 %v136_v20, %v135_v19  ;;  %v8397_v24 = vpack.c.bf16 %v138_v23, %v137_v22  ;;  %v60_v25 = vld [vmem:[#allocation3 + $0x8] sm:$0xff]  ;;  %v61_v26 = vld [vmem:[#allocation3 + $0x10] sm:$0xff]  ;;  %v62_v27 = vld [vmem:[#allocation3 + $0x18] sm:$0xff] }
  0x3d   :  { %v63_v28 = vld [vmem:[#allocation3 + $0x20] sm:$0xff]  ;;  %v64_v29 = vld [vmem:[#allocation3 + $0x28] sm:$0xff]  ;;  %v65_v30 = vld [vmem:[#allocation3 + $0x30] sm:$0xff] }
  0x3e   :  { %8376 = vmatpush3.bf16.msra.mxu0 %v8373_v5  ;;  %v66_v31 = vld [vmem:[#allocation3 + $0x38] sm:$0xff]  ;;  %v67_v32 = vld [vmem:[#allocation3 + $0x40] sm:$0xff]  ;;  %v68_v33 = vld [vmem:[#allocation3 + $0x48] sm:$0xff]  ;;  %v9313_v5 = vmov 0.0  }
  0x3f   :  { %8378 = vmatprep.subr.bf16.mxu0 %v8377_v8  ;;  %v69_v34 = vld [vmem:[#allocation3 + $0x50] sm:$0xff]  ;;  %v70_v35 = vld [vmem:[#allocation3 + $0x58] sm:$0xff]  ;;  %v71_v36 = vld [vmem:[#allocation3 + $0x60] sm:$0xff]  ;;  %926 = vst [vmem:[#allocation2 + $0x20] sm:$0xff] %v9313_v5 }
  0x40   :  { %v72_v37 = vld [vmem:[#allocation3 + $0x68] sm:$0xff]  ;;  %v73_v38 = vld [vmem:[#allocation3 + $0x70] sm:$0xff]  ;;  %v74_v39 = vld [vmem:[#allocation3 + $0x78] sm:$0xff]  ;;  %927 = vst [vmem:[#allocation2 + $0x28] sm:$0x3] %v9313_v5 }
  0x41   :  { %v75_v40 = vld [vmem:[#allocation3 + $0x80] sm:$0xff]  ;;  %v76_v41 = vld [vmem:[#allocation3 + $0x88] sm:$0xff]  ;;  %v77_v42 = vld [vmem:[#allocation3 + $0x90] sm:$0xff]  ;;  %922 = vst [vmem:[#allocation2] sm:$0xff] %v9313_v5 }
  0x42   :  { %8380 = vmatpush3.bf16.msra.mxu0 %v8377_v8  ;;  %v78_v43 = vld [vmem:[#allocation3 + $0x98] sm:$0xff]  ;;  %v79_v44 = vld [vmem:[#allocation3 + $0xa0] sm:$0xff]  ;;  %v80_v45 = vld [vmem:[#allocation3 + $0xa8] sm:$0xff]  ;;  %923 = vst [vmem:[#allocation2 + $0x8] sm:$0xff] %v9313_v5 }
  0x43   :  { %8382 = vmatprep.subr.bf16.mxu0 %v8381_v12  ;;  %v81_v46 = vld [vmem:[#allocation3 + $0xb0] sm:$0xff]  ;;  %v82_v47 = vld [vmem:[#allocation3 + $0xb8] sm:$0xff]  ;;  %v83_v48 = vld [vmem:[#allocation3 + $0xc0] sm:$0xff]  ;;  %924 = vst [vmem:[#allocation2 + $0x10] sm:$0x3] %v9313_v5 }
  0x44   :  { %v84_v49 = vld [vmem:[#allocation3 + $0xc8] sm:$0xff]  ;;  %v85_v50 = vld [vmem:[#allocation3 + $0xd0] sm:$0xff]  ;;  %v86_v51 = vld [vmem:[#allocation3 + $0xd8] sm:$0xff]  ;;  %925 = vst [vmem:[#allocation2 + $0x18] sm:$0xff] %v9313_v5 }
  0x45   :  { %v87_v52 = vld [vmem:[#allocation3 + $0xe0] sm:$0xff]  ;;  %v88_v53 = vld [vmem:[#allocation3 + $0xe8] sm:$0xff]  ;;  %v89_v54 = vld [vmem:[#allocation3 + $0xf0] sm:$0xff]  ;;  %928 = vst [vmem:[#allocation2 + $0x30] sm:$0xff] %v9313_v5 }
  0x46   :  { %8384 = vmatpush3.bf16.msra.mxu0 %v8381_v12  ;;  %v90_v55 = vld [vmem:[#allocation3 + $0xf8] sm:$0xff]  ;;  %v91_v56 = vld [vmem:[#allocation3 + $0x100] sm:$0xff]  ;;  %v92_v57 = vld [vmem:[#allocation3 + $0x108] sm:$0xff]  ;;  %929 = vst [vmem:[#allocation2 + $0x38] sm:$0xff] %v9313_v5 }
  0x47   :  { %8386 = vmatprep.subr.bf16.mxu0 %v8385_v15  ;;  %v93_v58 = vld [vmem:[#allocation3 + $0x110] sm:$0xff]  ;;  %v94_v59 = vld [vmem:[#allocation3 + $0x118] sm:$0xff]  ;;  %v95_v60 = vld [vmem:[#allocation3 + $0x120] sm:$0xff]  ;;  %930 = vst [vmem:[#allocation2 + $0x40] sm:$0x3] %v9313_v5 }
  0x48   :  { %v96_v61 = vld [vmem:[#allocation3 + $0x128] sm:$0xff]  ;;  %v97_v62 = vld [vmem:[#allocation3 + $0x130] sm:$0xff]  ;;  %v98_v63 = vld [vmem:[#allocation3 + $0x138] sm:$0xff]  ;;  %931 = vst [vmem:[#allocation2 + $0x48] sm:$0xff] %v9313_v5 }
  0x49   :  { %v99_v0 = vld [vmem:[#allocation3 + $0x140] sm:$0xff]  ;;  %v100_v1 = vld [vmem:[#allocation3 + $0x148] sm:$0xff]  ;;  %v101_v2 = vld [vmem:[#allocation3 + $0x150] sm:$0xff]  ;;  %932 = vst [vmem:[#allocation2 + $0x50] sm:$0xff] %v9313_v5 }
  0x4a   :  { %8388 = vmatpush3.bf16.msra.mxu0 %v8385_v15  ;;  %v102_v3 = vld [vmem:[#allocation3 + $0x158] sm:$0xff]  ;;  %v9392_v4 = vld [vmem:[#allocation3 + $0x160] sm:$0xff]  ;;  %933 = vst [vmem:[#allocation2 + $0x58] sm:$0x3] %v9313_v5  ;;  %934 = vst [vmem:[#allocation2 + $0x60] sm:$0xff] %v9313_v5 }
  0x4b   :  { %8390 = vmatprep.subr.bf16.mxu0 %v8389_v18  ;;  %935 = vst [vmem:[#allocation2 + $0x68] sm:$0xff] %v9313_v5  ;;  %936 = vst [vmem:[#allocation2 + $0x70] sm:$0x3] %v9313_v5  ;;  %v104_v6 = vld [vmem:[#allocation3 + $0x168] sm:$0xff]  ;;  %v105_v7 = vld [vmem:[#allocation3 + $0x170] sm:$0xff] }
  0x4c   :  { %937 = vst [vmem:[#allocation2 + $0x78] sm:$0xff] %v9313_v5  ;;  %938 = vst [vmem:[#allocation2 + $0x80] sm:$0xff] %v9313_v5  ;;  %v106_v8 = vld [vmem:[#allocation3 + $0x178] sm:$0xff]  ;;  %v107_v9 = vld [vmem:[#allocation3 + $0x180] sm:$0xff] }
  0x4d   :  { %939 = vst [vmem:[#allocation2 + $0x88] sm:$0x3] %v9313_v5  ;;  %940 = vst [vmem:[#allocation2 + $0x90] sm:$0xff] %v9313_v5  ;;  %v108_v10 = vld [vmem:[#allocation3 + $0x188] sm:$0xff]  ;;  %v109_v11 = vld [vmem:[#allocation3 + $0x190] sm:$0xff] }
  0x4e   :  { %8392 = vmatpush3.bf16.msra.mxu0 %v8389_v18  ;;  %941 = vst [vmem:[#allocation2 + $0x98] sm:$0xff] %v9313_v5  ;;  %942 = vst [vmem:[#allocation2 + $0xa0] sm:$0x3] %v9313_v5  ;;  %v110_v12 = vld [vmem:[#allocation3 + $0x198] sm:$0xff]  ;;  %v111_v13 = vld [vmem:[#allocation3 + $0x1a0] sm:$0xff] }
  0x4f   :  { %8394 = vmatprep.subr.bf16.mxu0 %v8393_v21  ;;  %943 = vst [vmem:[#allocation2 + $0xa8] sm:$0xff] %v9313_v5  ;;  %944 = vst [vmem:[#allocation2 + $0xb0] sm:$0xff] %v9313_v5  ;;  %v112_v14 = vld [vmem:[#allocation3 + $0x1a8] sm:$0xff]  ;;  %v113_v15 = vld [vmem:[#allocation3 + $0x1b0] sm:$0xff] }
  0x50   :  { %945 = vst [vmem:[#allocation2 + $0xb8] sm:$0x3] %v9313_v5  ;;  %946 = vst [vmem:[#allocation2 + $0xc0] sm:$0xff] %v9313_v5  ;;  %v114_v16 = vld [vmem:[#allocation3 + $0x1b8] sm:$0xff]  ;;  %v115_v17 = vld [vmem:[#allocation3 + $0x1c0] sm:$0xff] }
  0x51   :  { %947 = vst [vmem:[#allocation2 + $0xc8] sm:$0xff] %v9313_v5  ;;  %948 = vst [vmem:[#allocation2 + $0xd0] sm:$0x3] %v9313_v5  ;;  %v116_v18 = vld [vmem:[#allocation3 + $0x1c8] sm:$0xff]  ;;  %v117_v19 = vld [vmem:[#allocation3 + $0x1d0] sm:$0xff] }
  0x52   :  { %8396 = vmatpush3.bf16.msra.mxu0 %v8393_v21  ;;  %949 = vst [vmem:[#allocation2 + $0xd8] sm:$0xff] %v9313_v5  ;;  %950 = vst [vmem:[#allocation2 + $0xe0] sm:$0xff] %v9313_v5  ;;  %v118_v20 = vld [vmem:[#allocation3 + $0x1d8] sm:$0xff]  ;;  %v119_v21 = vld [vmem:[#allocation3 + $0x1e0] sm:$0xff] }
  0x53   :  { %8398 = vmatprep.subr.bf16.mxu0 %v8397_v24  ;;  %951 = vst [vmem:[#allocation2 + $0xe8] sm:$0x3] %v9313_v5  ;;  %952 = vst [vmem:[#allocation2 + $0xf0] sm:$0xff] %v9313_v5  ;;  %v120_v22 = vld [vmem:[#allocation3 + $0x1e8] sm:$0xff]  ;;  %v121_v23 = vld [vmem:[#allocation3 + $0x1f0] sm:$0xff] }
  0x54   :  { %953 = vst [vmem:[#allocation2 + $0xf8] sm:$0xff] %v9313_v5  ;;  %954 = vst [vmem:[#allocation2 + $0x100] sm:$0x3] %v9313_v5 }
  0x55   :  { %955 = vst [vmem:[#allocation2 + $0x108] sm:$0xff] %v9313_v5  ;;  %956 = vst [vmem:[#allocation2 + $0x110] sm:$0xff] %v9313_v5 }
  0x56   :  { %8400 = vmatpush3.bf16.msra.mxu0 %v8397_v24  ;;  %957 = vst [vmem:[#allocation2 + $0x118] sm:$0x3] %v9313_v5  ;;  %958 = vst [vmem:[#allocation2 + $0x120] sm:$0xff] %v9313_v5  ;;  %v122_v24 = vld [vmem:[#allocation3 + $0x1f8] sm:$0xff] }
  0x57   :  { %959 = vst [vmem:[#allocation2 + $0x128] sm:$0xff] %v9313_v5  ;;  %960 = vst [vmem:[#allocation2 + $0x130] sm:$0x3] %v9313_v5 }
  0x58   :  { %961 = vst [vmem:[#allocation2 + $0x138] sm:$0xff] %v9313_v5  ;;  %962 = vst [vmem:[#allocation2 + $0x140] sm:$0xff] %v9313_v5 }
  0x59   :  { %7122 = vmatmul.mubr.f32.vlgmr.msra.gmra.mrb[0].mxu0 %v60_v25  ;;  %963 = vst [vmem:[#allocation2 + $0x148] sm:$0x3] %v9313_v5  ;;  %964 = vst [vmem:[#allocation2 + $0x150] sm:$0xff] %v9313_v5 }
  0x5a   :  { %7124 = vmatprep.mubr.f32.mxu0 %v61_v26  ;;  %965 = vst [vmem:[#allocation2 + $0x158] sm:$0xff] %v9313_v5  ;;  %966 = vst [vmem:[#allocation2 + $0x160] sm:$0x3] %v9313_v5 }
  0x5b   :  { %967 = vst [vmem:[#allocation2 + $0x168] sm:$0xff] %v9313_v5  ;;  %968 = vst [vmem:[#allocation2 + $0x170] sm:$0xff] %v9313_v5 }
  0x5c   :  { %969 = vst [vmem:[#allocation2 + $0x178] sm:$0x3] %v9313_v5  ;;  %970 = vst [vmem:[#allocation2 + $0x180] sm:$0xff] %v9313_v5 }
  0x5d   :  { %7125 = vmatmul.mubr.f32.gmra.mrb[2].mxu0 %v62_v27  ;;  %971 = vst [vmem:[#allocation2 + $0x188] sm:$0xff] %v9313_v5  ;;  %972 = vst [vmem:[#allocation2 + $0x190] sm:$0x3] %v9313_v5 }
  0x5e   :  { %7127 = vmatprep.mubr.f32.mxu0 %v63_v28  ;;  %973 = vst [vmem:[#allocation2 + $0x198] sm:$0xff] %v9313_v5  ;;  %974 = vst [vmem:[#allocation2 + $0x1a0] sm:$0xff] %v9313_v5 }
  0x5f   :  { %975 = vst [vmem:[#allocation2 + $0x1a8] sm:$0x3] %v9313_v5  ;;  %976 = vst [vmem:[#allocation2 + $0x1b0] sm:$0xff] %v9313_v5 }
  0x60   :  { %977 = vst [vmem:[#allocation2 + $0x1b8] sm:$0xff] %v9313_v5  ;;  %978 = vst [vmem:[#allocation2 + $0x1c0] sm:$0x3] %v9313_v5 }
  0x61   :  { %7128 = vmatmul.mubr.f32.gmra.mrb[4].mxu0 %v64_v29  ;;  %979 = vst [vmem:[#allocation2 + $0x1c8] sm:$0xff] %v9313_v5  ;;  %980 = vst [vmem:[#allocation2 + $0x1d0] sm:$0xff] %v9313_v5 }
  0x62   :  { %7130 = vmatprep.mubr.f32.mxu0 %v65_v30  ;;  %981 = vst [vmem:[#allocation2 + $0x1d8] sm:$0x3] %v9313_v5  ;;  %982 = vst [vmem:[#allocation2 + $0x1e0] sm:$0xff] %v9313_v5 }
  0x63   :  { %983 = vst [vmem:[#allocation2 + $0x1e8] sm:$0xff] %v9313_v5  ;;  %984 = vst [vmem:[#allocation2 + $0x1f0] sm:$0x3] %v9313_v5 }
  0x64   :  { %985 = vst [vmem:[#allocation2 + $0x1f8] sm:$0xff] %v9313_v5  ;;  %986 = vst [vmem:[#allocation2 + $0x200] sm:$0xff] %v9313_v5 }
  0x65   :  { %7131 = vmatmul.mubr.f32.gmra.mrb[6].mxu0 %v66_v31  ;;  %987 = vst [vmem:[#allocation2 + $0x208] sm:$0x3] %v9313_v5  ;;  %988 = vst [vmem:[#allocation2 + $0x210] sm:$0xff] %v9313_v5 }
  0x66   :  { %7133 = vmatprep.mubr.f32.mxu0 %v67_v32  ;;  %989 = vst [vmem:[#allocation2 + $0x218] sm:$0xff] %v9313_v5  ;;  %990 = vst [vmem:[#allocation2 + $0x220] sm:$0x3] %v9313_v5 }
  0x67   :  { %991 = vst [vmem:[#allocation2 + $0x228] sm:$0xff] %v9313_v5  ;;  %992 = vst [vmem:[#allocation2 + $0x230] sm:$0xff] %v9313_v5 }
  0x68   :  { %993 = vst [vmem:[#allocation2 + $0x238] sm:$0x3] %v9313_v5  ;;  %994 = vst [vmem:[#allocation2 + $0x240] sm:$0xff] %v9313_v5 }
  0x69   :  { %7134 = vmatmul.mubr.f32.gmra.mrb[8].mxu0 %v68_v33  ;;  %995 = vst [vmem:[#allocation2 + $0x248] sm:$0xff] %v9313_v5  ;;  %996 = vst [vmem:[#allocation2 + $0x250] sm:$0x3] %v9313_v5 }
  0x6a   :  { %7136 = vmatprep.mubr.f32.mxu0 %v69_v34  ;;  %997 = vst [vmem:[#allocation2 + $0x258] sm:$0xff] %v9313_v5  ;;  %998 = vst [vmem:[#allocation2 + $0x260] sm:$0xff] %v9313_v5 }
  0x6b   :  { %999 = vst [vmem:[#allocation2 + $0x268] sm:$0x3] %v9313_v5  ;;  %1000 = vst [vmem:[#allocation2 + $0x270] sm:$0xff] %v9313_v5 }
  0x6c   :  { %1001 = vst [vmem:[#allocation2 + $0x278] sm:$0xff] %v9313_v5  ;;  %1002 = vst [vmem:[#allocation2 + $0x280] sm:$0x3] %v9313_v5 }
  0x6d   :  { %7137 = vmatmul.mubr.f32.gmra.mrb[10].mxu0 %v70_v35  ;;  %1003 = vst [vmem:[#allocation2 + $0x288] sm:$0xff] %v9313_v5  ;;  %1004 = vst [vmem:[#allocation2 + $0x290] sm:$0xff] %v9313_v5 }
  0x6e   :  { %7139 = vmatprep.mubr.f32.mxu0 %v71_v36  ;;  %1005 = vst [vmem:[#allocation2 + $0x298] sm:$0x3] %v9313_v5  ;;  %1006 = vst [vmem:[#allocation2 + $0x2a0] sm:$0xff] %v9313_v5 }
  0x6f   :  { %1007 = vst [vmem:[#allocation2 + $0x2a8] sm:$0xff] %v9313_v5  ;;  %1008 = vst [vmem:[#allocation2 + $0x2b0] sm:$0x3] %v9313_v5 }
  0x70   :  { %1009 = vst [vmem:[#allocation2 + $0x2b8] sm:$0xff] %v9313_v5  ;;  %1010 = vst [vmem:[#allocation2 + $0x2c0] sm:$0xff] %v9313_v5 }
  0x71   :  { %7140 = vmatmul.mubr.f32.gmra.mrb[12].mxu0 %v72_v37  ;;  %1011 = vst [vmem:[#allocation2 + $0x2c8] sm:$0x3] %v9313_v5  ;;  %1012 = vst [vmem:[#allocation2 + $0x2d0] sm:$0xff] %v9313_v5 }
  0x72   :  { %7142 = vmatprep.mubr.f32.mxu0 %v73_v38  ;;  %1013 = vst [vmem:[#allocation2 + $0x2d8] sm:$0xff] %v9313_v5  ;;  %1014 = vst [vmem:[#allocation2 + $0x2e0] sm:$0x3] %v9313_v5 }
  0x73   :  { %1015 = vst [vmem:[#allocation2 + $0x2e8] sm:$0xff] %v9313_v5  ;;  %1016 = vst [vmem:[#allocation2 + $0x2f0] sm:$0xff] %v9313_v5 }
  0x74   :  { %1017 = vst [vmem:[#allocation2 + $0x2f8] sm:$0x3] %v9313_v5  ;;  %1018 = vst [vmem:[#allocation2 + $0x300] sm:$0xff] %v9313_v5 }
  0x75   :  { %7143 = vmatmul.mubr.f32.gmra.mrb[14].mxu0 %v74_v39  ;;  %1019 = vst [vmem:[#allocation2 + $0x308] sm:$0xff] %v9313_v5  ;;  %1020 = vst [vmem:[#allocation2 + $0x310] sm:$0x3] %v9313_v5 }
  0x76   :  { %7145 = vmatprep.mubr.f32.mxu0 %v75_v40  ;;  %1021 = vst [vmem:[#allocation2 + $0x318] sm:$0xff] %v9313_v5  ;;  %1022 = vst [vmem:[#allocation2 + $0x320] sm:$0xff] %v9313_v5 }
  0x77   :  { %1023 = vst [vmem:[#allocation2 + $0x328] sm:$0x3] %v9313_v5  ;;  %1024 = vst [vmem:[#allocation2 + $0x330] sm:$0xff] %v9313_v5 }
  0x78   :  { %1025 = vst [vmem:[#allocation2 + $0x338] sm:$0xff] %v9313_v5  ;;  %1026 = vst [vmem:[#allocation2 + $0x340] sm:$0x3] %v9313_v5 }
  0x79   :  { %7146 = vmatmul.mubr.f32.gmra.mrb[16].mxu0 %v76_v41  ;;  %1027 = vst [vmem:[#allocation2 + $0x348] sm:$0xff] %v9313_v5  ;;  %1028 = vst [vmem:[#allocation2 + $0x350] sm:$0xff] %v9313_v5 }
  0x7a   :  { %7148 = vmatprep.mubr.f32.mxu0 %v77_v42  ;;  %1029 = vst [vmem:[#allocation2 + $0x358] sm:$0x3] %v9313_v5 }
  0x7d   :  { %7149 = vmatmul.mubr.f32.gmra.mrb[18].mxu0 %v78_v43 }
  0x7e   :  { %7151 = vmatprep.mubr.f32.mxu0 %v79_v44 }
  0x81   :  { %7152 = vmatmul.mubr.f32.gmra.mrb[20].mxu0 %v80_v45 }
  0x82   :  { %7154 = vmatprep.mubr.f32.mxu0 %v81_v46 }
  0x85   :  { %7155 = vmatmul.mubr.f32.gmra.mrb[22].mxu0 %v82_v47 }
  0x86   :  { %7157 = vmatprep.mubr.f32.mxu0 %v83_v48 }
  0x89   :  { %7158 = vmatmul.mubr.f32.gmra.mrb[24].mxu0 %v84_v49 }
  0x8a   :  { %7160 = vmatprep.mubr.f32.mxu0 %v85_v50 }
  0x8d   :  { %7161 = vmatmul.mubr.f32.gmra.mrb[26].mxu0 %v86_v51 }
  0x8e   :  { %7163 = vmatprep.mubr.f32.mxu0 %v87_v52 }
  0x91   :  { %7164 = vmatmul.mubr.f32.gmra.mrb[28].mxu0 %v88_v53 }
  0x92   :  { %7166 = vmatprep.mubr.f32.mxu0 %v89_v54 }
  0x95   :  { %7167 = vmatmul.mubr.f32.gmra.mrb[30].mxu0 %v90_v55 }
  0x96   :  { %7169 = vmatprep.mubr.f32.mxu0 %v91_v56 }
  0x99   :  { %7170 = vmatmul.mubr.f32.gmra.mrb[32].mxu0 %v92_v57 }
  0x9a   :  { %7172 = vmatprep.mubr.f32.mxu0 %v93_v58 }
  0x9d   :  { %7173 = vmatmul.mubr.f32.gmra.mrb[34].mxu0 %v94_v59 }
  0x9e   :  { %7175 = vmatprep.mubr.f32.mxu0 %v95_v60 }
  0xa1   :  { %7176 = vmatmul.mubr.f32.gmra.mrb[36].mxu0 %v96_v61 }
  0xa2   :  { %7178 = vmatprep.mubr.f32.mxu0 %v97_v62 }
  0xa5   :  { %7179 = vmatmul.mubr.f32.gmra.mrb[38].mxu0 %v98_v63 }
  0xa6   :  { %7181 = vmatprep.mubr.f32.mxu0 %v99_v0 }
  0xa9   :  { %7182 = vmatmul.mubr.f32.gmra.mrb[40].mxu0 %v100_v1 }
  0xaa   :  { %7184 = vmatprep.mubr.f32.mxu0 %v101_v2 }
  0xad   :  { %7185 = vmatmul.mubr.f32.gmra.mrb[42].mxu0 %v102_v3 }
  0xae   :  { %7187 = vmatprep.mubr.f32.mxu0 %v9392_v4 }
  0xb1   :  { %7188 = vmatmul.mubr.f32.gmra.mrb[44].mxu0 %v104_v6 }
  0xb2   :  { %7190 = vmatprep.mubr.f32.mxu0 %v105_v7 }
  0xb5   :  { %7191 = vmatmul.mubr.f32.gmra.mrb[46].mxu0 %v106_v8 }
  0xb6   :  { %7193 = vmatprep.mubr.f32.mxu0 %v107_v9 }
  0xb9   :  { %7194 = vmatmul.mubr.f32.gmra.mrb[48].mxu0 %v108_v10 }
  0xba   :  { %7196 = vmatprep.mubr.f32.mxu0 %v109_v11 }
  0xbd   :  { %7197 = vmatmul.mubr.f32.gmra.mrb[50].mxu0 %v110_v12 }
  0xbe   :  { %7199 = vmatprep.mubr.f32.mxu0 %v111_v13 }
  0xc1   :  { %7200 = vmatmul.mubr.f32.gmra.mrb[52].mxu0 %v112_v14 }
  0xc2   :  { %7202 = vmatprep.mubr.f32.mxu0 %v113_v15 }
  0xc5   :  { %7203 = vmatmul.mubr.f32.gmra.mrb[54].mxu0 %v114_v16 }
  0xc6   :  { %7205 = vmatprep.mubr.f32.mxu0 %v115_v17 }
  0xc9   :  { %7206 = vmatmul.mubr.f32.gmra.mrb[56].mxu0 %v116_v18 }
  0xca   :  { %7208 = vmatprep.mubr.f32.mxu0 %v117_v19 }
  0xcd   :  { %7209 = vmatmul.mubr.f32.gmra.mrb[58].mxu0 %v118_v20 }
  0xce   :  { %7211 = vmatprep.mubr.f32.mxu0 %v119_v21 }
  0xd1   :  { %7212 = vmatmul.mubr.f32.gmra.mrb[60].mxu0 %v120_v22 }
  0xd2   :  { %7214 = vmatprep.mubr.f32.mxu0 %v121_v23 }
  0xd5   :  { %7215 = vmatmul.mubr.f32.gmra.mrb[62].mxu0 %v122_v24 }
 0x12c   :  { %v9503_v25 = vpop.f32.mrb[0].mxu0 }
 0x12d   :  { %v9505_v26 = vpop.f32.mrb[1].mxu0 }
 0x12e   :  { %v524_v27 = vadd.f32 %v9503_v25, %v9505_v26 }
 0x130   :  { %v9509_v28 = vpop.f32.mrb[2].mxu0 }
 0x131   :  { %v9511_v29 = vpop.f32.mrb[3].mxu0 }
 0x132   :  { %v525_v30 = vadd.f32 %v524_v27, %v9511_v29 }
 0x134   :  { %v526_v31 = vadd.f32 %v9509_v28, %v525_v30  ;;  %v9515_v32 = vpop.f32.mrb[4].mxu0 }
 0x135   :  { %v9517_v33 = vpop.f32.mrb[5].mxu0 }
 0x136   :  { %v527_v34 = vadd.f32 %v526_v31, %v9517_v33 }
 0x138   :  { %v9520_v35 = vpop.f32.mrb[6].mxu0  ;;  %v528_v36 = vadd.f32 %v9515_v32, %v527_v34 }
 0x139   :  { %v9523_v37 = vpop.f32.mrb[7].mxu0 }
 0x13a   :  { %v529_v38 = vadd.f32 %v528_v36, %v9523_v37 }
 0x13c   :  { %v9526_v39 = vpop.f32.mrb[8].mxu0  ;;  %v530_v40 = vadd.f32 %v9520_v35, %v529_v38 }
 0x13d   :  { %v9529_v41 = vpop.f32.mrb[9].mxu0 }
 0x13e   :  { %v531_v42 = vadd.f32 %v530_v40, %v9529_v41 }
 0x140   :  { %v9532_v43 = vpop.f32.mrb[10].mxu0  ;;  %v532_v44 = vadd.f32 %v9526_v39, %v531_v42 }
 0x141   :  { %v9535_v45 = vpop.f32.mrb[11].mxu0 }
 0x142   :  { %v533_v46 = vadd.f32 %v532_v44, %v9535_v45 }
 0x144   :  { %v9538_v47 = vpop.f32.mrb[12].mxu0  ;;  %v534_v48 = vadd.f32 %v9532_v43, %v533_v46 }
 0x145   :  { %v9541_v49 = vpop.f32.mrb[13].mxu0 }
 0x146   :  { %v535_v50 = vadd.f32 %v534_v48, %v9541_v49 }
 0x148   :  { %v9544_v51 = vpop.f32.mrb[14].mxu0  ;;  %v536_v52 = vadd.f32 %v9538_v47, %v535_v50 }
 0x149   :  { %v9547_v53 = vpop.f32.mrb[15].mxu0 }
 0x14a   :  { %v537_v54 = vadd.f32 %v536_v52, %v9547_v53 }
 0x14c   :  { %v9550_v55 = vpop.f32.mrb[16].mxu0  ;;  %v538_v56 = vadd.f32 %v9544_v51, %v537_v54 }
 0x14d   :  { %v9553_v57 = vpop.f32.mrb[17].mxu0 }
 0x14e   :  { %v539_v58 = vadd.f32 %v538_v56, %v9553_v57 }
 0x150   :  { %v9556_v59 = vpop.f32.mrb[18].mxu0  ;;  %v540_v60 = vadd.f32 %v9550_v55, %v539_v58 }
 0x151   :  { %v9559_v61 = vpop.f32.mrb[19].mxu0 }
 0x152   :  { %v541_v62 = vadd.f32 %v540_v60, %v9559_v61 }
 0x154   :  { %v9562_v63 = vpop.f32.mrb[20].mxu0  ;;  %v542_v0 = vadd.f32 %v9556_v59, %v541_v62 }
 0x155   :  { %v9565_v1 = vpop.f32.mrb[21].mxu0 }
 0x156   :  { %v543_v2 = vadd.f32 %v542_v0, %v9565_v1 }
 0x158   :  { %v9568_v3 = vpop.f32.mrb[22].mxu0  ;;  %v544_v4 = vadd.f32 %v9562_v63, %v543_v2 }
 0x159   :  { %v9571_v5 = vpop.f32.mrb[23].mxu0 }
 0x15a   :  { %v545_v6 = vadd.f32 %v544_v4, %v9571_v5 }
 0x15c   :  { %v9574_v7 = vpop.f32.mrb[24].mxu0  ;;  %v546_v8 = vadd.f32 %v9568_v3, %v545_v6 }
 0x15d   :  { %v9577_v9 = vpop.f32.mrb[25].mxu0 }
 0x15e   :  { %v547_v10 = vadd.f32 %v546_v8, %v9577_v9 }
 0x160   :  { %v9580_v11 = vpop.f32.mrb[26].mxu0  ;;  %v548_v12 = vadd.f32 %v9574_v7, %v547_v10 }
 0x161   :  { %v9583_v13 = vpop.f32.mrb[27].mxu0 }
 0x162   :  { %v549_v14 = vadd.f32 %v548_v12, %v9583_v13 }
 0x164   :  { %v9586_v15 = vpop.f32.mrb[28].mxu0  ;;  %v550_v16 = vadd.f32 %v9580_v11, %v549_v14 }
 0x165   :  { %v9589_v17 = vpop.f32.mrb[29].mxu0 }
 0x166   :  { %v551_v18 = vadd.f32 %v550_v16, %v9589_v17 }
 0x168   :  { %v9592_v19 = vpop.f32.mrb[30].mxu0  ;;  %v552_v20 = vadd.f32 %v9586_v15, %v551_v18 }
 0x169   :  { %v9595_v21 = vpop.f32.mrb[31].mxu0 }
 0x16a   :  { %v553_v22 = vadd.f32 %v552_v20, %v9595_v21 }
 0x16c   :  { %v9598_v23 = vpop.f32.mrb[32].mxu0  ;;  %v554_v24 = vadd.f32 %v9592_v19, %v553_v22 }
 0x16d   :  { %v9601_v27 = vpop.f32.mrb[33].mxu0 }
 0x16e   :  { %v555_v30 = vadd.f32 %v554_v24, %v9601_v27 }
 0x170   :  { %v9604_v31 = vpop.f32.mrb[34].mxu0  ;;  %v556_v34 = vadd.f32 %v9598_v23, %v555_v30 }
 0x171   :  { %v9607_v36 = vpop.f32.mrb[35].mxu0 }
 0x172   :  { %v557_v38 = vadd.f32 %v556_v34, %v9607_v36 }
 0x174   :  { %v9610_v40 = vpop.f32.mrb[36].mxu0  ;;  %v558_v42 = vadd.f32 %v9604_v31, %v557_v38 }
 0x175   :  { %v9613_v44 = vpop.f32.mrb[37].mxu0 }
 0x176   :  { %v559_v46 = vadd.f32 %v558_v42, %v9613_v44 }
 0x178   :  { %v9616_v48 = vpop.f32.mrb[38].mxu0  ;;  %v560_v50 = vadd.f32 %v9610_v40, %v559_v46 }
 0x179   :  { %v9619_v52 = vpop.f32.mrb[39].mxu0 }
 0x17a   :  { %v561_v54 = vadd.f32 %v560_v50, %v9619_v52 }
 0x17c   :  { %v9622_v56 = vpop.f32.mrb[40].mxu0  ;;  %v562_v58 = vadd.f32 %v9616_v48, %v561_v54 }
 0x17d   :  { %v9625_v60 = vpop.f32.mrb[41].mxu0 }
 0x17e   :  { %v563_v62 = vadd.f32 %v562_v58, %v9625_v60 }
 0x180   :  { %v9628_v0 = vpop.f32.mrb[42].mxu0  ;;  %v564_v2 = vadd.f32 %v9622_v56, %v563_v62 }
 0x181   :  { %v9631_v4 = vpop.f32.mrb[43].mxu0 }
 0x182   :  { %v565_v6 = vadd.f32 %v564_v2, %v9631_v4 }
 0x184   :  { %v9634_v8 = vpop.f32.mrb[44].mxu0  ;;  %v566_v10 = vadd.f32 %v9628_v0, %v565_v6 }
 0x185   :  { %v9637_v12 = vpop.f32.mrb[45].mxu0 }
 0x186   :  { %v567_v14 = vadd.f32 %v566_v10, %v9637_v12 }
 0x188   :  { %v9640_v16 = vpop.f32.mrb[46].mxu0  ;;  %v568_v18 = vadd.f32 %v9634_v8, %v567_v14 }
 0x189   :  { %v9643_v20 = vpop.f32.mrb[47].mxu0 }
 0x18a   :  { %v569_v22 = vadd.f32 %v568_v18, %v9643_v20 }
 0x18c   :  { %v9646_v24 = vpop.f32.mrb[48].mxu0  ;;  %v570_v30 = vadd.f32 %v9640_v16, %v569_v22 }
 0x18d   :  { %12495 = vst [vmem:[#allocation13_spill] sm:$0xff] %v9646_v24  ;;  %v9649_v34 = vpop.f32.mrb[49].mxu0 }
 0x18e   :  { %12496 = vst [vmem:[#allocation14_spill] sm:$0xff] %v9649_v34  ;;  %v571_v38 = vadd.f32 %v570_v30, %v9649_v34 }
 0x190   :  { %v9652_v42 = vpop.f32.mrb[50].mxu0  ;;  %v572_v46 = vadd.f32 %v9646_v24, %v571_v38 }
 0x191   :  { %12497 = vst [vmem:[#allocation15_spill] sm:$0xff] %v9652_v42  ;;  %v9655_v50 = vpop.f32.mrb[51].mxu0 }
 0x192   :  { %12498 = vst [vmem:[#allocation16_spill] sm:$0xff] %v9655_v50  ;;  %v573_v54 = vadd.f32 %v572_v46, %v9655_v50 }
 0x194   :  { %v9658_v58 = vpop.f32.mrb[52].mxu0  ;;  %v574_v62 = vadd.f32 %v9652_v42, %v573_v54 }
 0x195   :  { %12499 = vst [vmem:[#allocation17_spill] sm:$0xff] %v9658_v58  ;;  %v9661_v2 = vpop.f32.mrb[53].mxu0 }
 0x196   :  { %12500 = vst [vmem:[#allocation18_spill] sm:$0xff] %v9661_v2  ;;  %v575_v6 = vadd.f32 %v574_v62, %v9661_v2 }
 0x198   :  { %v9664_v10 = vpop.f32.mrb[54].mxu0  ;;  %v576_v14 = vadd.f32 %v9658_v58, %v575_v6 }
 0x199   :  { %12501 = vst [vmem:[#allocation19_spill] sm:$0xff] %v9664_v10  ;;  %v9667_v18 = vpop.f32.mrb[55].mxu0 }
 0x19a   :  { %12502 = vst [vmem:[#allocation20_spill] sm:$0xff] %v9667_v18  ;;  %v577_v22 = vadd.f32 %v576_v14, %v9667_v18 }
 0x19c   :  { %v9670_v30 = vpop.f32.mrb[56].mxu0  ;;  %v578_v38 = vadd.f32 %v9664_v10, %v577_v22 }
 0x19d   :  { %12503 = vst [vmem:[#allocation21_spill] sm:$0xff] %v9670_v30  ;;  %v9673_v46 = vpop.f32.mrb[57].mxu0 }
 0x19e   :  { %12504 = vst [vmem:[#allocation22_spill] sm:$0xff] %v9673_v46  ;;  %v579_v54 = vadd.f32 %v578_v38, %v9673_v46 }
 0x1a0   :  { %v9676_v42 = vpop.f32.mrb[58].mxu0  ;;  %v580_v62 = vadd.f32 %v9670_v30, %v579_v54 }
 0x1a1   :  { %12505 = vst [vmem:[#allocation23_spill] sm:$0xff] %v9676_v42  ;;  %v9679_v2 = vpop.f32.mrb[59].mxu0 }
 0x1a2   :  { %12506 = vst [vmem:[#allocation24_spill] sm:$0xff] %v9679_v2  ;;  %v581_v6 = vadd.f32 %v580_v62, %v9679_v2 }
 0x1a4   :  { %v9682_v58 = vpop.f32.mrb[60].mxu0  ;;  %v582_v14 = vadd.f32 %v9676_v42, %v581_v6 }
 0x1a5   :  { %v9685_v18 = vpop.f32.mrb[61].mxu0 }
 0x1a6   :  { %v583_v22 = vadd.f32 %v582_v14, %v9685_v18 }
 0x1a8   :  { %v9688_v10 = vpop.f32.mrb[62].mxu0  ;;  %v584_v38 = vadd.f32 %v9682_v58, %v583_v22 }
 0x1a9   :  { %v9691_v46 = vpop.f32.mrb[63].mxu0 }
 0x1aa   :  { %v585_v54 = vadd.f32 %v584_v38, %v9691_v46 }
 0x1ac   :  { %v586_v30 = vadd.f32 %v9688_v10, %v585_v54  ;;  %v12521_v54 = vld [vmem:[#allocation15_spill] sm:$0xff] }
 0x1ae   :  { %v587_v50 = vrot.slane %v586_v30, 4 }
 0x1b0   :  { %v588_v62 = vadd.f32 %v587_v50, %v586_v30  ;;  %v12519_v30 = vld [vmem:[#allocation16_spill] sm:$0xff] }
 0x1b2   :  { %v589_v2 = vrot.slane %v588_v62, 2 }
 0x1b4   :  { %v590_v24 = vadd.f32 %v589_v2, %v588_v62  ;;  %v12517_v2 = vld [vmem:[#allocation13_spill] sm:$0xff]  ;;  %v12523_v62 = vld [vmem:[#allocation18_spill] sm:$0xff] }
 0x1b6   :  { %v591_v34 = vrot.slane %v590_v24, 1 }
 0x1b8   :  { %v592_v6 = vadd.f32 %v591_v34, %v590_v24  ;;  %v12515_v34 = vld [vmem:[#allocation14_spill] sm:$0xff] }
 0x1ba   :  { %v9695_v42 = vmul.f32 0.001953125, %v592_v6  ;;  %v12525_v6 = vld [vmem:[#allocation17_spill] sm:$0xff] }
 0x1bc   :  { %v9699_v14 = vsub.f32 %v9505_v26, %v9695_v42  ;;  %v9703_v22 = vsub.f32 %v9503_v25, %v9695_v42  ;;  %v9707_v38 = vsub.f32 %v9511_v29, %v9695_v42  ;;  %v9711_v50 = vsub.f32 %v9509_v28, %v9695_v42 }
 0x1bd   :  { %v9715_v24 = vsub.f32 %v9517_v33, %v9695_v42  ;;  %v9719_v26 = vsub.f32 %v9515_v32, %v9695_v42  ;;  %v9723_v25 = vsub.f32 %v9523_v37, %v9695_v42  ;;  %v9727_v29 = vsub.f32 %v9520_v35, %v9695_v42 }
 0x1be   :  { %12507 = vst [vmem:[#allocation25_spill] sm:$0xff] %v9699_v14  ;;  %12508 = vst [vmem:[#allocation26_spill] sm:$0xff] %v9703_v22  ;;  %v9731_v28 = vsub.f32 %v9529_v41, %v9695_v42  ;;  %v9735_v33 = vsub.f32 %v9526_v39, %v9695_v42  ;;  %v9739_v32 = vsub.f32 %v9535_v45, %v9695_v42 }
 0x1bf   :  { %12509 = vst [vmem:[#allocation27_spill] sm:$0xff] %v9707_v38  ;;  %12510 = vst [vmem:[#allocation28_spill] sm:$0xff] %v9727_v29  ;;  %v9743_v37 = vsub.f32 %v9532_v43, %v9695_v42  ;;  %v9747_v35 = vsub.f32 %v9541_v49, %v9695_v42  ;;  %v9751_v41 = vsub.f32 %v9538_v47, %v9695_v42 }
 0x1c0   :  { %12511 = vst [vmem:[#allocation29_spill] sm:$0xff] %v9731_v28  ;;  %v9755_v39 = vsub.f32 %v9547_v53, %v9695_v42  ;;  %v9759_v45 = vsub.f32 %v9544_v51, %v9695_v42  ;;  %v9763_v43 = vsub.f32 %v9553_v57, %v9695_v42  ;;  %v9767_v49 = vsub.f32 %v9550_v55, %v9695_v42 }
 0x1c1   :  { %12512 = vst [vmem:[#allocation30_spill] sm:$0xff] %v9743_v37  ;;  %v9771_v47 = vsub.f32 %v9559_v61, %v9695_v42  ;;  %v9775_v53 = vsub.f32 %v9556_v59, %v9695_v42  ;;  %v9779_v51 = vsub.f32 %v9565_v1, %v9695_v42  ;;  %v9783_v57 = vsub.f32 %v9562_v63, %v9695_v42 }
 0x1c2   :  { %12513 = vst [vmem:[#allocation31_spill] sm:$0xff] %v9755_v39  ;;  %12514 = vst [vmem:[#allocation32_spill] sm:$0xff] %v9759_v45  ;;  %v9787_v55 = vsub.f32 %v9571_v5, %v9695_v42  ;;  %v9791_v61 = vsub.f32 %v9568_v3, %v9695_v42  ;;  %v9795_v59 = vsub.f32 %v9577_v9, %v9695_v42 }
 0x1c3   :  { %v9799_v1 = vsub.f32 %v9574_v7, %v9695_v42  ;;  %v9803_v63 = vsub.f32 %v9583_v13, %v9695_v42  ;;  %v9807_v5 = vsub.f32 %v9580_v11, %v9695_v42  ;;  %v9811_v3 = vsub.f32 %v9589_v17, %v9695_v42 }
 0x1c4   :  { %v9815_v9 = vsub.f32 %v9586_v15, %v9695_v42  ;;  %v9819_v7 = vsub.f32 %v9595_v21, %v9695_v42  ;;  %v9823_v13 = vsub.f32 %v9592_v19, %v9695_v42  ;;  %v9827_v11 = vsub.f32 %v9601_v27, %v9695_v42 }
 0x1c5   :  { %v9831_v17 = vsub.f32 %v9598_v23, %v9695_v42  ;;  %v9835_v15 = vsub.f32 %v9607_v36, %v9695_v42  ;;  %v9839_v21 = vsub.f32 %v9604_v31, %v9695_v42  ;;  %v9843_v19 = vsub.f32 %v9613_v44, %v9695_v42 }
 0x1c6   :  { %v9847_v27 = vsub.f32 %v9610_v40, %v9695_v42  ;;  %v9851_v23 = vsub.f32 %v9619_v52, %v9695_v42  ;;  %v9855_v36 = vsub.f32 %v9616_v48, %v9695_v42  ;;  %v9859_v31 = vsub.f32 %v9625_v60, %v9695_v42 }
 0x1c7   :  { %v9863_v44 = vsub.f32 %v9622_v56, %v9695_v42  ;;  %v9867_v40 = vsub.f32 %v9631_v4, %v9695_v42  ;;  %v9871_v52 = vsub.f32 %v9628_v0, %v9695_v42  ;;  %v9875_v48 = vsub.f32 %v9637_v12, %v9695_v42 }
 0x1c8   :  { %v9879_v60 = vsub.f32 %v9634_v8, %v9695_v42  ;;  %v9883_v56 = vsub.f32 %v9643_v20, %v9695_v42  ;;  %v9887_v4 = vsub.f32 %v9640_v16, %v9695_v42  ;;  %v9891_v0 = vsub.f32 %v12515_v34, %v9695_v42 }
 0x1c9   :  { %v9895_v12 = vsub.f32 %v12517_v2, %v9695_v42  ;;  %v9899_v8 = vsub.f32 %v12519_v30, %v9695_v42  ;;  %v9903_v20 = vsub.f32 %v12521_v54, %v9695_v42  ;;  %v9907_v16 = vsub.f32 %v12523_v62, %v9695_v42 }
 0x1ca   :  { %12516 = vst [vmem:[#allocation14_spill] sm:$0xff] %v9891_v0  ;;  %v9911_v34 = vsub.f32 %v12525_v6, %v9695_v42  ;;  %v12527_v0 = vld [vmem:[#allocation20_spill] sm:$0xff] }
 0x1cb   :  { %12518 = vst [vmem:[#allocation13_spill] sm:$0xff] %v9895_v12  ;;  %12520 = vst [vmem:[#allocation16_spill] sm:$0xff] %v9899_v8  ;;  %v9915_v2 = vsub.f32 %v12527_v0, %v9695_v42  ;;  %v12529_v12 = vld [vmem:[#allocation19_spill] sm:$0xff]  ;;  %v12531_v8 = vld [vmem:[#allocation22_spill] sm:$0xff] }
 0x1cc   :  { %12522 = vst [vmem:[#allocation15_spill] sm:$0xff] %v9903_v20  ;;  %12524 = vst [vmem:[#allocation18_spill] sm:$0xff] %v9907_v16  ;;  %v9919_v30 = vsub.f32 %v12529_v12, %v9695_v42  ;;  %v9923_v54 = vsub.f32 %v12531_v8, %v9695_v42  ;;  %v12533_v20 = vld [vmem:[#allocation21_spill] sm:$0xff]  ;;  %v12535_v16 = vld [vmem:[#allocation24_spill] sm:$0xff]  ;;  %v9939_v12 = vsub.f32 %v9685_v18, %v9695_v42 }
 0x1cd   :  { %12526 = vst [vmem:[#allocation17_spill] sm:$0xff] %v9911_v34  ;;  %12528 = vst [vmem:[#allocation20_spill] sm:$0xff] %v9915_v2  ;;  %v9927_v62 = vsub.f32 %v12533_v20, %v9695_v42  ;;  %v9931_v6 = vsub.f32 %v12535_v16, %v9695_v42  ;;  %v12537_v34 = vld [vmem:[#allocation23_spill] sm:$0xff]  ;;  %v9943_v8 = vsub.f32 %v9682_v58, %v9695_v42 }
 0x1ce   :  { %12530 = vst [vmem:[#allocation19_spill] sm:$0xff] %v9919_v30  ;;  %12532 = vst [vmem:[#allocation22_spill] sm:$0xff] %v9923_v54  ;;  %v9935_v0 = vsub.f32 %v12537_v34, %v9695_v42  ;;  %v9947_v20 = vsub.f32 %v9691_v46, %v9695_v42  ;;  %v9951_v16 = vsub.f32 %v9688_v10, %v9695_v42 }
 0x1cf   :  { %12534 = vst [vmem:[#allocation21_spill] sm:$0xff] %v9927_v62  ;;  %12536 = vst [vmem:[#allocation24_spill] sm:$0xff] %v9931_v6  ;;  %v658_v34 = vmul.f32 %v9699_v14, %v9699_v14  ;;  %v660_v18 = vmul.f32 %v9707_v38, %v9707_v38  ;;  %v661_v58 = vmul.f32 %v9711_v50, %v9711_v50 }
 0x1d0   :  { %12538 = vst [vmem:[#allocation23_spill] sm:$0xff] %v9935_v0  ;;  %12539 = vst [vmem:[#allocation33_spill] sm:$0xff] %v9939_v12  ;;  %v659_v0 = vmul.f32 %v9703_v22, %v9703_v22  ;;  %v662_v46 = vmul.f32 %v9715_v24, %v9715_v24  ;;  %v663_v42 = vmul.f32 %v9719_v26, %v9719_v26 }
 0x1d1   :  { %12540 = vst [vmem:[#allocation34_spill] sm:$0xff] %v9943_v8  ;;  %12541 = vst [vmem:[#allocation35_spill] sm:$0xff] %v9947_v20  ;;  %v664_v14 = vmul.f32 %v9723_v25, %v9723_v25  ;;  %v665_v38 = vmul.f32 %v9727_v29, %v9727_v29  ;;  %v1241_v29 = vld [vmem:[#allocation8 + $0x88] sm:$0xff] }
 0x1d2   :  { %v722_v12 = vadd.f32 %v659_v0, %v658_v34  ;;  %v666_v34 = vmul.f32 %v9731_v28, %v9731_v28 }
 0x1d4   :  { %v723_v8 = vadd.f32 %v722_v12, %v660_v18  ;;  %v667_v18 = vmul.f32 %v9735_v33, %v9735_v33 }
 0x1d6   :  { %v724_v20 = vadd.f32 %v723_v8, %v661_v58  ;;  %v668_v58 = vmul.f32 %v9739_v32, %v9739_v32 }
 0x1d8   :  { %v725_v10 = vadd.f32 %v724_v20, %v662_v46  ;;  %v669_v46 = vmul.f32 %v9743_v37, %v9743_v37  ;;  %v1243_v37 = vld [vmem:[#allocation8 + $0x98] sm:$0xff] }
 0x1da   :  { %v726_v22 = vadd.f32 %v725_v10, %v663_v42  ;;  %v670_v10 = vmul.f32 %v9747_v35, %v9747_v35 }
 0x1dc   :  { %v727_v0 = vadd.f32 %v726_v22, %v664_v14  ;;  %v1240_v22 = vld [vmem:[#allocation8 + $0x80] sm:$0xff] }
 0x1dd   :  { %v8401_v28 = vpack.c.bf16 %v1241_v29, %v1240_v22  ;;  %v3153_v22 = vld [vmem:[#allocation8 + $0x210] sm:$0xff] }
 0x1de   :  { %v728_v12 = vadd.f32 %v727_v0, %v665_v38  ;;  %v671_v38 = vmul.f32 %v9751_v41, %v9751_v41 }
 0x1df   :  { %8402 = vmatprep.subr.bf16.mxu0 %v8401_v28 }
 0x1e0   :  { %v729_v8 = vadd.f32 %v728_v12, %v666_v34  ;;  %v672_v34 = vmul.f32 %v9755_v39, %v9755_v39  ;;  %8404 = vmatpush3.bf16.msra.mxu0 %v8401_v28  ;;  %v1244_v28 = vld [vmem:[#allocation8 + $0xa0] sm:$0xff]  ;;  %v1245_v39 = vld [vmem:[#allocation8 + $0xa8] sm:$0xff] }
 0x1e2   :  { %v730_v20 = vadd.f32 %v729_v8, %v667_v18  ;;  %v3151_v18 = vld [vmem:[#allocation8 + $0x200] sm:$0xff]  ;;  %v3152_v8 = vld [vmem:[#allocation8 + $0x208] sm:$0xff] }
 0x1e4   :  { %v731_v42 = vadd.f32 %v730_v20, %v668_v58  ;;  %v1242_v58 = vld [vmem:[#allocation8 + $0x90] sm:$0xff]  ;;  %v8529_v20 = vpack.c.bf16 %v3152_v8, %v3151_v18  ;;  %v675_v18 = vmul.f32 %v9767_v49, %v9767_v49 }
 0x1e5   :  { %v8405_v29 = vpack.c.bf16 %v1243_v37, %v1242_v58  ;;  %v676_v37 = vmul.f32 %v9771_v47, %v9771_v47  ;;  %v3156_v58 = vld [vmem:[#allocation8 + $0x228] sm:$0xff] }
 0x1e6   :  { %v732_v14 = vadd.f32 %v731_v42, %v669_v46  ;;  %v673_v46 = vmul.f32 %v9759_v45, %v9759_v45  ;;  %8530 = vmatprep.subr.bf16.mxu1 %v8529_v20  ;;  %v8409_v45 = vpack.c.bf16 %v1245_v39, %v1244_v28  ;;  %v678_v39 = vmul.f32 %v9779_v51, %v9779_v51  ;;  %v3158_v28 = vld [vmem:[#allocation8 + $0x238] sm:$0xff] }
 0x1e7   :  { %8406 = vmatprep.subr.bf16.mxu0 %v8405_v29  ;;  %8532 = vmatpush3.bf16.msra.mxu1 %v8529_v20  ;;  %v1246_v20 = vld [vmem:[#allocation8 + $0xb0] sm:$0xff] }
 0x1e8   :  { %v733_v0 = vadd.f32 %v732_v14, %v670_v10  ;;  %v674_v10 = vmul.f32 %v9763_v43, %v9763_v43  ;;  %8408 = vmatpush3.bf16.msra.mxu0 %v8405_v29  ;;  %v677_v29 = vmul.f32 %v9775_v53, %v9775_v53 }
 0x1e9   :  { %8410 = vmatprep.subr.bf16.mxu0 %v8409_v45 }
 0x1ea   :  { %v734_v12 = vadd.f32 %v733_v0, %v671_v38  ;;  %v3154_v38 = vld [vmem:[#allocation8 + $0x218] sm:$0xff] }
 0x1eb   :  { %v8533_v0 = vpack.c.bf16 %v3154_v38, %v3153_v22 }
 0x1ec   :  { %v735_v42 = vadd.f32 %v734_v12, %v672_v34  ;;  %v3155_v12 = vld [vmem:[#allocation8 + $0x220] sm:$0xff]  ;;  %8412 = vmatpush3.bf16.msra.mxu0 %v8409_v45  ;;  %v1249_v45 = vld [vmem:[#allocation8 + $0xc8] sm:$0xff] }
 0x1ed   :  { %8534 = vmatprep.subr.bf16.mxu1 %v8533_v0 }
 0x1ee   :  { %v736_v14 = vadd.f32 %v735_v42, %v673_v46  ;;  %8536 = vmatpush3.bf16.msra.mxu1 %v8533_v0  ;;  %v8537_v46 = vpack.c.bf16 %v3156_v58, %v3155_v12  ;;  %v1247_v42 = vld [vmem:[#allocation8 + $0xb8] sm:$0xff]  ;;  %v1248_v0 = vld [vmem:[#allocation8 + $0xc0] sm:$0xff] }
 0x1ef   :  { %v8413_v38 = vpack.c.bf16 %v1247_v42, %v1246_v20  ;;  %v8417_v58 = vpack.c.bf16 %v1249_v45, %v1248_v0  ;;  %v3159_v20 = vld [vmem:[#allocation8 + $0x240] sm:$0xff]  ;;  %v1250_v42 = vld [vmem:[#allocation8 + $0xd0] sm:$0xff] }
 0x1f0   :  { %v737_v8 = vadd.f32 %v736_v14, %v674_v10  ;;  %8538 = vmatprep.subr.bf16.mxu1 %v8537_v46  ;;  %v3157_v14 = vld [vmem:[#allocation8 + $0x230] sm:$0xff]  ;;  %v1252_v45 = vld [vmem:[#allocation8 + $0xe0] sm:$0xff] }
 0x1f1   :  { %8414 = vmatprep.subr.bf16.mxu0 %v8413_v38  ;;  %v3161_v0 = vld [vmem:[#allocation8 + $0x250] sm:$0xff] }
 0x1f2   :  { %v738_v34 = vadd.f32 %v737_v8, %v675_v18  ;;  %8540 = vmatpush3.bf16.msra.mxu1 %v8537_v46  ;;  %8416 = vmatpush3.bf16.msra.mxu0 %v8413_v38  ;;  %v8541_v18 = vpack.c.bf16 %v3158_v28, %v3157_v14  ;;  %v679_v8 = vmul.f32 %v9783_v57, %v9783_v57  ;;  %v3160_v46 = vld [vmem:[#allocation8 + $0x248] sm:$0xff] }
 0x1f3   :  { %8418 = vmatprep.subr.bf16.mxu0 %v8417_v58  ;;  %v681_v38 = vmul.f32 %v9791_v61, %v9791_v61 }
 0x1f4   :  { %v739_v22 = vadd.f32 %v738_v34, %v676_v37  ;;  %8542 = vmatprep.subr.bf16.mxu1 %v8541_v18  ;;  %v680_v37 = vmul.f32 %v9787_v55, %v9787_v55 }
 0x1f6   :  { %v740_v10 = vadd.f32 %v739_v22, %v677_v29  ;;  %8544 = vmatpush3.bf16.msra.mxu1 %v8541_v18  ;;  %8420 = vmatpush3.bf16.msra.mxu0 %v8417_v58  ;;  %v8545_v29 = vpack.c.bf16 %v3160_v46, %v3159_v20  ;;  %v1251_v22 = vld [vmem:[#allocation8 + $0xd8] sm:$0xff]  ;;  %v683_v58 = vmul.f32 %v9799_v1, %v9799_v1 }
 0x1f7   :  { %v8421_v28 = vpack.c.bf16 %v1251_v22, %v1250_v42  ;;  %v3162_v18 = vld [vmem:[#allocation8 + $0x258] sm:$0xff]  ;;  %v3163_v42 = vld [vmem:[#allocation8 + $0x260] sm:$0xff]  ;;  %v1254_v22 = vld [vmem:[#allocation8 + $0xf0] sm:$0xff] }
 0x1f8   :  { %v741_v12 = vadd.f32 %v740_v10, %v678_v39  ;;  %8546 = vmatprep.subr.bf16.mxu1 %v8545_v29  ;;  %v682_v39 = vmul.f32 %v9795_v59, %v9795_v59 }
 0x1f9   :  { %8422 = vmatprep.subr.bf16.mxu0 %v8421_v28 }
 0x1fa   :  { %v742_v34 = vadd.f32 %v741_v12, %v679_v8  ;;  %8548 = vmatpush3.bf16.msra.mxu1 %v8545_v29  ;;  %8424 = vmatpush3.bf16.msra.mxu0 %v8421_v28  ;;  %v8549_v8 = vpack.c.bf16 %v3162_v18, %v3161_v0  ;;  %v1253_v12 = vld [vmem:[#allocation8 + $0xe8] sm:$0xff]  ;;  %v685_v28 = vmul.f32 %v9807_v5, %v9807_v5 }
 0x1fb   :  { %v8425_v46 = vpack.c.bf16 %v1253_v12, %v1252_v45  ;;  %v3164_v29 = vld [vmem:[#allocation8 + $0x268] sm:$0xff]  ;;  %v3165_v45 = vld [vmem:[#allocation8 + $0x270] sm:$0xff] }
 0x1fc   :  { %v743_v14 = vadd.f32 %v742_v34, %v680_v37  ;;  %8550 = vmatprep.subr.bf16.mxu1 %v8549_v8  ;;  %v684_v37 = vmul.f32 %v9803_v63, %v9803_v63  ;;  %v1175_v12 = vld [vmem:[#allocation2 + $0x1] sm:$0xff] }
 0x1fd   :  { %8426 = vmatprep.subr.bf16.mxu0 %v8425_v46  ;;  %7249 = vmatprep.mubr.f32.mxu0 %v1175_v12  ;;  %v693_v12 = vmul.f32 %v9839_v21, %v9839_v21 }
 0x1fe   :  { %v744_v10 = vadd.f32 %v743_v14, %v681_v38  ;;  %8552 = vmatpush3.bf16.msra.mxu1 %v8549_v8  ;;  %8428 = vmatpush3.bf16.msra.mxu0 %v8425_v46  ;;  %v8553_v38 = vpack.c.bf16 %v3164_v29, %v3163_v42  ;;  %v1255_v14 = vld [vmem:[#allocation8 + $0xf8] sm:$0xff]  ;;  %v1176_v42 = vld [vmem:[#allocation2 + $0x9] sm:$0xff]  ;;  %v689_v29 = vmul.f32 %v9823_v13, %v9823_v13 }
 0x1ff   :  { %v8429_v18 = vpack.c.bf16 %v1255_v14, %v1254_v22  ;;  %v3166_v8 = vld [vmem:[#allocation8 + $0x278] sm:$0xff]  ;;  %v3682_v14 = vld [vmem:[#allocation8 + $0x288] sm:$0xff] }
 0x200   :  { %v745_v20 = vadd.f32 %v744_v10, %v682_v39  ;;  %8554 = vmatprep.subr.bf16.mxu1 %v8553_v38  ;;  %v686_v39 = vmul.f32 %v9811_v3, %v9811_v3 }
 0x201   :  { %8430 = vmatprep.subr.bf16.mxu0 %v8429_v18 }
 0x202   :  { %v746_v34 = vadd.f32 %v745_v20, %v683_v58  ;;  %8556 = vmatpush3.bf16.msra.mxu1 %v8553_v38  ;;  %8432 = vmatpush3.bf16.msra.mxu0 %v8429_v18  ;;  %v8557_v58 = vpack.c.bf16 %v3166_v8, %v3165_v45  ;;  %v687_v20 = vmul.f32 %v9815_v9, %v9815_v9  ;;  %v3681_v38 = vld [vmem:[#allocation8 + $0x280] sm:$0xff] }
 0x203   :  { %v692_v45 = vmul.f32 %v9835_v15, %v9835_v15 }
 0x204   :  { %v747_v0 = vadd.f32 %v746_v34, %v684_v37  ;;  %8558 = vmatprep.subr.bf16.mxu1 %v8557_v58  ;;  %v688_v37 = vmul.f32 %v9819_v7, %v9819_v7 }
 0x205   :  { %7250 = vmatmul.mubr.f32.vlgmr.msra.gmra.mrb[64].mxu0 %v1176_v42  ;;  %v695_v42 = vmul.f32 %v9847_v27, %v9847_v27 }
 0x206   :  { %v748_v10 = vadd.f32 %v747_v0, %v685_v28  ;;  %8560 = vmatpush3.bf16.msra.mxu1 %v8557_v58  ;;  %v10017_v28 = vpack.c.bf16 %v3682_v14, %v3681_v38  ;;  %v690_v0 = vmul.f32 %v9827_v11, %v9827_v11  ;;  %v698_v14 = vmul.f32 %v9859_v31, %v9859_v31 }
 0x208   :  { %v749_v46 = vadd.f32 %v748_v10, %v686_v39  ;;  %12542 = vst [vmem:[#allocation36_spill] sm:$0xff] %v10017_v28  ;;  %8562 = vmatprep.subr.bf16.mxu1 %v10017_v28  ;;  %v691_v39 = vmul.f32 %v9831_v17, %v9831_v17 }
 0x20a   :  { %v750_v34 = vadd.f32 %v749_v46, %v687_v20  ;;  %v694_v20 = vmul.f32 %v9843_v19, %v9843_v19 }
 0x20c   :  { %v751_v22 = vadd.f32 %v750_v34, %v688_v37  ;;  %v696_v34 = vmul.f32 %v9851_v23, %v9851_v23 }
 0x20e   :  { %v752_v18 = vadd.f32 %v751_v22, %v689_v29  ;;  %v697_v22 = vmul.f32 %v9855_v36, %v9855_v36 }
 0x210   :  { %v753_v10 = vadd.f32 %v752_v18, %v690_v0  ;;  %v699_v18 = vmul.f32 %v9863_v44, %v9863_v44 }
 0x212   :  { %v754_v8 = vadd.f32 %v753_v10, %v691_v39  ;;  %v700_v10 = vmul.f32 %v9867_v40, %v9867_v40 }
 0x214   :  { %v755_v58 = vadd.f32 %v754_v8, %v692_v45  ;;  %v701_v8 = vmul.f32 %v9871_v52, %v9871_v52 }
 0x216   :  { %v756_v46 = vadd.f32 %v755_v58, %v693_v12  ;;  %v702_v58 = vmul.f32 %v9875_v48, %v9875_v48 }
 0x218   :  { %v757_v37 = vadd.f32 %v756_v46, %v694_v20  ;;  %v703_v46 = vmul.f32 %v9879_v60, %v9879_v60 }
 0x21a   :  { %v758_v29 = vadd.f32 %v757_v37, %v695_v42  ;;  %v704_v37 = vmul.f32 %v9883_v56, %v9883_v56 }
 0x21c   :  { %v759_v38 = vadd.f32 %v758_v29, %v696_v34  ;;  %v705_v29 = vmul.f32 %v9887_v4, %v9887_v4 }
 0x21e   :  { %v760_v0 = vadd.f32 %v759_v38, %v697_v22  ;;  %v12543_v38 = vld [vmem:[#allocation14_spill] sm:$0xff] }
 0x220   :  { %v761_v39 = vadd.f32 %v760_v0, %v698_v14  ;;  %v706_v14 = vmul.f32 %v12543_v38, %v12543_v38 }
 0x222   :  { %v762_v45 = vadd.f32 %v761_v39, %v699_v18  ;;  %v12544_v18 = vld [vmem:[#allocation13_spill] sm:$0xff] }
 0x223   :  { %v707_v39 = vmul.f32 %v12544_v18, %v12544_v18 }
 0x224   :  { %v763_v12 = vadd.f32 %v762_v45, %v700_v10  ;;  %v12545_v45 = vld [vmem:[#allocation16_spill] sm:$0xff] }
 0x226   :  { %v764_v20 = vadd.f32 %v763_v12, %v701_v8  ;;  %v708_v8 = vmul.f32 %v12545_v45, %v12545_v45 }
 0x228   :  { %v765_v42 = vadd.f32 %v764_v20, %v702_v58  ;;  %v12546_v58 = vld [vmem:[#allocation15_spill] sm:$0xff] }
 0x229   :  { %v709_v20 = vmul.f32 %v12546_v58, %v12546_v58 }
 0x22a   :  { %v766_v34 = vadd.f32 %v765_v42, %v703_v46  ;;  %v12547_v42 = vld [vmem:[#allocation18_spill] sm:$0xff] }
 0x22b   :  { %v710_v28 = vmul.f32 %v12547_v42, %v12547_v42 }
 0x22c   :  { %v767_v22 = vadd.f32 %v766_v34, %v704_v37  ;;  %v12548_v34 = vld [vmem:[#allocation17_spill] sm:$0xff] }
 0x22d   :  { %v711_v38 = vmul.f32 %v12548_v34, %v12548_v34 }
 0x22e   :  { %v768_v0 = vadd.f32 %v767_v22, %v705_v29  ;;  %v712_v22 = vmul.f32 %v9915_v2, %v9915_v2 }
 0x230   :  { %v769_v10 = vadd.f32 %v768_v0, %v706_v14  ;;  %v713_v0 = vmul.f32 %v9919_v30, %v9919_v30 }
 0x232   :  { %v770_v12 = vadd.f32 %v769_v10, %v707_v39  ;;  %v714_v10 = vmul.f32 %v9923_v54, %v9923_v54 }
 0x234   :  { %v771_v46 = vadd.f32 %v770_v12, %v708_v8  ;;  %v715_v12 = vmul.f32 %v9927_v62, %v9927_v62 }
 0x236   :  { %v772_v37 = vadd.f32 %v771_v46, %v709_v20  ;;  %v716_v46 = vmul.f32 %v9931_v6, %v9931_v6 }
 0x238   :  { %v773_v29 = vadd.f32 %v772_v37, %v710_v28  ;;  %v12549_v37 = vld [vmem:[#allocation23_spill] sm:$0xff] }
 0x239   :  { %v717_v2 = vmul.f32 %v12549_v37, %v12549_v37 }
 0x23a   :  { %v774_v14 = vadd.f32 %v773_v29, %v711_v38  ;;  %v12550_v29 = vld [vmem:[#allocation33_spill] sm:$0xff] }
 0x23b   :  { %v718_v30 = vmul.f32 %v12550_v29, %v12550_v29 }
 0x23c   :  { %v775_v39 = vadd.f32 %v774_v14, %v712_v22  ;;  %v12551_v14 = vld [vmem:[#allocation34_spill] sm:$0xff] }
 0x23d   :  { %v719_v54 = vmul.f32 %v12551_v14, %v12551_v14 }
 0x23e   :  { %v776_v8 = vadd.f32 %v775_v39, %v713_v0  ;;  %v12552_v39 = vld [vmem:[#allocation35_spill] sm:$0xff] }
 0x23f   :  { %v720_v62 = vmul.f32 %v12552_v39, %v12552_v39 }
 0x240   :  { %v777_v20 = vadd.f32 %v776_v8, %v714_v10  ;;  %v721_v8 = vmul.f32 %v9951_v16, %v9951_v16 }
 0x242   :  { %v778_v28 = vadd.f32 %v777_v20, %v715_v12 }
 0x244   :  { %v779_v38 = vadd.f32 %v778_v28, %v716_v46 }
 0x246   :  { %v780_v22 = vadd.f32 %v779_v38, %v717_v2  ;;  %v1159_v2 = vld [vmem:[#allocation8] sm:$0xff]  ;;  %v1160_v38 = vld [vmem:[#allocation8 + $0x8] sm:$0xff] }
 0x247   :  { %v8433_v42 = vpack.c.bf16 %v1160_v38, %v1159_v2 }
 0x248   :  { %v781_v0 = vadd.f32 %v780_v22, %v718_v30  ;;  %v1161_v22 = vld [vmem:[#allocation8 + $0x10] sm:$0xff] }
 0x249   :  { %8434 = vmatprep.subr.bf16.mxu0 %v8433_v42 }
 0x24a   :  { %v782_v10 = vadd.f32 %v781_v0, %v719_v54  ;;  %8436 = vmatpush3.bf16.msra.mxu0 %v8433_v42  ;;  %v1162_v54 = vld [vmem:[#allocation8 + $0x18] sm:$0xff]  ;;  %v3689_v42 = vld [vmem:[#allocation8 + $0x2c0] sm:$0xff] }
 0x24b   :  { %v8437_v0 = vpack.c.bf16 %v1162_v54, %v1161_v22 }
 0x24c   :  { %v783_v12 = vadd.f32 %v782_v10, %v720_v62  ;;  %v1163_v62 = vld [vmem:[#allocation8 + $0x20] sm:$0xff]  ;;  %v1164_v10 = vld [vmem:[#allocation8 + $0x28] sm:$0xff] }
 0x24d   :  { %8438 = vmatprep.subr.bf16.mxu0 %v8437_v0 }
 0x24e   :  { %v784_v20 = vadd.f32 %v783_v12, %v721_v8  ;;  %8440 = vmatpush3.bf16.msra.mxu0 %v8437_v0  ;;  %v3683_v8 = vld [vmem:[#allocation8 + $0x290] sm:$0xff]  ;;  %v3685_v12 = vld [vmem:[#allocation8 + $0x2a0] sm:$0xff] }
 0x250   :  { %v785_v6 = vrot.slane %v784_v20, 4 }
 0x252   :  { %v786_v37 = vadd.f32 %v785_v6, %v784_v20  ;;  %v8441_v6 = vpack.c.bf16 %v1164_v10, %v1163_v62  ;;  %v3687_v20 = vld [vmem:[#allocation8 + $0x2b0] sm:$0xff]  ;;  %v12555_v10 = vld [vmem:[#allocation25_spill] sm:$0xff] }
 0x254   :  { %v787_v46 = vrot.slane %v786_v37, 2  ;;  %8442 = vmatprep.subr.bf16.mxu0 %v8441_v6 }
 0x255   :  { %8444 = vmatpush3.bf16.msra.mxu0 %v8441_v6 }
 0x256   :  { %v788_v28 = vadd.f32 %v787_v46, %v786_v37  ;;  %v3684_v37 = vld [vmem:[#allocation8 + $0x298] sm:$0xff] }
 0x257   :  { %v1166_v46 = vld [vmem:[#allocation8 + $0x38] sm:$0xff] }
 0x258   :  { %v789_v34 = vrot.slane %v788_v28, 1 }
 0x25a   :  { %v790_v29 = vadd.f32 %v789_v34, %v788_v28  ;;  %v3686_v34 = vld [vmem:[#allocation8 + $0x2a8] sm:$0xff] }
 0x25b   :  { %v3690_v28 = vld [vmem:[#allocation8 + $0x2c8] sm:$0xff]  ;;  %v10088_v22 = vpack.c.bf16 %v3686_v34, %v3685_v12 }
 0x25c   :  { %v791_v14 = vmul.f32 0.001953125, %v790_v29  ;;  %v1165_v29 = vld [vmem:[#allocation8 + $0x30] sm:$0xff]  ;;  %v10092_v0 = vpack.c.bf16 %v3690_v28, %v3689_v42  ;;  %v12558_v42 = vld [vmem:[#allocation28_spill] sm:$0xff] }
 0x25d   :  { %v8445_v2 = vpack.c.bf16 %v1166_v46, %v1165_v29  ;;  %v12556_v29 = vld [vmem:[#allocation26_spill] sm:$0xff] }
 0x25e   :  { %v792_v30 = vadd.f32 1e-05, %v791_v14  ;;  %v3688_v14 = vld [vmem:[#allocation8 + $0x2b8] sm:$0xff]  ;;  %12554 = vst [vmem:[#allocation16_spill] sm:$0xff] %v10092_v0  ;;  %v12569_v0 = vld [vmem:[#allocation17_spill] sm:$0xff] }
 0x25f   :  { %8446 = vmatprep.subr.bf16.mxu0 %v8445_v2  ;;  %v10090_v54 = vpack.c.bf16 %v3688_v14, %v3687_v20 }
 0x260   :  { %9208 = vrsqrt.f32 %v792_v30  ;;  %v10086_v30 = vpack.c.bf16 %v3684_v37, %v3683_v8  ;;  %8448 = vmatpush3.bf16.msra.mxu0 %v8445_v2  ;;  %v12557_v8 = vld [vmem:[#allocation27_spill] sm:$0xff]  ;;  %v12559_v2 = vld [vmem:[#allocation29_spill] sm:$0xff] }
 0x261   :  { %12553 = vst [vmem:[#allocation13_spill] sm:$0xff] %v10090_v54  ;;  %v12571_v54 = vld [vmem:[#allocation20_spill] sm:$0xff] }
 0x26a   :  { %v10084_v38 = vpop.eup %9208 }
 0x26b   :  { %v856_v62 = vmul.f32 %v10084_v38, %v12552_v39  ;;  %v10098_v6 = vmul.f32 %v10084_v38, %v12555_v10  ;;  %v10102_v46 = vmul.f32 %v10084_v38, %v12556_v29  ;;  %v10106_v37 = vmul.f32 %v10084_v38, %v12557_v8  ;;  %v12560_v10 = vld [vmem:[#allocation30_spill] sm:$0xff]  ;;  %v12561_v8 = vld [vmem:[#allocation31_spill] sm:$0xff] }
 0x26c   :  { %v10110_v12 = vmul.f32 %v10084_v38, %v9711_v50  ;;  %v10114_v34 = vmul.f32 %v10084_v38, %v9715_v24  ;;  %v10118_v39 = vmul.f32 %v10084_v38, %v9719_v26  ;;  %v10122_v20 = vmul.f32 %v10084_v38, %v9723_v25 }
 0x26d   :  { %v920_v14 = vmax.f32 %v856_v62, 0.0  ;;  %v10126_v28 = vmul.f32 %v10084_v38, %v12558_v42  ;;  %v10130_v50 = vmul.f32 %v10084_v38, %v12559_v2  ;;  %v10134_v24 = vmul.f32 %v10084_v38, %v9735_v33  ;;  %v12562_v42 = vld [vmem:[#allocation32_spill] sm:$0xff] }
 0x26e   :  { %v10138_v26 = vmul.f32 %v10084_v38, %v9739_v32  ;;  %v10142_v25 = vmul.f32 %v10084_v38, %v12560_v10  ;;  %v10146_v62 = vmul.f32 %v10084_v38, %v9747_v35  ;;  %v10150_v29 = vmul.f32 %v10084_v38, %v9751_v41 }
 0x26f   :  { %1093 = vst [vmem:[#allocation2 + $0x331] sm:$0xff] %v920_v14  ;;  %v10154_v33 = vmul.f32 %v10084_v38, %v12561_v8  ;;  %v10158_v32 = vmul.f32 %v10084_v38, %v12562_v42  ;;  %v10162_v2 = vmul.f32 %v10084_v38, %v9763_v43  ;;  %v10166_v35 = vmul.f32 %v10084_v38, %v9767_v49  ;;  %v12563_v8 = vld [vmem:[#allocation14_spill] sm:$0xff] }
 0x270   :  { %v10170_v41 = vmul.f32 %v10084_v38, %v9771_v47  ;;  %v10174_v14 = vmul.f32 %v10084_v38, %v9775_v53  ;;  %v10178_v10 = vmul.f32 %v10084_v38, %v9779_v51  ;;  %v10182_v43 = vmul.f32 %v10084_v38, %v9783_v57  ;;  %v12567_v42 = vld [vmem:[#allocation18_spill] sm:$0xff] }
 0x271   :  { %v10186_v49 = vmul.f32 %v10084_v38, %v9787_v55  ;;  %v10190_v47 = vmul.f32 %v10084_v38, %v9791_v61  ;;  %v10194_v53 = vmul.f32 %v10084_v38, %v9795_v59  ;;  %v10198_v51 = vmul.f32 %v10084_v38, %v9799_v1 }
 0x272   :  { %v10202_v57 = vmul.f32 %v10084_v38, %v9803_v63  ;;  %v10206_v55 = vmul.f32 %v10084_v38, %v9807_v5  ;;  %v10210_v61 = vmul.f32 %v10084_v38, %v9811_v3  ;;  %v10214_v59 = vmul.f32 %v10084_v38, %v9815_v9 }
 0x273   :  { %v10218_v1 = vmul.f32 %v10084_v38, %v9819_v7  ;;  %v10222_v63 = vmul.f32 %v10084_v38, %v9823_v13  ;;  %v10226_v5 = vmul.f32 %v10084_v38, %v9827_v11  ;;  %v10230_v3 = vmul.f32 %v10084_v38, %v9831_v17 }
 0x274   :  { %v10234_v9 = vmul.f32 %v10084_v38, %v9835_v15  ;;  %v10238_v7 = vmul.f32 %v10084_v38, %v9839_v21  ;;  %v10242_v13 = vmul.f32 %v10084_v38, %v9843_v19  ;;  %v10246_v11 = vmul.f32 %v10084_v38, %v9847_v27 }
 0x275   :  { %v10250_v17 = vmul.f32 %v10084_v38, %v9851_v23  ;;  %v10254_v15 = vmul.f32 %v10084_v38, %v9855_v36  ;;  %v10258_v21 = vmul.f32 %v10084_v38, %v9859_v31  ;;  %v10262_v19 = vmul.f32 %v10084_v38, %v9863_v44 }
 0x276   :  { %v10266_v27 = vmul.f32 %v10084_v38, %v9867_v40  ;;  %v10270_v23 = vmul.f32 %v10084_v38, %v9871_v52  ;;  %v10274_v36 = vmul.f32 %v10084_v38, %v9875_v48  ;;  %v10278_v31 = vmul.f32 %v10084_v38, %v9879_v60 }
 0x277   :  { %v10282_v44 = vmul.f32 %v10084_v38, %v9883_v56  ;;  %v10286_v40 = vmul.f32 %v10084_v38, %v9887_v4  ;;  %v10290_v52 = vmul.f32 %v10084_v38, %v12563_v8  ;;  %v10294_v48 = vmul.f32 %v10084_v38, %v12544_v18 }
 0x278   :  { %v10298_v60 = vmul.f32 %v10084_v38, %v12545_v45  ;;  %v10302_v56 = vmul.f32 %v10084_v38, %v12546_v58  ;;  %v10306_v4 = vmul.f32 %v10084_v38, %v12567_v42  ;;  %v10310_v8 = vmul.f32 %v10084_v38, %v12569_v0 }
 0x279   :  { %12564 = vst [vmem:[#allocation15_spill] sm:$0xff] %v10294_v48  ;;  %v10314_v18 = vmul.f32 %v10084_v38, %v12571_v54  ;;  %v12573_v48 = vld [vmem:[#allocation19_spill] sm:$0xff] }
 0x27a   :  { %12565 = vst [vmem:[#allocation35_spill] sm:$0xff] %v10298_v60  ;;  %12566 = vst [vmem:[#allocation25_spill] sm:$0xff] %v10302_v56  ;;  %v10318_v45 = vmul.f32 %v10084_v38, %v12573_v48  ;;  %v12575_v60 = vld [vmem:[#allocation22_spill] sm:$0xff]  ;;  %v12576_v56 = vld [vmem:[#allocation21_spill] sm:$0xff] }
 0x27b   :  { %12568 = vst [vmem:[#allocation26_spill] sm:$0xff] %v10306_v4  ;;  %12570 = vst [vmem:[#allocation27_spill] sm:$0xff] %v10310_v8  ;;  %v10322_v58 = vmul.f32 %v10084_v38, %v12575_v60  ;;  %v10326_v42 = vmul.f32 %v10084_v38, %v12576_v56  ;;  %v12578_v4 = vld [vmem:[#allocation24_spill] sm:$0xff]  ;;  %v12580_v8 = vld [vmem:[#allocation23_spill] sm:$0xff]  ;;  %v10346_v56 = vmul.f32 %v10084_v38, %v9951_v16  ;;  %v10362_v16 = vmax.f32 %v10126_v28, 0.0 }
 0x27c   :  { %12572 = vst [vmem:[#allocation28_spill] sm:$0xff] %v10314_v18  ;;  %12574 = vst [vmem:[#allocation29_spill] sm:$0xff] %v10318_v45  ;;  %v10330_v0 = vmul.f32 %v10084_v38, %v12578_v4  ;;  %v10334_v54 = vmul.f32 %v10084_v38, %v12580_v8  ;;  %v12582_v18 = vld [vmem:[#allocation33_spill] sm:$0xff]  ;;  %v12583_v45 = vld [vmem:[#allocation34_spill] sm:$0xff]  ;;  %v859_v4 = vmax.f32 %v10102_v46, 0.0  ;;  %v861_v8 = vmax.f32 %v10110_v12, 0.0 }
 0x27d   :  { %12577 = vst [vmem:[#allocation30_spill] sm:$0xff] %v10326_v42  ;;  %v10338_v48 = vmul.f32 %v10084_v38, %v12582_v18  ;;  %v10342_v60 = vmul.f32 %v10084_v38, %v12583_v45  ;;  %v858_v42 = vmax.f32 %v10098_v6, 0.0  ;;  %v10356_v18 = vmax.f32 %v10118_v39, 0.0  ;;  %1038 = vst [vmem:[#allocation2 + $0x69] sm:$0xff] %v10362_v16 }
 0x27e   :  { %12579 = vst [vmem:[#allocation31_spill] sm:$0xff] %v10330_v0  ;;  %12581 = vst [vmem:[#allocation32_spill] sm:$0xff] %v10334_v54  ;;  %v860_v0 = vmax.f32 %v10106_v37, 0.0  ;;  %v10353_v54 = vmax.f32 %v10114_v34, 0.0  ;;  %v10359_v45 = vmax.f32 %v10122_v20, 0.0  ;;  %v10365_v38 = vmax.f32 %v10130_v50, 0.0 }
 0x27f   :  { %v10368_v6 = vmax.f32 %v10134_v24, 0.0  ;;  %v10371_v46 = vmax.f32 %v10138_v26, 0.0  ;;  %1031 = vst [vmem:[#allocation2 + $0x19] sm:$0xff] %v858_v42  ;;  %1032 = vst [vmem:[#allocation2 + $0x21] sm:$0xff] %v859_v4  ;;  %7252 = vmatprep.mubr.f32.mxu0 %v858_v42  ;;  %7761 = vmatprep.mubr.f32.mxu1 %v858_v42  ;;  %v10374_v37 = vmax.f32 %v10142_v25, 0.0  ;;  %v10377_v12 = vmax.f32 %v10146_v62, 0.0 }
 0x280   :  { %1033 = vst [vmem:[#allocation2 + $0x31] sm:$0xff] %v860_v0  ;;  %v10380_v34 = vmax.f32 %v10150_v29, 0.0  ;;  %v10383_v39 = vmax.f32 %v10154_v33, 0.0  ;;  %1034 = vst [vmem:[#allocation2 + $0x39] sm:$0xff] %v861_v8  ;;  %7253 = vmatmul.mubr.f32.gmra.mrb[66].mxu0 %v859_v4  ;;  %7762 = vmatmul.mubr.f32.vlgmr.msra.gmra.mrb[0].mxu1 %v859_v4  ;;  %v10389_v20 = vmax.f32 %v10158_v32, 0.0  ;;  %v10392_v28 = vmax.f32 %v10162_v2, 0.0 }
 0x281   :  { %1035 = vst [vmem:[#allocation2 + $0x49] sm:$0xff] %v10353_v54  ;;  %1036 = vst [vmem:[#allocation2 + $0x51] sm:$0xff] %v10356_v18  ;;  %v10395_v50 = vmax.f32 %v10166_v35, 0.0  ;;  %v10398_v24 = vmax.f32 %v10170_v41, 0.0  ;;  %v12584_v26 = vld [vmem:[#allocation36_spill] sm:$0xff]  ;;  %7255 = vmatprep.mubr.f32.mxu0 %v860_v0  ;;  %v10406_v25 = vmax.f32 %v10174_v14, 0.0  ;;  %7764 = vmatprep.mubr.f32.mxu1 %v860_v0 }
 0x282   :  { %1037 = vst [vmem:[#allocation2 + $0x61] sm:$0xff] %v10359_v45  ;;  %1039 = vst [vmem:[#allocation2 + $0x79] sm:$0xff] %v10365_v38  ;;  %8564 = vmatpush3.bf16.msra.mxu1 %v12584_v26  ;;  %v10409_v62 = vmax.f32 %v10178_v10, 0.0  ;;  %v10412_v29 = vmax.f32 %v10182_v43, 0.0  ;;  %v10415_v33 = vmax.f32 %v10186_v49, 0.0  ;;  %v10423_v32 = vmax.f32 %v10190_v47, 0.0 }
 0x283   :  { %1040 = vst [vmem:[#allocation2 + $0x81] sm:$0xff] %v10368_v6  ;;  %1041 = vst [vmem:[#allocation2 + $0x91] sm:$0xff] %v10371_v46  ;;  %8566 = vmatprep.subr.bf16.mxu1 %v10086_v30  ;;  %v10426_v2 = vmax.f32 %v10194_v53, 0.0  ;;  %v10429_v35 = vmax.f32 %v10198_v51, 0.0  ;;  %v10432_v41 = vmax.f32 %v10202_v57, 0.0  ;;  %v10439_v14 = vmax.f32 %v10206_v55, 0.0 }
 0x284   :  { %1042 = vst [vmem:[#allocation2 + $0x99] sm:$0xff] %v10374_v37  ;;  %1043 = vst [vmem:[#allocation2 + $0xa9] sm:$0xff] %v10377_v12  ;;  %v10442_v10 = vmax.f32 %v10210_v61, 0.0  ;;  %v10445_v43 = vmax.f32 %v10214_v59, 0.0  ;;  %v12381_v49 = vmax.f32 %v10218_v1, 0.0  ;;  %7256 = vmatmul.mubr.f32.gmra.mrb[68].mxu0 %v861_v8  ;;  %7765 = vmatmul.mubr.f32.gmra.mrb[2].mxu1 %v861_v8  ;;  %v12380_v47 = vmax.f32 %v10222_v63, 0.0 }
 0x285   :  { %1044 = vst [vmem:[#allocation2 + $0xb1] sm:$0xff] %v10380_v34  ;;  %1045 = vst [vmem:[#allocation2 + $0xc1] sm:$0xff] %v10383_v39  ;;  %v10454_v53 = vmax.f32 %v10226_v5, 0.0  ;;  %v10457_v51 = vmax.f32 %v10230_v3, 0.0  ;;  %v10460_v57 = vmax.f32 %v10234_v9, 0.0  ;;  %7258 = vmatprep.mubr.f32.mxu0 %v10353_v54  ;;  %7767 = vmatprep.mubr.f32.mxu1 %v10353_v54  ;;  %v10469_v55 = vmax.f32 %v10238_v7, 0.0 }
 0x286   :  { %1046 = vst [vmem:[#allocation2 + $0xc9] sm:$0xff] %v10389_v20  ;;  %1047 = vst [vmem:[#allocation2 + $0xd9] sm:$0xff] %v10392_v28  ;;  %v10472_v61 = vmax.f32 %v10242_v13, 0.0  ;;  %v10475_v59 = vmax.f32 %v10246_v11, 0.0  ;;  %v10478_v5 = vmax.f32 %v10250_v17, 0.0  ;;  %8568 = vmatpush3.bf16.msra.mxu1 %v10086_v30  ;;  %v10487_v3 = vmax.f32 %v10254_v15, 0.0 }
 0x287   :  { %1048 = vst [vmem:[#allocation2 + $0xe1] sm:$0xff] %v10395_v50  ;;  %1049 = vst [vmem:[#allocation2 + $0xf1] sm:$0xff] %v10398_v24  ;;  %v10490_v9 = vmax.f32 %v10258_v21, 0.0  ;;  %v10493_v7 = vmax.f32 %v10262_v19, 0.0  ;;  %v10496_v13 = vmax.f32 %v10266_v27, 0.0  ;;  %8570 = vmatprep.subr.bf16.mxu1 %v10088_v22  ;;  %v10505_v30 = vmax.f32 %v10270_v23, 0.0 }
 0x288   :  { %1050 = vst [vmem:[#allocation2 + $0xf9] sm:$0xff] %v10406_v25  ;;  %1051 = vst [vmem:[#allocation2 + $0x109] sm:$0xff] %v10409_v62  ;;  %v10508_v11 = vmax.f32 %v10274_v36, 0.0  ;;  %v10511_v17 = vmax.f32 %v10278_v31, 0.0  ;;  %v10514_v15 = vmax.f32 %v10282_v44, 0.0  ;;  %7259 = vmatmul.mubr.f32.gmra.mrb[70].mxu0 %v10356_v18  ;;  %7768 = vmatmul.mubr.f32.gmra.mrb[4].mxu1 %v10356_v18  ;;  %v10523_v21 = vmax.f32 %v10286_v40, 0.0 }
 0x289   :  { %1052 = vst [vmem:[#allocation2 + $0x111] sm:$0xff] %v10412_v29  ;;  %1053 = vst [vmem:[#allocation2 + $0x121] sm:$0xff] %v10415_v33  ;;  %v10526_v19 = vmax.f32 %v10290_v52, 0.0  ;;  %v12586_v27 = vld [vmem:[#allocation15_spill] sm:$0xff]  ;;  %7261 = vmatprep.mubr.f32.mxu0 %v10359_v45  ;;  %7770 = vmatprep.mubr.f32.mxu1 %v10359_v45  ;;  %v12588_v44 = vld [vmem:[#allocation25_spill] sm:$0xff] }
 0x28a   :  { %1054 = vst [vmem:[#allocation2 + $0x129] sm:$0xff] %v10423_v32  ;;  %1055 = vst [vmem:[#allocation2 + $0x139] sm:$0xff] %v10426_v2  ;;  %v10529_v23 = vmax.f32 %v12586_v27, 0.0  ;;  %v12587_v36 = vld [vmem:[#allocation35_spill] sm:$0xff]  ;;  %v10541_v40 = vmax.f32 %v12588_v44, 0.0  ;;  %v12589_v52 = vld [vmem:[#allocation26_spill] sm:$0xff]  ;;  %8572 = vmatpush3.bf16.msra.mxu1 %v10088_v22 }
 0x28b   :  { %1056 = vst [vmem:[#allocation2 + $0x141] sm:$0xff] %v10429_v35  ;;  %1057 = vst [vmem:[#allocation2 + $0x151] sm:$0xff] %v10432_v41  ;;  %v10532_v31 = vmax.f32 %v12587_v36, 0.0  ;;  %v10544_v42 = vmax.f32 %v12589_v52, 0.0  ;;  %v12590_v0 = vld [vmem:[#allocation27_spill] sm:$0xff]  ;;  %v12591_v4 = vld [vmem:[#allocation28_spill] sm:$0xff] }
 0x28c   :  { %1058 = vst [vmem:[#allocation2 + $0x159] sm:$0xff] %v10439_v14  ;;  %1059 = vst [vmem:[#allocation2 + $0x169] sm:$0xff] %v10442_v10  ;;  %v10547_v54 = vmax.f32 %v12590_v0, 0.0  ;;  %v10550_v8 = vmax.f32 %v12591_v4, 0.0  ;;  %v1167_v18 = vld [vmem:[#allocation8 + $0x40] sm:$0xff]  ;;  %v1168_v45 = vld [vmem:[#allocation8 + $0x48] sm:$0xff]  ;;  %7262 = vmatmul.mubr.f32.gmra.mrb[72].mxu0 %v10362_v16  ;;  %7771 = vmatmul.mubr.f32.gmra.mrb[6].mxu1 %v10362_v16 }
 0x28d   :  { %1060 = vst [vmem:[#allocation2 + $0x171] sm:$0xff] %v10445_v43  ;;  %1061 = vst [vmem:[#allocation2 + $0x181] sm:$0xff] %v12381_v49  ;;  %v12592_v26 = vld [vmem:[#allocation29_spill] sm:$0xff]  ;;  %v10561_v36 = vmax.f32 %v10322_v58, 0.0  ;;  %v12594_v44 = vld [vmem:[#allocation30_spill] sm:$0xff]  ;;  %7264 = vmatprep.mubr.f32.mxu0 %v10365_v38  ;;  %7773 = vmatprep.mubr.f32.mxu1 %v10365_v38 }
 0x28e   :  { %1062 = vst [vmem:[#allocation2 + $0x189] sm:$0xff] %v12380_v47  ;;  %1063 = vst [vmem:[#allocation2 + $0x1c9] sm:$0xff] %v10454_v53  ;;  %v10558_v27 = vmax.f32 %v12592_v26, 0.0  ;;  %v10564_v52 = vmax.f32 %v12594_v44, 0.0  ;;  %v12596_v0 = vld [vmem:[#allocation31_spill] sm:$0xff]  ;;  %v12598_v22 = vld [vmem:[#allocation13_spill] sm:$0xff] }
 0x28f   :  { %1064 = vst [vmem:[#allocation2 + $0x1d1] sm:$0xff] %v10457_v51  ;;  %1065 = vst [vmem:[#allocation2 + $0x1e1] sm:$0xff] %v10460_v57  ;;  %v10567_v4 = vmax.f32 %v12596_v0, 0.0  ;;  %8574 = vmatprep.subr.bf16.mxu1 %v12598_v22  ;;  %v3691_v26 = vld [vmem:[#allocation8 + $0x2d0] sm:$0xff]  ;;  %v3692_v47 = vld [vmem:[#allocation8 + $0x2d8] sm:$0xff]  ;;  %v10578_v44 = vmax.f32 %v10338_v48, 0.0 }
 0x290   :  { %1066 = vst [vmem:[#allocation2 + $0x1e9] sm:$0xff] %v10469_v55  ;;  %1067 = vst [vmem:[#allocation2 + $0x1f9] sm:$0xff] %v10472_v61  ;;  %v12599_v58 = vld [vmem:[#allocation32_spill] sm:$0xff]  ;;  %v10581_v0 = vmax.f32 %v10342_v60, 0.0  ;;  %v8449_v60 = vpack.c.bf16 %v1168_v45, %v1167_v18  ;;  %8576 = vmatpush3.bf16.msra.mxu1 %v12598_v22  ;;  %7265 = vmatmul.mubr.f32.gmra.mrb[74].mxu0 %v10368_v6  ;;  %v3694_v38 = vld [vmem:[#allocation8 + $0x2e8] sm:$0xff] }
 0x291   :  { %1068 = vst [vmem:[#allocation2 + $0x201] sm:$0xff] %v10475_v59  ;;  %1069 = vst [vmem:[#allocation2 + $0x211] sm:$0xff] %v10478_v5  ;;  %v10575_v49 = vmax.f32 %v12599_v58, 0.0  ;;  %v1169_v58 = vld [vmem:[#allocation8 + $0x50] sm:$0xff]  ;;  %v1170_v48 = vld [vmem:[#allocation8 + $0x58] sm:$0xff]  ;;  %7774 = vmatmul.mubr.f32.gmra.mrb[8].mxu1 %v10368_v6  ;;  %7267 = vmatprep.mubr.f32.mxu0 %v10371_v46 }
 0x292   :  { %12585 = vst [vmem:[#allocation14_spill] sm:$0xff] %v10523_v21  ;;  %1070 = vst [vmem:[#allocation2 + $0x219] sm:$0xff] %v10487_v3  ;;  %v12600_v16 = vld [vmem:[#allocation16_spill] sm:$0xff]  ;;  %8450 = vmatprep.subr.bf16.mxu0 %v8449_v60  ;;  %v1171_v18 = vld [vmem:[#allocation8 + $0x60] sm:$0xff]  ;;  %7776 = vmatprep.mubr.f32.mxu1 %v10371_v46 }
 0x293   :  { %1071 = vst [vmem:[#allocation2 + $0x229] sm:$0xff] %v10490_v9  ;;  %1072 = vst [vmem:[#allocation2 + $0x231] sm:$0xff] %v10493_v7  ;;  %8578 = vmatprep.subr.bf16.mxu1 %v12600_v16  ;;  %v1172_v45 = vld [vmem:[#allocation8 + $0x68] sm:$0xff]  ;;  %8452 = vmatpush3.bf16.msra.mxu0 %v8449_v60  ;;  %v3696_v6 = vld [vmem:[#allocation8 + $0x2f8] sm:$0xff] }
 0x294   :  { %1073 = vst [vmem:[#allocation2 + $0x241] sm:$0xff] %v10496_v13  ;;  %1074 = vst [vmem:[#allocation2 + $0x249] sm:$0xff] %v10505_v30  ;;  %8580 = vmatpush3.bf16.msra.mxu1 %v12600_v16  ;;  %7268 = vmatmul.mubr.f32.gmra.mrb[76].mxu0 %v10374_v37  ;;  %v4212_v60 = vld [vmem:[#allocation8 + $0x300] sm:$0xff]  ;;  %v4213_v16 = vld [vmem:[#allocation8 + $0x308] sm:$0xff] }
 0x295   :  { %1075 = vst [vmem:[#allocation2 + $0x259] sm:$0xff] %v10508_v11  ;;  %1076 = vst [vmem:[#allocation2 + $0x261] sm:$0xff] %v10511_v17  ;;  %7777 = vmatmul.mubr.f32.gmra.mrb[10].mxu1 %v10374_v37  ;;  %7270 = vmatprep.mubr.f32.mxu0 %v10377_v12  ;;  %v10616_v37 = vpack.c.bf16 %v4213_v16, %v4212_v60  ;;  %v10772_v16 = vld [vmem:[#allocation2 + $0x90] sm:$0xff] }
 0x296   :  { %1077 = vst [vmem:[#allocation2 + $0x271] sm:$0xff] %v10514_v15  ;;  %12593 = vst [vmem:[#allocation18_spill] sm:$0xff] %v10561_v36  ;;  %7779 = vmatprep.mubr.f32.mxu1 %v10377_v12  ;;  %v1207_v12 = vld [vmem:[#allocation2 + $0x1b1] sm:$0xff] }
 0x297   :  { %12595 = vst [vmem:[#allocation17_spill] sm:$0xff] %v10564_v52  ;;  %12597 = vst [vmem:[#allocation20_spill] sm:$0xff] %v10567_v4 }
 0x298   :  { %1078 = vst [vmem:[#allocation2 + $0x279] sm:$0xff] %v10523_v21  ;;  %1079 = vst [vmem:[#allocation2 + $0x289] sm:$0xff] %v10526_v19  ;;  %v921_v21 = vmax.f32 %v10346_v56, 0.0  ;;  %7271 = vmatmul.mubr.f32.gmra.mrb[78].mxu0 %v10380_v34  ;;  %v4216_v56 = vld [vmem:[#allocation8 + $0x320] sm:$0xff] }
 0x299   :  { %1080 = vst [vmem:[#allocation2 + $0x291] sm:$0xff] %v10529_v23  ;;  %1081 = vst [vmem:[#allocation2 + $0x2a1] sm:$0xff] %v10532_v31  ;;  %7780 = vmatmul.mubr.f32.gmra.mrb[12].mxu1 %v10380_v34  ;;  %7273 = vmatprep.mubr.f32.mxu0 %v10383_v39  ;;  %v12601_v34 = vmax.f32 %v10218_v1, 0.0  ;;  %v12603_v1 = vld [vmem:[#allocation14_spill] sm:$0xff] }
 0x29a   :  { %1082 = vst [vmem:[#allocation2 + $0x2a9] sm:$0xff] %v10541_v40  ;;  %1083 = vst [vmem:[#allocation2 + $0x2b9] sm:$0xff] %v10544_v42  ;;  %7782 = vmatprep.mubr.f32.mxu1 %v10383_v39  ;;  %v1208_v39 = vld [vmem:[#allocation2 + $0x1b9] sm:$0xff] }
 0x29b   :  { %1084 = vst [vmem:[#allocation2 + $0x2c1] sm:$0xff] %v10547_v54  ;;  %1085 = vst [vmem:[#allocation2 + $0x2d1] sm:$0xff] %v10550_v8 }
 0x29c   :  { %1086 = vst [vmem:[#allocation2 + $0x2d9] sm:$0xff] %v10558_v27  ;;  %1087 = vst [vmem:[#allocation2 + $0x2e9] sm:$0xff] %v10561_v36  ;;  %v8453_v36 = vpack.c.bf16 %v1170_v48, %v1169_v58  ;;  %v1173_v58 = vld [vmem:[#allocation8 + $0x70] sm:$0xff]  ;;  %v1174_v48 = vld [vmem:[#allocation8 + $0x78] sm:$0xff]  ;;  %7274 = vmatmul.mubr.f32.gmra.mrb[80].mxu0 %v10389_v20 }
 0x29d   :  { %1088 = vst [vmem:[#allocation2 + $0x2f1] sm:$0xff] %v10564_v52  ;;  %1089 = vst [vmem:[#allocation2 + $0x301] sm:$0xff] %v10567_v4  ;;  %v8581_v52 = vpack.c.bf16 %v3692_v47, %v3691_v26  ;;  %v3693_v4 = vld [vmem:[#allocation8 + $0x2e0] sm:$0xff]  ;;  %v3695_v47 = vld [vmem:[#allocation8 + $0x2f0] sm:$0xff]  ;;  %v8457_v26 = vpack.c.bf16 %v1172_v45, %v1171_v18  ;;  %7783 = vmatmul.mubr.f32.gmra.mrb[14].mxu1 %v10389_v20  ;;  %7276 = vmatprep.mubr.f32.mxu0 %v10392_v28  ;;  %v12602_v20 = vmax.f32 %v10222_v63, 0.0 }
 0x29e   :  { %1090 = vst [vmem:[#allocation2 + $0x309] sm:$0xff] %v10575_v49  ;;  %1091 = vst [vmem:[#allocation2 + $0x319] sm:$0xff] %v10578_v44  ;;  %v8585_v22 = vpack.c.bf16 %v3694_v38, %v3693_v4  ;;  %8454 = vmatprep.subr.bf16.mxu0 %v8453_v36  ;;  %v8589_v46 = vpack.c.bf16 %v3696_v6, %v3695_v47  ;;  %v8461_v4 = vpack.c.bf16 %v1174_v48, %v1173_v58  ;;  %v2091_v63 = vld [vmem:[#allocation8 + $0x100] sm:$0xff]  ;;  %v10758_v38 = vld [vmem:[#allocation2 + $0x6a] sm:$0xff] }
 0x29f   :  { %1092 = vst [vmem:[#allocation2 + $0x321] sm:$0xff] %v10581_v0  ;;  %1094 = vst [vmem:[#allocation2 + $0x339] sm:$0xff] %v921_v21  ;;  %8582 = vmatprep.subr.bf16.mxu1 %v8581_v52  ;;  %8456 = vmatpush3.bf16.msra.mxu0 %v8453_v36  ;;  %v10752_v36 = vld [vmem:[#allocation2 + $0x62] sm:$0xff]  ;;  %v10760_v45 = vld [vmem:[#allocation2 + $0x78] sm:$0xff] }
 0x2a0   :  { %8584 = vmatpush3.bf16.msra.mxu1 %v8581_v52  ;;  %8458 = vmatprep.subr.bf16.mxu0 %v8457_v26  ;;  %v4220_v52 = vld [vmem:[#allocation8 + $0x340] sm:$0xff]  ;;  %v2101_v47 = vld [vmem:[#allocation8 + $0x150] sm:$0xff]  ;;  %v4223_v48 = vld [vmem:[#allocation8 + $0x358] sm:$0xff] }
 0x2a1   :  { %8586 = vmatprep.subr.bf16.mxu1 %v8585_v22  ;;  %7785 = vmatprep.mubr.f32.mxu1 %v10392_v28  ;;  %v2092_v28 = vld [vmem:[#allocation8 + $0x108] sm:$0xff]  ;;  %v10764_v6 = vld [vmem:[#allocation2 + $0x7a] sm:$0xff]  ;;  %v4222_v58 = vld [vmem:[#allocation8 + $0x350] sm:$0xff] }
 0x2a2   :  { %7277 = vmatmul.mubr.f32.gmra.mrb[82].mxu0 %v10395_v50  ;;  %7786 = vmatmul.mubr.f32.gmra.mrb[16].mxu1 %v10395_v50  ;;  %v8465_v50 = vpack.c.bf16 %v2092_v28, %v2091_v63  ;;  %v10780_v63 = vld [vmem:[#allocation2 + $0x98] sm:$0xff] }
 0x2a3   :  { %8460 = vmatpush3.bf16.msra.mxu0 %v8457_v26  ;;  %7279 = vmatprep.mubr.f32.mxu0 %v10398_v24  ;;  %v2102_v26 = vld [vmem:[#allocation8 + $0x158] sm:$0xff] }
 0x2a4   :  { %8588 = vmatpush3.bf16.msra.mxu1 %v8585_v22  ;;  %8462 = vmatprep.subr.bf16.mxu0 %v8461_v4  ;;  %v8485_v60 = vpack.c.bf16 %v2102_v26, %v2101_v47  ;;  %v10782_v28 = vld [vmem:[#allocation2 + $0x9a] sm:$0xff]  ;;  %v10851_v26 = vld [vmem:[#allocation2 + $0x122] sm:$0xff] }
 0x2a5   :  { %8590 = vmatprep.subr.bf16.mxu1 %v8589_v46  ;;  %7788 = vmatprep.mubr.f32.mxu1 %v10398_v24  ;;  %v12604_v24 = vld [vmem:[#allocation18_spill] sm:$0xff]  ;;  %v10849_v47 = vld [vmem:[#allocation2 + $0x120] sm:$0xff] }
 0x2a6   :  { %7280 = vmatmul.mubr.f32.gmra.mrb[84].mxu0 %v10406_v25  ;;  %7789 = vmatmul.mubr.f32.gmra.mrb[18].mxu1 %v10406_v25  ;;  %v12605_v25 = vld [vmem:[#allocation17_spill] sm:$0xff] }
 0x2a7   :  { %8464 = vmatpush3.bf16.msra.mxu0 %v8461_v4  ;;  %7282 = vmatprep.mubr.f32.mxu0 %v10409_v62  ;;  %v10770_v4 = vld [vmem:[#allocation2 + $0x82] sm:$0xff] }
 0x2a8   :  { %8592 = vmatpush3.bf16.msra.mxu1 %v8589_v46  ;;  %7791 = vmatprep.mubr.f32.mxu1 %v10409_v62  ;;  %v12606_v62 = vld [vmem:[#allocation20_spill] sm:$0xff]  ;;  %v10768_v46 = vld [vmem:[#allocation2 + $0x80] sm:$0xff] }
 0x2a9   :  { %8594 = vmatprep.subr.bf16.mxu1 %v10616_v37  ;;  %8466 = vmatprep.subr.bf16.mxu0 %v8465_v50 }
 0x2aa   :  { %7283 = vmatmul.mubr.f32.gmra.mrb[86].mxu0 %v10412_v29  ;;  %7792 = vmatmul.mubr.f32.gmra.mrb[20].mxu1 %v10412_v29  ;;  %v3148_v29 = vld [vmem:[#allocation2 + $0x331] sm:$0xff] }
 0x2ab   :  { %7285 = vmatprep.mubr.f32.mxu0 %v10415_v33  ;;  %7794 = vmatprep.mubr.f32.mxu1 %v10415_v33  ;;  %v2093_v33 = vld [vmem:[#allocation8 + $0x110] sm:$0xff] }
 0x2ae   :  { %7286 = vmatmul.mubr.f32.gmra.mrb[88].mxu0 %v10423_v32  ;;  %7795 = vmatmul.mubr.f32.gmra.mrb[22].mxu1 %v10423_v32  ;;  %v2094_v32 = vld [vmem:[#allocation8 + $0x118] sm:$0xff] }
 0x2af   :  { %7288 = vmatprep.mubr.f32.mxu0 %v10426_v2  ;;  %7797 = vmatprep.mubr.f32.mxu1 %v10426_v2  ;;  %v10713_v2 = vld [vmem:[#allocation2] sm:$0xff] }
 0x2b0   :  { %12607 = vst [vmem:[#allocation19_spill] sm:$0xff] %v10713_v2 }
 0x2b2   :  { %7289 = vmatmul.mubr.f32.gmra.mrb[90].mxu0 %v10429_v35  ;;  %7798 = vmatmul.mubr.f32.gmra.mrb[24].mxu1 %v10429_v35  ;;  %v4214_v35 = vld [vmem:[#allocation8 + $0x310] sm:$0xff] }
 0x2b3   :  { %7291 = vmatprep.mubr.f32.mxu0 %v10432_v41  ;;  %7800 = vmatprep.mubr.f32.mxu1 %v10432_v41  ;;  %v4215_v41 = vld [vmem:[#allocation8 + $0x318] sm:$0xff] }
 0x2b6   :  { %7292 = vmatmul.mubr.f32.gmra.mrb[92].mxu0 %v10439_v14  ;;  %7801 = vmatmul.mubr.f32.gmra.mrb[26].mxu1 %v10439_v14  ;;  %v8469_v14 = vpack.c.bf16 %v2094_v32, %v2093_v33  ;;  %v10788_v33 = vld [vmem:[#allocation2 + $0xaa] sm:$0xff] }
 0x2b7   :  { %7294 = vmatprep.mubr.f32.mxu0 %v10442_v10  ;;  %7803 = vmatprep.mubr.f32.mxu1 %v10442_v10  ;;  %v1097_v10 = vld [vmem:[#allocation2 + $0x18] sm:$0xff]  ;;  %v4226_v32 = vld [vmem:[#allocation8 + $0x370] sm:$0xff] }
 0x2ba   :  { %7295 = vmatmul.mubr.f32.gmra.mrb[94].mxu0 %v10445_v43  ;;  %7804 = vmatmul.mubr.f32.gmra.mrb[28].mxu1 %v10445_v43  ;;  %v10719_v43 = vld [vmem:[#allocation2 + $0x1a] sm:$0xff] }
 0x2bb   :  { %7806 = vmatprep.mubr.f32.mxu1 %v12601_v34  ;;  %7297 = vmatprep.mubr.f32.mxu0 %v1207_v12  ;;  %v2103_v12 = vld [vmem:[#allocation8 + $0x160] sm:$0xff]  ;;  %v2104_v34 = vld [vmem:[#allocation8 + $0x168] sm:$0xff] }
 0x2be   :  { %7298 = vmatmul.mubr.f32.gmra.mrb[96].mxu0 %v1208_v39  ;;  %7807 = vmatmul.mubr.f32.gmra.mrb[30].mxu1 %v12602_v20  ;;  %v10776_v39 = vld [vmem:[#allocation2 + $0x92] sm:$0xff]  ;;  %v4224_v20 = vld [vmem:[#allocation8 + $0x360] sm:$0xff] }
 0x2bf   :  { %7300 = vmatprep.mubr.f32.mxu0 %v10454_v53  ;;  %7809 = vmatprep.mubr.f32.mxu1 %v10454_v53  ;;  %v8597_v53 = vpack.c.bf16 %v4215_v41, %v4214_v35  ;;  %v4227_v35 = vld [vmem:[#allocation8 + $0x378] sm:$0xff] }
 0x2c2   :  { %7301 = vmatmul.mubr.f32.gmra.mrb[98].mxu0 %v10457_v51  ;;  %7810 = vmatmul.mubr.f32.gmra.mrb[32].mxu1 %v10457_v51  ;;  %v10722_v51 = vld [vmem:[#allocation2 + $0x22] sm:$0xff] }
 0x2c3   :  { %7303 = vmatprep.mubr.f32.mxu0 %v10460_v57  ;;  %7812 = vmatprep.mubr.f32.mxu1 %v10460_v57  ;;  %v2095_v57 = vld [vmem:[#allocation8 + $0x120] sm:$0xff] }
 0x2c6   :  { %7304 = vmatmul.mubr.f32.gmra.mrb[100].mxu0 %v10469_v55  ;;  %7813 = vmatmul.mubr.f32.gmra.mrb[34].mxu1 %v10469_v55  ;;  %v2096_v55 = vld [vmem:[#allocation8 + $0x128] sm:$0xff] }
 0x2c7   :  { %7306 = vmatprep.mubr.f32.mxu0 %v10472_v61  ;;  %7815 = vmatprep.mubr.f32.mxu1 %v10472_v61  ;;  %v10725_v61 = vld [vmem:[#allocation2 + $0x30] sm:$0xff] }
 0x2ca   :  { %7307 = vmatmul.mubr.f32.gmra.mrb[102].mxu0 %v10475_v59  ;;  %7816 = vmatmul.mubr.f32.gmra.mrb[36].mxu1 %v10475_v59  ;;  %v4217_v59 = vld [vmem:[#allocation8 + $0x328] sm:$0xff] }
 0x2cb   :  { %7309 = vmatprep.mubr.f32.mxu0 %v10478_v5  ;;  %7818 = vmatprep.mubr.f32.mxu1 %v10478_v5  ;;  %v10729_v5 = vld [vmem:[#allocation2 + $0x32] sm:$0xff] }
 0x2ce   :  { %7310 = vmatmul.mubr.f32.gmra.mrb[104].mxu0 %v10487_v3  ;;  %7819 = vmatmul.mubr.f32.gmra.mrb[38].mxu1 %v10487_v3  ;;  %v10732_v3 = vld [vmem:[#allocation2 + $0x38] sm:$0xff] }
 0x2cf   :  { %7312 = vmatprep.mubr.f32.mxu0 %v10490_v9  ;;  %7821 = vmatprep.mubr.f32.mxu1 %v10490_v9  ;;  %v10734_v9 = vld [vmem:[#allocation2 + $0x3a] sm:$0xff] }
 0x2d2   :  { %7313 = vmatmul.mubr.f32.gmra.mrb[106].mxu0 %v10493_v7  ;;  %7822 = vmatmul.mubr.f32.gmra.mrb[40].mxu1 %v10493_v7  ;;  %v8473_v7 = vpack.c.bf16 %v2096_v55, %v2095_v57  ;;  %v10800_v57 = vld [vmem:[#allocation2 + $0xc2] sm:$0xff] }
 0x2d3   :  { %7315 = vmatprep.mubr.f32.mxu0 %v10496_v13  ;;  %7824 = vmatprep.mubr.f32.mxu1 %v10496_v13  ;;  %v10736_v13 = vld [vmem:[#allocation2 + $0x48] sm:$0xff]  ;;  %v4742_v55 = vld [vmem:[#allocation8 + $0x380] sm:$0xff] }
 0x2d6   :  { %7316 = vmatmul.mubr.f32.gmra.mrb[108].mxu0 %v10505_v30  ;;  %7825 = vmatmul.mubr.f32.gmra.mrb[42].mxu1 %v10505_v30  ;;  %v8601_v30 = vpack.c.bf16 %v4217_v59, %v4216_v56  ;;  %v4743_v56 = vld [vmem:[#allocation8 + $0x388] sm:$0xff] }
 0x2d7   :  { %7318 = vmatprep.mubr.f32.mxu0 %v10508_v11  ;;  %7827 = vmatprep.mubr.f32.mxu1 %v10508_v11  ;;  %v2097_v11 = vld [vmem:[#allocation8 + $0x130] sm:$0xff]  ;;  %v10804_v59 = vld [vmem:[#allocation2 + $0xc8] sm:$0xff] }
 0x2da   :  { %7319 = vmatmul.mubr.f32.gmra.mrb[110].mxu0 %v10511_v17  ;;  %7828 = vmatmul.mubr.f32.gmra.mrb[44].mxu1 %v10511_v17  ;;  %v2098_v17 = vld [vmem:[#allocation8 + $0x138] sm:$0xff] }
 0x2db   :  { %7321 = vmatprep.mubr.f32.mxu0 %v10514_v15  ;;  %7830 = vmatprep.mubr.f32.mxu1 %v10514_v15  ;;  %v10740_v15 = vld [vmem:[#allocation2 + $0x4a] sm:$0xff] }
 0x2de   :  { %7322 = vmatmul.mubr.f32.gmra.mrb[112].mxu0 %v12603_v1  ;;  %7831 = vmatmul.mubr.f32.gmra.mrb[46].mxu1 %v12603_v1  ;;  %v4225_v1 = vld [vmem:[#allocation8 + $0x368] sm:$0xff] }
 0x2df   :  { %7324 = vmatprep.mubr.f32.mxu0 %v10526_v19  ;;  %7833 = vmatprep.mubr.f32.mxu1 %v10526_v19  ;;  %v4219_v19 = vld [vmem:[#allocation8 + $0x338] sm:$0xff] }
 0x2e2   :  { %7325 = vmatmul.mubr.f32.gmra.mrb[114].mxu0 %v10529_v23  ;;  %7834 = vmatmul.mubr.f32.gmra.mrb[48].mxu1 %v10529_v23  ;;  %v10744_v23 = vld [vmem:[#allocation2 + $0x50] sm:$0xff] }
 0x2e3   :  { %7327 = vmatprep.mubr.f32.mxu0 %v10532_v31  ;;  %7836 = vmatprep.mubr.f32.mxu1 %v10532_v31  ;;  %v10746_v31 = vld [vmem:[#allocation2 + $0x52] sm:$0xff] }
 0x2e6   :  { %7328 = vmatmul.mubr.f32.gmra.mrb[116].mxu0 %v10541_v40  ;;  %7837 = vmatmul.mubr.f32.gmra.mrb[50].mxu1 %v10541_v40  ;;  %v8477_v40 = vpack.c.bf16 %v2098_v17, %v2097_v11  ;;  %v10812_v11 = vld [vmem:[#allocation2 + $0xd8] sm:$0xff] }
 0x2e7   :  { %7330 = vmatprep.mubr.f32.mxu0 %v10544_v42  ;;  %7839 = vmatprep.mubr.f32.mxu1 %v10544_v42  ;;  %v10748_v42 = vld [vmem:[#allocation2 + $0x60] sm:$0xff] }
 0x2e8   :  { %v10814_v17 = vld [vmem:[#allocation2 + $0xda] sm:$0xff] }
 0x2ea   :  { %7331 = vmatmul.mubr.f32.gmra.mrb[118].mxu0 %v10547_v54  ;;  %7840 = vmatmul.mubr.f32.gmra.mrb[52].mxu1 %v10547_v54 }
 0x2eb   :  { %7333 = vmatprep.mubr.f32.mxu0 %v10550_v8  ;;  %7842 = vmatprep.mubr.f32.mxu1 %v10550_v8  ;;  %v2099_v8 = vld [vmem:[#allocation8 + $0x140] sm:$0xff] }
 0x2ee   :  { %7334 = vmatmul.mubr.f32.gmra.mrb[120].mxu0 %v10558_v27  ;;  %7843 = vmatmul.mubr.f32.gmra.mrb[54].mxu1 %v10558_v27  ;;  %v2100_v27 = vld [vmem:[#allocation8 + $0x148] sm:$0xff] }
 0x2ef   :  { %7336 = vmatprep.mubr.f32.mxu0 %v12604_v24  ;;  %7845 = vmatprep.mubr.f32.mxu1 %v12604_v24  ;;  %v8481_v18 = vpack.c.bf16 %v2100_v27, %v2099_v8  ;;  %v10784_v24 = vld [vmem:[#allocation2 + $0xa8] sm:$0xff]  ;;  %v10831_v8 = vld [vmem:[#allocation2 + $0xf8] sm:$0xff] }
 0x2f0   :  { %v10833_v27 = vld [vmem:[#allocation2 + $0xfa] sm:$0xff] }
 0x2f2   :  { %7337 = vmatmul.mubr.f32.gmra.mrb[122].mxu0 %v12605_v25  ;;  %7846 = vmatmul.mubr.f32.gmra.mrb[56].mxu1 %v12605_v25  ;;  %v8617_v25 = vpack.c.bf16 %v4225_v1, %v4224_v20  ;;  %v10873_v20 = vld [vmem:[#allocation2 + $0x150] sm:$0xff] }
 0x2f3   :  { %7339 = vmatprep.mubr.f32.mxu0 %v12606_v62  ;;  %7848 = vmatprep.mubr.f32.mxu1 %v12606_v62  ;;  %v2105_v62 = vld [vmem:[#allocation8 + $0x170] sm:$0xff] }
 0x2f4   :  { %v10875_v1 = vld [vmem:[#allocation2 + $0x152] sm:$0xff] }
 0x2f5   :  { %12609 = vst [vmem:[#allocation21_spill] sm:$0xff] %v10875_v1 }
 0x2f6   :  { %7340 = vmatmul.mubr.f32.gmra.mrb[124].mxu0 %v10575_v49  ;;  %7849 = vmatmul.mubr.f32.gmra.mrb[58].mxu1 %v10575_v49  ;;  %v1098_v49 = vld [vmem:[#allocation2 + $0x20] sm:$0xff] }
 0x2f7   :  { %7342 = vmatprep.mubr.f32.mxu0 %v10578_v44  ;;  %7851 = vmatprep.mubr.f32.mxu1 %v10578_v44  ;;  %v4221_v44 = vld [vmem:[#allocation8 + $0x348] sm:$0xff] }
 0x2f8   :  { %v8609_v22 = vpack.c.bf16 %v4221_v44, %v4220_v52  ;;  %v10837_v52 = vld [vmem:[#allocation2 + $0x108] sm:$0xff] }
 0x2f9   :  { %v10839_v44 = vld [vmem:[#allocation2 + $0x10a] sm:$0xff] }
 0x2fa   :  { %7343 = vmatmul.mubr.f32.gmra.mrb[126].mxu0 %v10581_v0  ;;  %7852 = vmatmul.mubr.f32.gmra.mrb[60].mxu1 %v10581_v0  ;;  %v10756_v0 = vld [vmem:[#allocation2 + $0x68] sm:$0xff] }
 0x2fb   :  { %7854 = vmatprep.mubr.f32.mxu1 %v3148_v29  ;;  %7377 = vmatprep.mubr.f32.mxu0 %v10713_v2  ;;  %v2106_v29 = vld [vmem:[#allocation8 + $0x178] sm:$0xff] }
 0x2fc   :  { %v8493_v41 = vpack.c.bf16 %v2106_v29, %v2105_v62  ;;  %v10885_v62 = vld [vmem:[#allocation2 + $0x168] sm:$0xff] }
 0x2fd   :  { %12612 = vst [vmem:[#allocation33_spill] sm:$0xff] %v10885_v62  ;;  %v10887_v29 = vld [vmem:[#allocation2 + $0x16a] sm:$0xff] }
 0x2fe   :  { %7378 = vmatmul.mubr.f32.vlgmr.msra.gmra.mrb[64].mxu0 %v10713_v2  ;;  %7855 = vmatmul.mubr.f32.gmra.mrb[62].mxu1 %v921_v21  ;;  %v4218_v21 = vld [vmem:[#allocation8 + $0x330] sm:$0xff]  ;;  %12613 = vst [vmem:[#allocation34_spill] sm:$0xff] %v10887_v29 }
 0x2ff   :  { %7380 = vmatprep.mubr.f32.mxu0 %v1097_v10  ;;  %7889 = vmatprep.mubr.f32.mxu1 %v10719_v43  ;;  %v8605_v54 = vpack.c.bf16 %v4219_v19, %v4218_v21  ;;  %v10794_v10 = vld [vmem:[#allocation2 + $0xb2] sm:$0xff]  ;;  %v10818_v21 = vld [vmem:[#allocation2 + $0xe0] sm:$0xff] }
 0x300   :  { %8468 = vmatpush3.bf16.msra.mxu0 %v8465_v50  ;;  %v8489_v50 = vpack.c.bf16 %v2104_v34, %v2103_v12  ;;  %v10820_v19 = vld [vmem:[#allocation2 + $0xe2] sm:$0xff] }
 0x301   :  { %8470 = vmatprep.subr.bf16.mxu0 %v8469_v14  ;;  %v10867_v12 = vld [vmem:[#allocation2 + $0x140] sm:$0xff] }
 0x302   :  { %7381 = vmatmul.mubr.f32.gmra.mrb[66].mxu0 %v1098_v49  ;;  %7890 = vmatmul.mubr.f32.vlgmr.msra.gmra.mrb[0].mxu1 %v10722_v51  ;;  %v10796_v49 = vld [vmem:[#allocation2 + $0xc0] sm:$0xff] }
 0x303   :  { %8596 = vmatpush3.bf16.msra.mxu1 %v10616_v37  ;;  %7383 = vmatprep.mubr.f32.mxu0 %v10725_v61  ;;  %v8613_v37 = vpack.c.bf16 %v4223_v48, %v4222_v58  ;;  %v10855_v58 = vld [vmem:[#allocation2 + $0x128] sm:$0xff] }
 0x304   :  { %7892 = vmatprep.mubr.f32.mxu1 %v10729_v5  ;;  %8598 = vmatprep.subr.bf16.mxu1 %v8597_v53  ;;  %v10857_v48 = vld [vmem:[#allocation2 + $0x12a] sm:$0xff]  ;;  %v10869_v34 = vld [vmem:[#allocation2 + $0x142] sm:$0xff] }
 0x305   :  { %8472 = vmatpush3.bf16.msra.mxu0 %v8469_v14  ;;  %v10792_v14 = vld [vmem:[#allocation2 + $0xb0] sm:$0xff]  ;;  %12608 = vst [vmem:[#allocation22_spill] sm:$0xff] %v10869_v34 }
 0x306   :  { %7384 = vmatmul.mubr.f32.gmra.mrb[68].mxu0 %v10732_v3  ;;  %7893 = vmatmul.mubr.f32.gmra.mrb[2].mxu1 %v10734_v9 }
 0x307   :  { %7386 = vmatprep.mubr.f32.mxu0 %v10736_v13  ;;  %7895 = vmatprep.mubr.f32.mxu1 %v10740_v15 }
 0x308   :  { %8600 = vmatpush3.bf16.msra.mxu1 %v8597_v53  ;;  %8474 = vmatprep.subr.bf16.mxu0 %v8473_v7  ;;  %v8621_v53 = vpack.c.bf16 %v4227_v35, %v4226_v32  ;;  %v10891_v32 = vld [vmem:[#allocation2 + $0x170] sm:$0xff] }
 0x309   :  { %8602 = vmatprep.subr.bf16.mxu1 %v8601_v30  ;;  %8476 = vmatpush3.bf16.msra.mxu0 %v8473_v7  ;;  %v10806_v7 = vld [vmem:[#allocation2 + $0xca] sm:$0xff]  ;;  %12614 = vst [vmem:[#allocation36_spill] sm:$0xff] %v10891_v32  ;;  %v10893_v35 = vld [vmem:[#allocation2 + $0x172] sm:$0xff] }
 0x30a   :  { %7387 = vmatmul.mubr.f32.gmra.mrb[70].mxu0 %v10744_v23  ;;  %7896 = vmatmul.mubr.f32.gmra.mrb[4].mxu1 %v10746_v31  ;;  %12615 = vst [vmem:[#allocation15_spill] sm:$0xff] %v10893_v35 }
 0x30b   :  { %7389 = vmatprep.mubr.f32.mxu0 %v10748_v42  ;;  %7898 = vmatprep.mubr.f32.mxu1 %v10752_v36 }
 0x30c   :  { %8604 = vmatpush3.bf16.msra.mxu1 %v8601_v30  ;;  %8478 = vmatprep.subr.bf16.mxu0 %v8477_v40  ;;  %v10808_v30 = vpack.c.bf16 %v4743_v56, %v4742_v55  ;;  %v1129_v55 = vld [vmem:[#allocation2 + $0x1c8] sm:$0xff] }
 0x30d   :  { %8606 = vmatprep.subr.bf16.mxu1 %v8605_v54  ;;  %8480 = vmatpush3.bf16.msra.mxu0 %v8477_v40  ;;  %v10825_v40 = vld [vmem:[#allocation2 + $0xf0] sm:$0xff] }
 0x30e   :  { %7390 = vmatmul.mubr.f32.gmra.mrb[72].mxu0 %v10756_v0  ;;  %7899 = vmatmul.mubr.f32.gmra.mrb[6].mxu1 %v10758_v38  ;;  %v10899_v56 = vld [vmem:[#allocation2 + $0x1ca] sm:$0xff] }
 0x30f   :  { %7392 = vmatprep.mubr.f32.mxu0 %v10760_v45  ;;  %7901 = vmatprep.mubr.f32.mxu1 %v10764_v6  ;;  %12616 = vst [vmem:[#allocation35_spill] sm:$0xff] %v10899_v56 }
 0x310   :  { %8608 = vmatpush3.bf16.msra.mxu1 %v8605_v54  ;;  %8482 = vmatprep.subr.bf16.mxu0 %v8481_v18  ;;  %v10827_v54 = vld [vmem:[#allocation2 + $0xf2] sm:$0xff] }
 0x311   :  { %8610 = vmatprep.subr.bf16.mxu1 %v8609_v22  ;;  %8484 = vmatpush3.bf16.msra.mxu0 %v8481_v18  ;;  %v10843_v18 = vld [vmem:[#allocation2 + $0x110] sm:$0xff] }
 0x312   :  { %7393 = vmatmul.mubr.f32.gmra.mrb[74].mxu0 %v10768_v46  ;;  %7902 = vmatmul.mubr.f32.gmra.mrb[8].mxu1 %v10770_v4 }
 0x313   :  { %7395 = vmatprep.mubr.f32.mxu0 %v10772_v16  ;;  %7904 = vmatprep.mubr.f32.mxu1 %v10776_v39 }
 0x314   :  { %8612 = vmatpush3.bf16.msra.mxu1 %v8609_v22  ;;  %8486 = vmatprep.subr.bf16.mxu0 %v8485_v60  ;;  %v10845_v22 = vld [vmem:[#allocation2 + $0x112] sm:$0xff] }
 0x315   :  { %8614 = vmatprep.subr.bf16.mxu1 %v8613_v37  ;;  %8488 = vmatpush3.bf16.msra.mxu0 %v8485_v60  ;;  %v10861_v60 = vld [vmem:[#allocation2 + $0x138] sm:$0xff] }
 0x316   :  { %7396 = vmatmul.mubr.f32.gmra.mrb[76].mxu0 %v10780_v63  ;;  %7905 = vmatmul.mubr.f32.gmra.mrb[10].mxu1 %v10782_v28 }
 0x317   :  { %7398 = vmatprep.mubr.f32.mxu0 %v10784_v24  ;;  %7907 = vmatprep.mubr.f32.mxu1 %v10788_v33 }
 0x318   :  { %8616 = vmatpush3.bf16.msra.mxu1 %v8613_v37  ;;  %8490 = vmatprep.subr.bf16.mxu0 %v8489_v50  ;;  %v10863_v37 = vld [vmem:[#allocation2 + $0x13a] sm:$0xff] }
 0x319   :  { %8618 = vmatprep.subr.bf16.mxu1 %v8617_v25  ;;  %8492 = vmatpush3.bf16.msra.mxu0 %v8489_v50  ;;  %v10879_v50 = vld [vmem:[#allocation2 + $0x158] sm:$0xff] }
 0x31a   :  { %7399 = vmatmul.mubr.f32.gmra.mrb[78].mxu0 %v10792_v14  ;;  %7908 = vmatmul.mubr.f32.gmra.mrb[12].mxu1 %v10794_v10  ;;  %12610 = vst [vmem:[#allocation24_spill] sm:$0xff] %v10879_v50 }
 0x31b   :  { %7401 = vmatprep.mubr.f32.mxu0 %v10796_v49  ;;  %7910 = vmatprep.mubr.f32.mxu1 %v10800_v57 }
 0x31c   :  { %8620 = vmatpush3.bf16.msra.mxu1 %v8617_v25  ;;  %8494 = vmatprep.subr.bf16.mxu0 %v8493_v41  ;;  %v10881_v25 = vld [vmem:[#allocation2 + $0x15a] sm:$0xff] }
 0x31d   :  { %8622 = vmatprep.subr.bf16.mxu1 %v8621_v53  ;;  %8496 = vmatpush3.bf16.msra.mxu0 %v8493_v41  ;;  %12611 = vst [vmem:[#allocation23_spill] sm:$0xff] %v10881_v25  ;;  %v3646_v41 = vld [vmem:[#allocation2 + $0x182] sm:$0xff] }
 0x31e   :  { %7402 = vmatmul.mubr.f32.gmra.mrb[80].mxu0 %v10804_v59  ;;  %7911 = vmatmul.mubr.f32.gmra.mrb[14].mxu1 %v10806_v7 }
 0x31f   :  { %7404 = vmatprep.mubr.f32.mxu0 %v10812_v11  ;;  %7913 = vmatprep.mubr.f32.mxu1 %v10814_v17 }
 0x320   :  { %8624 = vmatpush3.bf16.msra.mxu1 %v8621_v53  ;;  %v3647_v53 = vld [vmem:[#allocation2 + $0x18a] sm:$0xff] }
 0x321   :  { %8626 = vmatprep.subr.bf16.mxu1 %v10808_v30 }
 0x322   :  { %7405 = vmatmul.mubr.f32.gmra.mrb[82].mxu0 %v10818_v21  ;;  %7914 = vmatmul.mubr.f32.gmra.mrb[16].mxu1 %v10820_v19 }
 0x323   :  { %7407 = vmatprep.mubr.f32.mxu0 %v10825_v40  ;;  %7916 = vmatprep.mubr.f32.mxu1 %v10827_v54 }
 0x326   :  { %7408 = vmatmul.mubr.f32.gmra.mrb[84].mxu0 %v10831_v8  ;;  %7917 = vmatmul.mubr.f32.gmra.mrb[18].mxu1 %v10833_v27 }
 0x327   :  { %7410 = vmatprep.mubr.f32.mxu0 %v10837_v52  ;;  %7919 = vmatprep.mubr.f32.mxu1 %v10839_v44 }
 0x32a   :  { %7411 = vmatmul.mubr.f32.gmra.mrb[86].mxu0 %v10843_v18  ;;  %7920 = vmatmul.mubr.f32.gmra.mrb[20].mxu1 %v10845_v22 }
 0x32b   :  { %7413 = vmatprep.mubr.f32.mxu0 %v10849_v47  ;;  %7922 = vmatprep.mubr.f32.mxu1 %v10851_v26 }
 0x32e   :  { %7414 = vmatmul.mubr.f32.gmra.mrb[88].mxu0 %v10855_v58  ;;  %7923 = vmatmul.mubr.f32.gmra.mrb[22].mxu1 %v10857_v48 }
 0x32f   :  { %7416 = vmatprep.mubr.f32.mxu0 %v10861_v60  ;;  %7925 = vmatprep.mubr.f32.mxu1 %v10863_v37 }
 0x332   :  { %7417 = vmatmul.mubr.f32.gmra.mrb[90].mxu0 %v10867_v12  ;;  %7926 = vmatmul.mubr.f32.gmra.mrb[24].mxu1 %v10869_v34 }
 0x333   :  { %7419 = vmatprep.mubr.f32.mxu0 %v10873_v20  ;;  %7928 = vmatprep.mubr.f32.mxu1 %v10875_v1  ;;  %v3679_v1 = vld [vmem:[#allocation2 + $0x33a] sm:$0xff] }
 0x336   :  { %7420 = vmatmul.mubr.f32.gmra.mrb[92].mxu0 %v10879_v50  ;;  %7929 = vmatmul.mubr.f32.gmra.mrb[26].mxu1 %v10881_v25  ;;  %v10902_v25 = vld [vmem:[#allocation2 + $0x1d2] sm:$0xff] }
 0x337   :  { %7422 = vmatprep.mubr.f32.mxu0 %v10885_v62  ;;  %7931 = vmatprep.mubr.f32.mxu1 %v10887_v29  ;;  %v1130_v29 = vld [vmem:[#allocation2 + $0x1d0] sm:$0xff]  ;;  %12617 = vst [vmem:[#allocation25_spill] sm:$0xff] %v10902_v25 }
 0x338   :  { %v2027_v62 = vld [vmem:[#allocation2 + $0xa] sm:$0xff] }
 0x339   :  { %v4744_v50 = vld [vmem:[#allocation8 + $0x390] sm:$0xff] }
 0x33a   :  { %7423 = vmatmul.mubr.f32.gmra.mrb[94].mxu0 %v10891_v32  ;;  %7932 = vmatmul.mubr.f32.gmra.mrb[28].mxu1 %v10893_v35  ;;  %v10905_v35 = vld [vmem:[#allocation2 + $0x1e0] sm:$0xff]  ;;  %v10999_v32 = vld [vmem:[#allocation2 + $0x292] sm:$0xff] }
 0x33b   :  { %7934 = vmatprep.mubr.f32.mxu1 %v3646_v41  ;;  %7425 = vmatprep.mubr.f32.mxu0 %v10713_v2  ;;  %12618 = vst [vmem:[#allocation26_spill] sm:$0xff] %v10905_v35  ;;  %v10907_v41 = vld [vmem:[#allocation2 + $0x1e2] sm:$0xff]  ;;  %12649 = vst [vmem:[#allocation55_spill] sm:$0xff] %v10999_v32 }
 0x33c   :  { %12619 = vst [vmem:[#allocation27_spill] sm:$0xff] %v10907_v41 }
 0x33e   :  { %7426 = vmatmul.mubr.f32.gmra.mrb[96].mxu0 %v10713_v2  ;;  %7935 = vmatmul.mubr.f32.gmra.mrb[30].mxu1 %v3647_v53  ;;  %v10911_v53 = vld [vmem:[#allocation2 + $0x1e8] sm:$0xff] }
 0x33f   :  { %7428 = vmatprep.mubr.f32.mxu0 %v1129_v55  ;;  %7937 = vmatprep.mubr.f32.mxu1 %v10899_v56  ;;  %12620 = vst [vmem:[#allocation28_spill] sm:$0xff] %v10911_v53  ;;  %v10913_v2 = vld [vmem:[#allocation2 + $0x1ea] sm:$0xff]  ;;  %v10917_v55 = vld [vmem:[#allocation2 + $0x1f8] sm:$0xff] }
 0x340   :  { %12621 = vst [vmem:[#allocation29_spill] sm:$0xff] %v10913_v2  ;;  %12622 = vst [vmem:[#allocation30_spill] sm:$0xff] %v10917_v55  ;;  %v2622_v56 = vld [vmem:[#allocation8 + $0x188] sm:$0xff] }
 0x342   :  { %7429 = vmatmul.mubr.f32.gmra.mrb[98].mxu0 %v1130_v29  ;;  %7938 = vmatmul.mubr.f32.gmra.mrb[32].mxu1 %v10902_v25  ;;  %v10919_v29 = vld [vmem:[#allocation2 + $0x1fa] sm:$0xff] }
 0x343   :  { %7431 = vmatprep.mubr.f32.mxu0 %v10905_v35  ;;  %7940 = vmatprep.mubr.f32.mxu1 %v10907_v41  ;;  %12623 = vst [vmem:[#allocation31_spill] sm:$0xff] %v10919_v29  ;;  %v10923_v25 = vld [vmem:[#allocation2 + $0x200] sm:$0xff]  ;;  %v10929_v41 = vld [vmem:[#allocation2 + $0x210] sm:$0xff] }
 0x344   :  { %12624 = vst [vmem:[#allocation13_spill] sm:$0xff] %v10923_v25  ;;  %v10925_v35 = vld [vmem:[#allocation2 + $0x202] sm:$0xff]  ;;  %12626 = vst [vmem:[#allocation16_spill] sm:$0xff] %v10929_v41 }
 0x345   :  { %12625 = vst [vmem:[#allocation32_spill] sm:$0xff] %v10925_v35 }
 0x346   :  { %7432 = vmatmul.mubr.f32.gmra.mrb[100].mxu0 %v10911_v53  ;;  %7941 = vmatmul.mubr.f32.gmra.mrb[34].mxu1 %v10913_v2  ;;  %v10931_v53 = vld [vmem:[#allocation2 + $0x212] sm:$0xff] }
 0x347   :  { %7434 = vmatprep.mubr.f32.mxu0 %v10917_v55  ;;  %7943 = vmatprep.mubr.f32.mxu1 %v10919_v29  ;;  %12627 = vst [vmem:[#allocation14_spill] sm:$0xff] %v10931_v53  ;;  %v10935_v2 = vld [vmem:[#allocation2 + $0x218] sm:$0xff]  ;;  %v10941_v29 = vld [vmem:[#allocation2 + $0x228] sm:$0xff] }
 0x348   :  { %12628 = vst [vmem:[#allocation18_spill] sm:$0xff] %v10935_v2  ;;  %v10937_v55 = vld [vmem:[#allocation2 + $0x21a] sm:$0xff]  ;;  %12630 = vst [vmem:[#allocation20_spill] sm:$0xff] %v10941_v29 }
 0x349   :  { %12629 = vst [vmem:[#allocation17_spill] sm:$0xff] %v10937_v55 }
 0x34a   :  { %7435 = vmatmul.mubr.f32.gmra.mrb[102].mxu0 %v10923_v25  ;;  %7944 = vmatmul.mubr.f32.gmra.mrb[36].mxu1 %v10925_v35  ;;  %v10943_v25 = vld [vmem:[#allocation2 + $0x22a] sm:$0xff] }
 0x34b   :  { %7437 = vmatprep.mubr.f32.mxu0 %v10929_v41  ;;  %7946 = vmatprep.mubr.f32.mxu1 %v10931_v53  ;;  %12631 = vst [vmem:[#allocation37_spill] sm:$0xff] %v10943_v25  ;;  %v10947_v35 = vld [vmem:[#allocation2 + $0x230] sm:$0xff]  ;;  %v10953_v53 = vld [vmem:[#allocation2 + $0x240] sm:$0xff] }
 0x34c   :  { %12632 = vst [vmem:[#allocation38_spill] sm:$0xff] %v10947_v35  ;;  %v10949_v41 = vld [vmem:[#allocation2 + $0x232] sm:$0xff]  ;;  %12634 = vst [vmem:[#allocation40_spill] sm:$0xff] %v10953_v53 }
 0x34d   :  { %12633 = vst [vmem:[#allocation39_spill] sm:$0xff] %v10949_v41 }
 0x34e   :  { %7438 = vmatmul.mubr.f32.gmra.mrb[104].mxu0 %v10935_v2  ;;  %7947 = vmatmul.mubr.f32.gmra.mrb[38].mxu1 %v10937_v55  ;;  %v10955_v2 = vld [vmem:[#allocation2 + $0x242] sm:$0xff] }
 0x34f   :  { %7440 = vmatprep.mubr.f32.mxu0 %v10941_v29  ;;  %7949 = vmatprep.mubr.f32.mxu1 %v10943_v25  ;;  %12635 = vst [vmem:[#allocation41_spill] sm:$0xff] %v10955_v2  ;;  %v10959_v55 = vld [vmem:[#allocation2 + $0x248] sm:$0xff]  ;;  %v10965_v25 = vld [vmem:[#allocation2 + $0x258] sm:$0xff] }
 0x350   :  { %12636 = vst [vmem:[#allocation42_spill] sm:$0xff] %v10959_v55  ;;  %v10961_v29 = vld [vmem:[#allocation2 + $0x24a] sm:$0xff]  ;;  %12638 = vst [vmem:[#allocation44_spill] sm:$0xff] %v10965_v25 }
 0x351   :  { %12637 = vst [vmem:[#allocation43_spill] sm:$0xff] %v10961_v29 }
 0x352   :  { %7441 = vmatmul.mubr.f32.gmra.mrb[106].mxu0 %v10947_v35  ;;  %7950 = vmatmul.mubr.f32.gmra.mrb[40].mxu1 %v10949_v41  ;;  %v10967_v35 = vld [vmem:[#allocation2 + $0x25a] sm:$0xff] }
 0x353   :  { %7443 = vmatprep.mubr.f32.mxu0 %v10953_v53  ;;  %7952 = vmatprep.mubr.f32.mxu1 %v10955_v2  ;;  %12639 = vst [vmem:[#allocation45_spill] sm:$0xff] %v10967_v35  ;;  %v10971_v41 = vld [vmem:[#allocation2 + $0x260] sm:$0xff]  ;;  %v10977_v2 = vld [vmem:[#allocation2 + $0x270] sm:$0xff] }
 0x354   :  { %12640 = vst [vmem:[#allocation46_spill] sm:$0xff] %v10971_v41  ;;  %v10973_v53 = vld [vmem:[#allocation2 + $0x262] sm:$0xff]  ;;  %12642 = vst [vmem:[#allocation48_spill] sm:$0xff] %v10977_v2 }
 0x355   :  { %12641 = vst [vmem:[#allocation47_spill] sm:$0xff] %v10973_v53 }
 0x356   :  { %7444 = vmatmul.mubr.f32.gmra.mrb[108].mxu0 %v10959_v55  ;;  %7953 = vmatmul.mubr.f32.gmra.mrb[42].mxu1 %v10961_v29  ;;  %v10979_v55 = vld [vmem:[#allocation2 + $0x272] sm:$0xff] }
 0x357   :  { %7446 = vmatprep.mubr.f32.mxu0 %v10965_v25  ;;  %7955 = vmatprep.mubr.f32.mxu1 %v10967_v35  ;;  %12643 = vst [vmem:[#allocation49_spill] sm:$0xff] %v10979_v55  ;;  %v10983_v29 = vld [vmem:[#allocation2 + $0x278] sm:$0xff]  ;;  %v10987_v35 = vld [vmem:[#allocation2 + $0x288] sm:$0xff] }
 0x358   :  { %12644 = vst [vmem:[#allocation50_spill] sm:$0xff] %v10983_v29  ;;  %v10985_v25 = vld [vmem:[#allocation2 + $0x27a] sm:$0xff]  ;;  %12646 = vst [vmem:[#allocation52_spill] sm:$0xff] %v10987_v35 }
 0x359   :  { %12645 = vst [vmem:[#allocation51_spill] sm:$0xff] %v10985_v25 }
 0x35a   :  { %7447 = vmatmul.mubr.f32.gmra.mrb[110].mxu0 %v10971_v41  ;;  %7956 = vmatmul.mubr.f32.gmra.mrb[44].mxu1 %v10973_v53  ;;  %v10991_v41 = vld [vmem:[#allocation2 + $0x28a] sm:$0xff]  ;;  %v2621_v53 = vld [vmem:[#allocation8 + $0x180] sm:$0xff] }
 0x35b   :  { %7449 = vmatprep.mubr.f32.mxu0 %v10977_v2  ;;  %7958 = vmatprep.mubr.f32.mxu1 %v10979_v55  ;;  %12647 = vst [vmem:[#allocation53_spill] sm:$0xff] %v10991_v41  ;;  %v10995_v2 = vpack.c.bf16 %v2622_v56, %v2621_v53  ;;  %v10997_v55 = vld [vmem:[#allocation2 + $0x290] sm:$0xff]  ;;  %v11010_v56 = vld [vmem:[#allocation2 + $0x2a8] sm:$0xff] }
 0x35c   :  { %12648 = vst [vmem:[#allocation54_spill] sm:$0xff] %v10997_v55  ;;  %12652 = vst [vmem:[#allocation58_spill] sm:$0xff] %v11010_v56  ;;  %v11012_v53 = vld [vmem:[#allocation2 + $0x2aa] sm:$0xff] }
 0x35d   :  { %8498 = vmatprep.subr.bf16.mxu0 %v10995_v2  ;;  %12653 = vst [vmem:[#allocation59_spill] sm:$0xff] %v11012_v53 }
 0x35e   :  { %7450 = vmatmul.mubr.f32.gmra.mrb[112].mxu0 %v10983_v29  ;;  %7959 = vmatmul.mubr.f32.gmra.mrb[46].mxu1 %v10985_v25  ;;  %v11004_v25 = vld [vmem:[#allocation2 + $0x2a0] sm:$0xff] }
 0x35f   :  { %7452 = vmatprep.mubr.f32.mxu0 %v10987_v35  ;;  %7961 = vmatprep.mubr.f32.mxu1 %v10991_v41  ;;  %12650 = vst [vmem:[#allocation56_spill] sm:$0xff] %v11004_v25  ;;  %v11006_v29 = vld [vmem:[#allocation2 + $0x2a2] sm:$0xff]  ;;  %v11016_v41 = vld [vmem:[#allocation2 + $0x2b8] sm:$0xff]  ;;  %v2623_v35 = vld [vmem:[#allocation8 + $0x190] sm:$0xff] }
 0x360   :  { %12651 = vst [vmem:[#allocation57_spill] sm:$0xff] %v11006_v29  ;;  %12654 = vst [vmem:[#allocation60_spill] sm:$0xff] %v11016_v41 }
 0x362   :  { %7453 = vmatmul.mubr.f32.gmra.mrb[114].mxu0 %v10997_v55  ;;  %7962 = vmatmul.mubr.f32.gmra.mrb[48].mxu1 %v10999_v32  ;;  %v11018_v55 = vld [vmem:[#allocation2 + $0x2ba] sm:$0xff] }
 0x363   :  { %7455 = vmatprep.mubr.f32.mxu0 %v11004_v25  ;;  %7964 = vmatprep.mubr.f32.mxu1 %v11006_v29  ;;  %12655 = vst [vmem:[#allocation61_spill] sm:$0xff] %v11018_v55  ;;  %v11022_v32 = vld [vmem:[#allocation2 + $0x2c0] sm:$0xff]  ;;  %v11028_v29 = vld [vmem:[#allocation2 + $0x2d0] sm:$0xff] }
 0x364   :  { %12656 = vst [vmem:[#allocation62_spill] sm:$0xff] %v11022_v32  ;;  %v11024_v25 = vld [vmem:[#allocation2 + $0x2c2] sm:$0xff]  ;;  %12658 = vst [vmem:[#allocation64_spill] sm:$0xff] %v11028_v29 }
 0x365   :  { %12657 = vst [vmem:[#allocation63_spill] sm:$0xff] %v11024_v25 }
 0x366   :  { %7456 = vmatmul.mubr.f32.gmra.mrb[116].mxu0 %v11010_v56  ;;  %7965 = vmatmul.mubr.f32.gmra.mrb[50].mxu1 %v11012_v53  ;;  %v11030_v56 = vld [vmem:[#allocation2 + $0x2d2] sm:$0xff] }
 0x367   :  { %7458 = vmatprep.mubr.f32.mxu0 %v11016_v41  ;;  %7967 = vmatprep.mubr.f32.mxu1 %v11018_v55  ;;  %12659 = vst [vmem:[#allocation65_spill] sm:$0xff] %v11030_v56  ;;  %v11034_v53 = vld [vmem:[#allocation2 + $0x2d8] sm:$0xff]  ;;  %v11040_v55 = vld [vmem:[#allocation2 + $0x2e8] sm:$0xff] }
 0x368   :  { %12660 = vst [vmem:[#allocation66_spill] sm:$0xff] %v11034_v53  ;;  %v11036_v41 = vld [vmem:[#allocation2 + $0x2da] sm:$0xff]  ;;  %12662 = vst [vmem:[#allocation68_spill] sm:$0xff] %v11040_v55 }
 0x369   :  { %12661 = vst [vmem:[#allocation67_spill] sm:$0xff] %v11036_v41 }
 0x36a   :  { %7459 = vmatmul.mubr.f32.gmra.mrb[118].mxu0 %v11022_v32  ;;  %7968 = vmatmul.mubr.f32.gmra.mrb[52].mxu1 %v11024_v25  ;;  %v11042_v32 = vld [vmem:[#allocation2 + $0x2ea] sm:$0xff] }
 0x36b   :  { %7461 = vmatprep.mubr.f32.mxu0 %v11028_v29  ;;  %7970 = vmatprep.mubr.f32.mxu1 %v11030_v56  ;;  %12663 = vst [vmem:[#allocation69_spill] sm:$0xff] %v11042_v32  ;;  %v11046_v25 = vld [vmem:[#allocation2 + $0x2f0] sm:$0xff]  ;;  %v11052_v56 = vld [vmem:[#allocation2 + $0x300] sm:$0xff] }
 0x36c   :  { %12664 = vst [vmem:[#allocation70_spill] sm:$0xff] %v11046_v25  ;;  %v11048_v29 = vld [vmem:[#allocation2 + $0x2f2] sm:$0xff]  ;;  %12666 = vst [vmem:[#allocation72_spill] sm:$0xff] %v11052_v56 }
 0x36d   :  { %12665 = vst [vmem:[#allocation71_spill] sm:$0xff] %v11048_v29 }
 0x36e   :  { %7462 = vmatmul.mubr.f32.gmra.mrb[120].mxu0 %v11034_v53  ;;  %7971 = vmatmul.mubr.f32.gmra.mrb[54].mxu1 %v11036_v41  ;;  %v11054_v53 = vld [vmem:[#allocation2 + $0x302] sm:$0xff] }
 0x36f   :  { %7464 = vmatprep.mubr.f32.mxu0 %v11040_v55  ;;  %7973 = vmatprep.mubr.f32.mxu1 %v11042_v32  ;;  %12667 = vst [vmem:[#allocation73_spill] sm:$0xff] %v11054_v53  ;;  %v11058_v41 = vld [vmem:[#allocation2 + $0x308] sm:$0xff]  ;;  %v11064_v32 = vld [vmem:[#allocation2 + $0x318] sm:$0xff] }
 0x370   :  { %12668 = vst [vmem:[#allocation74_spill] sm:$0xff] %v11058_v41  ;;  %v11060_v55 = vld [vmem:[#allocation2 + $0x30a] sm:$0xff]  ;;  %12670 = vst [vmem:[#allocation76_spill] sm:$0xff] %v11064_v32 }
 0x371   :  { %12669 = vst [vmem:[#allocation75_spill] sm:$0xff] %v11060_v55 }
 0x372   :  { %7465 = vmatmul.mubr.f32.gmra.mrb[122].mxu0 %v11046_v25  ;;  %7974 = vmatmul.mubr.f32.gmra.mrb[56].mxu1 %v11048_v29  ;;  %v11066_v25 = vld [vmem:[#allocation2 + $0x31a] sm:$0xff]  ;;  %v2026_v29 = vld [vmem:[#allocation2 + $0x2] sm:$0xff] }
 0x373   :  { %7467 = vmatprep.mubr.f32.mxu0 %v11052_v56  ;;  %7976 = vmatprep.mubr.f32.mxu1 %v11054_v53  ;;  %12671 = vst [vmem:[#allocation77_spill] sm:$0xff] %v11066_v25  ;;  %v11070_v56 = vld [vmem:[#allocation2 + $0x320] sm:$0xff] }
 0x374   :  { %12672 = vst [vmem:[#allocation78_spill] sm:$0xff] %v11070_v56  ;;  %v11072_v53 = vld [vmem:[#allocation2 + $0x322] sm:$0xff] }
 0x375   :  { %12673 = vst [vmem:[#allocation79_spill] sm:$0xff] %v11072_v53 }
 0x376   :  { %7468 = vmatmul.mubr.f32.gmra.mrb[124].mxu0 %v11058_v41  ;;  %7977 = vmatmul.mubr.f32.gmra.mrb[58].mxu1 %v11060_v55  ;;  %v3678_v41 = vld [vmem:[#allocation2 + $0x332] sm:$0xff] }
 0x377   :  { %7470 = vmatprep.mubr.f32.mxu0 %v11064_v32  ;;  %7979 = vmatprep.mubr.f32.mxu1 %v11066_v25  ;;  %v2624_v55 = vld [vmem:[#allocation8 + $0x198] sm:$0xff] }
 0x378   :  { %v4745_v32 = vld [vmem:[#allocation8 + $0x398] sm:$0xff]  ;;  %v8501_v34 = vpack.c.bf16 %v2624_v55, %v2623_v35  ;;  %v2635_v35 = vld [vmem:[#allocation8 + $0x1f0] sm:$0xff] }
 0x379   :  { %v8629_v25 = vpack.c.bf16 %v4745_v32, %v4744_v50  ;;  %v2631_v50 = vld [vmem:[#allocation8 + $0x1d0] sm:$0xff]  ;;  %v2634_v32 = vld [vmem:[#allocation8 + $0x1e8] sm:$0xff]  ;;  %v2636_v55 = vld [vmem:[#allocation8 + $0x1f8] sm:$0xff] }
 0x37a   :  { %7471 = vmatmul.mubr.f32.gmra.mrb[126].mxu0 %v11070_v56  ;;  %7980 = vmatmul.mubr.f32.gmra.mrb[60].mxu1 %v11072_v53  ;;  %v2625_v53 = vld [vmem:[#allocation8 + $0x1a0] sm:$0xff]  ;;  %v2626_v56 = vld [vmem:[#allocation8 + $0x1a8] sm:$0xff] }
 0x37b   :  { %7982 = vmatprep.mubr.f32.mxu1 %v3678_v41  ;;  %7505 = vmatprep.mubr.f32.mxu0 %v2026_v29  ;;  %v4746_v41 = vld [vmem:[#allocation8 + $0x3a0] sm:$0xff]  ;;  %v4747_v29 = vld [vmem:[#allocation8 + $0x3a8] sm:$0xff] }
 0x37e   :  { %7506 = vmatmul.mubr.f32.vlgmr.msra.gmra.mrb[64].mxu0 %v2027_v62  ;;  %7983 = vmatmul.mubr.f32.gmra.mrb[62].mxu1 %v3679_v1  ;;  %v2628_v1 = vld [vmem:[#allocation8 + $0x1b8] sm:$0xff]  ;;  %v2633_v62 = vld [vmem:[#allocation8 + $0x1e0] sm:$0xff] }
 0x37f   :  { %7508 = vmatprep.mubr.f32.mxu0 %v10719_v43  ;;  %8017 = vmatprep.mubr.f32.mxu1 %v10725_v61  ;;  %v8505_v43 = vpack.c.bf16 %v2626_v56, %v2625_v53  ;;  %v8633_v61 = vpack.c.bf16 %v4747_v29, %v4746_v41  ;;  %v5272_v56 = vld [vmem:[#allocation8 + $0x400] sm:$0xff]  ;;  %v12696_v53 = vld [vmem:[#allocation20_spill] sm:$0xff]  ;;  %v12698_v29 = vld [vmem:[#allocation38_spill] sm:$0xff] }
 0x380   :  { %8500 = vmatpush3.bf16.msra.mxu0 %v10995_v2  ;;  %v2627_v2 = vld [vmem:[#allocation8 + $0x1b0] sm:$0xff]  ;;  %v12697_v41 = vld [vmem:[#allocation17_spill] sm:$0xff] }
 0x381   :  { %8502 = vmatprep.subr.bf16.mxu0 %v8501_v34 }
 0x382   :  { %7509 = vmatmul.mubr.f32.gmra.mrb[66].mxu0 %v10722_v51  ;;  %8018 = vmatmul.mubr.f32.vlgmr.msra.gmra.mrb[0].mxu1 %v10732_v3  ;;  %v4748_v51 = vld [vmem:[#allocation8 + $0x3b0] sm:$0xff]  ;;  %v4749_v3 = vld [vmem:[#allocation8 + $0x3b8] sm:$0xff] }
 0x383   :  { %8628 = vmatpush3.bf16.msra.mxu1 %v10808_v30  ;;  %7511 = vmatprep.mubr.f32.mxu0 %v10729_v5  ;;  %v8509_v5 = vpack.c.bf16 %v2628_v1, %v2627_v2  ;;  %v2629_v30 = vld [vmem:[#allocation8 + $0x1c0] sm:$0xff]  ;;  %v12701_v2 = vld [vmem:[#allocation39_spill] sm:$0xff]  ;;  %v12702_v1 = vld [vmem:[#allocation42_spill] sm:$0xff] }
 0x384   :  { %8020 = vmatprep.mubr.f32.mxu1 %v10736_v13  ;;  %8630 = vmatprep.subr.bf16.mxu1 %v8629_v25  ;;  %v8637_v13 = vpack.c.bf16 %v4749_v3, %v4748_v51  ;;  %v12703_v51 = vld [vmem:[#allocation41_spill] sm:$0xff]  ;;  %v12704_v3 = vld [vmem:[#allocation44_spill] sm:$0xff] }
 0x385   :  { %8504 = vmatpush3.bf16.msra.mxu0 %v8501_v34  ;;  %v2630_v34 = vld [vmem:[#allocation8 + $0x1c8] sm:$0xff] }
 0x386   :  { %7512 = vmatmul.mubr.f32.gmra.mrb[68].mxu0 %v10734_v9  ;;  %8021 = vmatmul.mubr.f32.gmra.mrb[2].mxu1 %v10744_v23  ;;  %v4750_v9 = vld [vmem:[#allocation8 + $0x3c0] sm:$0xff]  ;;  %v4751_v23 = vld [vmem:[#allocation8 + $0x3c8] sm:$0xff] }
 0x387   :  { %7514 = vmatprep.mubr.f32.mxu0 %v10740_v15  ;;  %8023 = vmatprep.mubr.f32.mxu1 %v10748_v42  ;;  %v8513_v15 = vpack.c.bf16 %v2630_v34, %v2629_v30  ;;  %v8641_v42 = vpack.c.bf16 %v4751_v23, %v4750_v9  ;;  %v12707_v30 = vld [vmem:[#allocation45_spill] sm:$0xff]  ;;  %v12708_v34 = vld [vmem:[#allocation48_spill] sm:$0xff]  ;;  %v12709_v9 = vld [vmem:[#allocation47_spill] sm:$0xff] }
 0x388   :  { %8632 = vmatpush3.bf16.msra.mxu1 %v8629_v25  ;;  %8506 = vmatprep.subr.bf16.mxu0 %v8505_v43  ;;  %v2632_v25 = vld [vmem:[#allocation8 + $0x1d8] sm:$0xff]  ;;  %v12710_v23 = vld [vmem:[#allocation50_spill] sm:$0xff] }
 0x389   :  { %8634 = vmatprep.subr.bf16.mxu1 %v8633_v61  ;;  %8508 = vmatpush3.bf16.msra.mxu0 %v8505_v43  ;;  %v12699_v43 = vld [vmem:[#allocation37_spill] sm:$0xff] }
 0x38a   :  { %7515 = vmatmul.mubr.f32.gmra.mrb[70].mxu0 %v10746_v31  ;;  %8024 = vmatmul.mubr.f32.gmra.mrb[4].mxu1 %v10756_v0  ;;  %v4752_v31 = vld [vmem:[#allocation8 + $0x3d0] sm:$0xff]  ;;  %v4753_v0 = vld [vmem:[#allocation8 + $0x3d8] sm:$0xff] }
 0x38b   :  { %7517 = vmatprep.mubr.f32.mxu0 %v10752_v36  ;;  %8026 = vmatprep.mubr.f32.mxu1 %v10760_v45  ;;  %v8517_v36 = vpack.c.bf16 %v2632_v25, %v2631_v50  ;;  %v8645_v45 = vpack.c.bf16 %v4753_v0, %v4752_v31  ;;  %v12713_v50 = vld [vmem:[#allocation51_spill] sm:$0xff]  ;;  %v12714_v25 = vld [vmem:[#allocation54_spill] sm:$0xff]  ;;  %v12715_v31 = vld [vmem:[#allocation53_spill] sm:$0xff] }
 0x38c   :  { %8636 = vmatpush3.bf16.msra.mxu1 %v8633_v61  ;;  %8510 = vmatprep.subr.bf16.mxu0 %v8509_v5  ;;  %v12700_v61 = vld [vmem:[#allocation40_spill] sm:$0xff] }
 0x38d   :  { %8638 = vmatprep.subr.bf16.mxu1 %v8637_v13  ;;  %8512 = vmatpush3.bf16.msra.mxu0 %v8509_v5  ;;  %v12705_v5 = vld [vmem:[#allocation43_spill] sm:$0xff]  ;;  %v12716_v0 = vld [vmem:[#allocation56_spill] sm:$0xff] }
 0x38e   :  { %7518 = vmatmul.mubr.f32.gmra.mrb[72].mxu0 %v10758_v38  ;;  %8027 = vmatmul.mubr.f32.gmra.mrb[6].mxu1 %v10768_v46  ;;  %v4754_v38 = vld [vmem:[#allocation8 + $0x3e0] sm:$0xff]  ;;  %v4755_v46 = vld [vmem:[#allocation8 + $0x3e8] sm:$0xff] }
 0x38f   :  { %7520 = vmatprep.mubr.f32.mxu0 %v10764_v6  ;;  %8029 = vmatprep.mubr.f32.mxu1 %v10772_v16  ;;  %v8521_v6 = vpack.c.bf16 %v2634_v32, %v2633_v62  ;;  %v8649_v16 = vpack.c.bf16 %v4755_v46, %v4754_v38  ;;  %v12719_v62 = vld [vmem:[#allocation57_spill] sm:$0xff]  ;;  %v12720_v32 = vld [vmem:[#allocation60_spill] sm:$0xff]  ;;  %v12721_v38 = vld [vmem:[#allocation59_spill] sm:$0xff] }
 0x390   :  { %8640 = vmatpush3.bf16.msra.mxu1 %v8637_v13  ;;  %8514 = vmatprep.subr.bf16.mxu0 %v8513_v15  ;;  %v12706_v13 = vld [vmem:[#allocation46_spill] sm:$0xff] }
 0x391   :  { %8642 = vmatprep.subr.bf16.mxu1 %v8641_v42  ;;  %8516 = vmatpush3.bf16.msra.mxu0 %v8513_v15  ;;  %v12711_v15 = vld [vmem:[#allocation49_spill] sm:$0xff]  ;;  %v12722_v46 = vld [vmem:[#allocation62_spill] sm:$0xff] }
 0x392   :  { %7521 = vmatmul.mubr.f32.gmra.mrb[74].mxu0 %v10770_v4  ;;  %8030 = vmatmul.mubr.f32.gmra.mrb[8].mxu1 %v10780_v63  ;;  %v4756_v4 = vld [vmem:[#allocation8 + $0x3f0] sm:$0xff]  ;;  %v4757_v63 = vld [vmem:[#allocation8 + $0x3f8] sm:$0xff] }
 0x393   :  { %7523 = vmatprep.mubr.f32.mxu0 %v10776_v39  ;;  %8032 = vmatprep.mubr.f32.mxu1 %v10784_v24  ;;  %v8525_v39 = vpack.c.bf16 %v2636_v55, %v2635_v35  ;;  %v8653_v24 = vpack.c.bf16 %v4757_v63, %v4756_v4  ;;  %v12725_v35 = vld [vmem:[#allocation63_spill] sm:$0xff]  ;;  %v12726_v55 = vld [vmem:[#allocation66_spill] sm:$0xff]  ;;  %v12727_v4 = vld [vmem:[#allocation65_spill] sm:$0xff] }
 0x394   :  { %8644 = vmatpush3.bf16.msra.mxu1 %v8641_v42  ;;  %8518 = vmatprep.subr.bf16.mxu0 %v8517_v36  ;;  %v12712_v42 = vld [vmem:[#allocation52_spill] sm:$0xff] }
 0x395   :  { %8646 = vmatprep.subr.bf16.mxu1 %v8645_v45  ;;  %8520 = vmatpush3.bf16.msra.mxu0 %v8517_v36  ;;  %v12717_v36 = vld [vmem:[#allocation55_spill] sm:$0xff]  ;;  %v12728_v63 = vld [vmem:[#allocation68_spill] sm:$0xff] }
 0x396   :  { %7524 = vmatmul.mubr.f32.gmra.mrb[76].mxu0 %v10782_v28  ;;  %8033 = vmatmul.mubr.f32.gmra.mrb[10].mxu1 %v10792_v14  ;;  %v5273_v28 = vld [vmem:[#allocation8 + $0x408] sm:$0xff] }
 0x397   :  { %7526 = vmatprep.mubr.f32.mxu0 %v10788_v33  ;;  %8035 = vmatprep.mubr.f32.mxu1 %v10796_v49  ;;  %v11108_v33 = vpack.c.bf16 %v5273_v28, %v5272_v56  ;;  %v12674_v14 = vld [vmem:[#allocation22_spill] sm:$0xff]  ;;  %v12676_v49 = vld [vmem:[#allocation21_spill] sm:$0xff]  ;;  %v12732_v28 = vld [vmem:[#allocation72_spill] sm:$0xff] }
 0x398   :  { %8648 = vmatpush3.bf16.msra.mxu1 %v8645_v45  ;;  %8522 = vmatprep.subr.bf16.mxu0 %v8521_v6  ;;  %v12718_v45 = vld [vmem:[#allocation58_spill] sm:$0xff]  ;;  %v12731_v56 = vld [vmem:[#allocation69_spill] sm:$0xff] }
 0x399   :  { %8650 = vmatprep.subr.bf16.mxu1 %v8649_v16  ;;  %8524 = vmatpush3.bf16.msra.mxu0 %v8521_v6  ;;  %v12723_v6 = vld [vmem:[#allocation61_spill] sm:$0xff] }
 0x39a   :  { %7527 = vmatmul.mubr.f32.gmra.mrb[78].mxu0 %v10794_v10  ;;  %8036 = vmatmul.mubr.f32.gmra.mrb[12].mxu1 %v10804_v59  ;;  %v12675_v10 = vld [vmem:[#allocation24_spill] sm:$0xff]  ;;  %v12678_v59 = vld [vmem:[#allocation23_spill] sm:$0xff] }
 0x39b   :  { %7529 = vmatprep.mubr.f32.mxu0 %v10800_v57  ;;  %8038 = vmatprep.mubr.f32.mxu1 %v10812_v11  ;;  %v12677_v57 = vld [vmem:[#allocation33_spill] sm:$0xff] }
 0x39c   :  { %8652 = vmatpush3.bf16.msra.mxu1 %v8649_v16  ;;  %8526 = vmatprep.subr.bf16.mxu0 %v8525_v39  ;;  %v11137_v11 = vld [vmem:[#allocation2 + $0x180] sm:$0xff]  ;;  %v12724_v16 = vld [vmem:[#allocation64_spill] sm:$0xff] }
 0x39d   :  { %8654 = vmatprep.subr.bf16.mxu1 %v8653_v24  ;;  %8528 = vmatpush3.bf16.msra.mxu0 %v8525_v39  ;;  %v12729_v39 = vld [vmem:[#allocation67_spill] sm:$0xff] }
 0x39e   :  { %7530 = vmatmul.mubr.f32.gmra.mrb[80].mxu0 %v10806_v7  ;;  %8039 = vmatmul.mubr.f32.gmra.mrb[14].mxu1 %v10818_v21  ;;  %v12679_v7 = vld [vmem:[#allocation36_spill] sm:$0xff] }
 0x39f   :  { %7532 = vmatprep.mubr.f32.mxu0 %v10814_v17  ;;  %8041 = vmatprep.mubr.f32.mxu1 %v10825_v40  ;;  %v12680_v17 = vld [vmem:[#allocation34_spill] sm:$0xff]  ;;  %v2058_v21 = vld [vmem:[#allocation2 + $0x1b2] sm:$0xff] }
 0x3a0   :  { %8656 = vmatpush3.bf16.msra.mxu1 %v8653_v24  ;;  %v12681_v40 = vld [vmem:[#allocation15_spill] sm:$0xff]  ;;  %v12730_v24 = vld [vmem:[#allocation70_spill] sm:$0xff] }
 0x3a1   :  { %8658 = vmatprep.subr.bf16.mxu1 %v11108_v33 }
 0x3a2   :  { %7533 = vmatmul.mubr.f32.gmra.mrb[82].mxu0 %v10820_v19  ;;  %8042 = vmatmul.mubr.f32.gmra.mrb[16].mxu1 %v10831_v8  ;;  %v11141_v19 = vld [vmem:[#allocation2 + $0x188] sm:$0xff]  ;;  %v2059_v8 = vld [vmem:[#allocation2 + $0x1ba] sm:$0xff] }
 0x3a3   :  { %7535 = vmatprep.mubr.f32.mxu0 %v10827_v54  ;;  %8044 = vmatprep.mubr.f32.mxu1 %v10837_v52  ;;  %v12682_v54 = vld [vmem:[#allocation19_spill] sm:$0xff]  ;;  %v12684_v52 = vld [vmem:[#allocation26_spill] sm:$0xff] }
 0x3a6   :  { %7536 = vmatmul.mubr.f32.gmra.mrb[84].mxu0 %v10833_v27  ;;  %8045 = vmatmul.mubr.f32.gmra.mrb[18].mxu1 %v10843_v18  ;;  %v12683_v27 = vld [vmem:[#allocation35_spill] sm:$0xff]  ;;  %v12686_v18 = vld [vmem:[#allocation28_spill] sm:$0xff] }
 0x3a7   :  { %7538 = vmatprep.mubr.f32.mxu0 %v10839_v44  ;;  %8047 = vmatprep.mubr.f32.mxu1 %v10849_v47  ;;  %v12685_v44 = vld [vmem:[#allocation25_spill] sm:$0xff]  ;;  %v12688_v47 = vld [vmem:[#allocation30_spill] sm:$0xff] }
 0x3aa   :  { %7539 = vmatmul.mubr.f32.gmra.mrb[86].mxu0 %v10845_v22  ;;  %8048 = vmatmul.mubr.f32.gmra.mrb[20].mxu1 %v10855_v58  ;;  %v12687_v22 = vld [vmem:[#allocation27_spill] sm:$0xff]  ;;  %v12690_v58 = vld [vmem:[#allocation13_spill] sm:$0xff] }
 0x3ab   :  { %7541 = vmatprep.mubr.f32.mxu0 %v10851_v26  ;;  %8050 = vmatprep.mubr.f32.mxu1 %v10861_v60  ;;  %v12689_v26 = vld [vmem:[#allocation29_spill] sm:$0xff]  ;;  %v12692_v60 = vld [vmem:[#allocation16_spill] sm:$0xff] }
 0x3ae   :  { %7542 = vmatmul.mubr.f32.gmra.mrb[88].mxu0 %v10857_v48  ;;  %8051 = vmatmul.mubr.f32.gmra.mrb[22].mxu1 %v10867_v12  ;;  %v12691_v48 = vld [vmem:[#allocation31_spill] sm:$0xff]  ;;  %v12694_v12 = vld [vmem:[#allocation18_spill] sm:$0xff] }
 0x3af   :  { %7544 = vmatprep.mubr.f32.mxu0 %v10863_v37  ;;  %8053 = vmatprep.mubr.f32.mxu1 %v10873_v20  ;;  %v12693_v37 = vld [vmem:[#allocation32_spill] sm:$0xff]  ;;  %v12695_v20 = vld [vmem:[#allocation14_spill] sm:$0xff] }
 0x3b2   :  { %7545 = vmatmul.mubr.f32.gmra.mrb[90].mxu0 %v12674_v14  ;;  %8054 = vmatmul.mubr.f32.gmra.mrb[24].mxu1 %v12675_v10  ;;  %v12733_v14 = vld [vmem:[#allocation71_spill] sm:$0xff]  ;;  %v12734_v10 = vld [vmem:[#allocation74_spill] sm:$0xff] }
 0x3b3   :  { %7547 = vmatprep.mubr.f32.mxu0 %v12676_v49  ;;  %8056 = vmatprep.mubr.f32.mxu1 %v12677_v57  ;;  %v12735_v49 = vld [vmem:[#allocation73_spill] sm:$0xff]  ;;  %v12736_v57 = vld [vmem:[#allocation76_spill] sm:$0xff] }
 0x3b6   :  { %7548 = vmatmul.mubr.f32.gmra.mrb[92].mxu0 %v12678_v59  ;;  %8057 = vmatmul.mubr.f32.gmra.mrb[26].mxu1 %v12679_v7  ;;  %v12737_v59 = vld [vmem:[#allocation75_spill] sm:$0xff]  ;;  %v12738_v7 = vld [vmem:[#allocation78_spill] sm:$0xff] }
 0x3b7   :  { %7550 = vmatprep.mubr.f32.mxu0 %v12680_v17  ;;  %8059 = vmatprep.mubr.f32.mxu1 %v11137_v11  ;;  %v11203_v17 = vld [vmem:[#allocation2 + $0x330] sm:$0xff] }
 0x3ba   :  { %7551 = vmatmul.mubr.f32.gmra.mrb[94].mxu0 %v12681_v40  ;;  %8060 = vmatmul.mubr.f32.gmra.mrb[28].mxu1 %v11141_v19  ;;  %v11207_v40 = vld [vmem:[#allocation2 + $0x338] sm:$0xff] }
 0x3bb   :  { %7553 = vmatprep.mubr.f32.mxu0 %v2058_v21  ;;  %8062 = vmatprep.mubr.f32.mxu1 %v12682_v54  ;;  %v12739_v21 = vld [vmem:[#allocation77_spill] sm:$0xff] }
 0x3be   :  { %7554 = vmatmul.mubr.f32.gmra.mrb[96].mxu0 %v2059_v8  ;;  %8063 = vmatmul.mubr.f32.gmra.mrb[30].mxu1 %v12682_v54  ;;  %v12740_v54 = vld [vmem:[#allocation79_spill] sm:$0xff]  ;;  %v2556_v8 = vld [vmem:[#allocation2 + $0x18] sm:$0xff] }
 0x3bf   :  { %7556 = vmatprep.mubr.f32.mxu0 %v12683_v27  ;;  %8065 = vmatprep.mubr.f32.mxu1 %v12684_v52  ;;  %v9213_v27 = vld [vmem:[#allocation2] sm:$0xff] }
 0x3c0   :  { %v2557_v52 = vld [vmem:[#allocation2 + $0x20] sm:$0xff] }
 0x3c2   :  { %7557 = vmatmul.mubr.f32.gmra.mrb[98].mxu0 %v12685_v44  ;;  %8066 = vmatmul.mubr.f32.gmra.mrb[32].mxu1 %v12686_v18  ;;  %v5274_v44 = vld [vmem:[#allocation8 + $0x410] sm:$0xff]  ;;  %v5275_v18 = vld [vmem:[#allocation8 + $0x418] sm:$0xff] }
 0x3c3   :  { %7559 = vmatprep.mubr.f32.mxu0 %v12687_v22  ;;  %8068 = vmatprep.mubr.f32.mxu1 %v12688_v47  ;;  %v2558_v22 = vld [vmem:[#allocation2 + $0x30] sm:$0xff] }
 0x3c4   :  { %v4677_v47 = vld [vmem:[#allocation2 + $0x31] sm:$0xff] }
 0x3c6   :  { %7560 = vmatmul.mubr.f32.gmra.mrb[100].mxu0 %v12689_v26  ;;  %8069 = vmatmul.mubr.f32.gmra.mrb[34].mxu1 %v12690_v58  ;;  %v8661_v26 = vpack.c.bf16 %v5275_v18, %v5274_v44  ;;  %v2559_v58 = vld [vmem:[#allocation2 + $0x38] sm:$0xff]  ;;  %v2578_v18 = vld [vmem:[#allocation2 + $0x120] sm:$0xff] }
 0x3c7   :  { %7562 = vmatprep.mubr.f32.mxu0 %v12691_v48  ;;  %8071 = vmatprep.mubr.f32.mxu1 %v12692_v60  ;;  %v4678_v48 = vld [vmem:[#allocation2 + $0x39] sm:$0xff]  ;;  %v2560_v60 = vld [vmem:[#allocation2 + $0x48] sm:$0xff]  ;;  %v4696_v44 = vld [vmem:[#allocation2 + $0x111] sm:$0xff] }
 0x3ca   :  { %7563 = vmatmul.mubr.f32.gmra.mrb[102].mxu0 %v12693_v37  ;;  %8072 = vmatmul.mubr.f32.gmra.mrb[36].mxu1 %v12694_v12  ;;  %v5276_v37 = vld [vmem:[#allocation8 + $0x420] sm:$0xff]  ;;  %v5277_v12 = vld [vmem:[#allocation8 + $0x428] sm:$0xff] }
 0x3cb   :  { %7565 = vmatprep.mubr.f32.mxu0 %v12695_v20  ;;  %8074 = vmatprep.mubr.f32.mxu1 %v12696_v53  ;;  %v4679_v20 = vld [vmem:[#allocation2 + $0x49] sm:$0xff] }
 0x3cc   :  { %v2561_v53 = vld [vmem:[#allocation2 + $0x50] sm:$0xff] }
 0x3ce   :  { %7566 = vmatmul.mubr.f32.gmra.mrb[104].mxu0 %v12697_v41  ;;  %8075 = vmatmul.mubr.f32.gmra.mrb[38].mxu1 %v12698_v29  ;;  %v4680_v41 = vld [vmem:[#allocation2 + $0x51] sm:$0xff]  ;;  %v2562_v29 = vld [vmem:[#allocation2 + $0x60] sm:$0xff] }
 0x3cf   :  { %7568 = vmatprep.mubr.f32.mxu0 %v12699_v43  ;;  %8077 = vmatprep.mubr.f32.mxu1 %v12700_v61  ;;  %v8665_v43 = vpack.c.bf16 %v5277_v12, %v5276_v37  ;;  %v4681_v61 = vld [vmem:[#allocation2 + $0x61] sm:$0xff]  ;;  %v2582_v12 = vld [vmem:[#allocation2 + $0x150] sm:$0xff] }
 0x3d0   :  { %v4700_v37 = vld [vmem:[#allocation2 + $0x141] sm:$0xff] }
 0x3d2   :  { %7569 = vmatmul.mubr.f32.gmra.mrb[106].mxu0 %v12701_v2  ;;  %8078 = vmatmul.mubr.f32.gmra.mrb[40].mxu1 %v12702_v1  ;;  %v5278_v2 = vld [vmem:[#allocation8 + $0x430] sm:$0xff]  ;;  %v5279_v1 = vld [vmem:[#allocation8 + $0x438] sm:$0xff] }
 0x3d3   :  { %7571 = vmatprep.mubr.f32.mxu0 %v12703_v51  ;;  %8080 = vmatprep.mubr.f32.mxu1 %v12704_v3  ;;  %v2563_v51 = vld [vmem:[#allocation2 + $0x68] sm:$0xff] }
 0x3d4   :  { %v4682_v3 = vld [vmem:[#allocation2 + $0x69] sm:$0xff] }
 0x3d6   :  { %7572 = vmatmul.mubr.f32.gmra.mrb[108].mxu0 %v12705_v5  ;;  %8081 = vmatmul.mubr.f32.gmra.mrb[42].mxu1 %v12706_v13  ;;  %v2564_v5 = vld [vmem:[#allocation2 + $0x78] sm:$0xff] }
 0x3d7   :  { %7574 = vmatprep.mubr.f32.mxu0 %v12707_v30  ;;  %8083 = vmatprep.mubr.f32.mxu1 %v12708_v34  ;;  %v4683_v13 = vld [vmem:[#allocation2 + $0x79] sm:$0xff]  ;;  %v5281_v34 = vld [vmem:[#allocation8 + $0x448] sm:$0xff] }
 0x3d8   :  { %v5280_v30 = vld [vmem:[#allocation8 + $0x440] sm:$0xff] }
 0x3da   :  { %7575 = vmatmul.mubr.f32.gmra.mrb[110].mxu0 %v12709_v9  ;;  %8084 = vmatmul.mubr.f32.gmra.mrb[44].mxu1 %v12710_v23  ;;  %v2565_v9 = vld [vmem:[#allocation2 + $0x80] sm:$0xff] }
 0x3db   :  { %7577 = vmatprep.mubr.f32.mxu0 %v12711_v15  ;;  %8086 = vmatprep.mubr.f32.mxu1 %v12712_v42  ;;  %v4684_v23 = vld [vmem:[#allocation2 + $0x81] sm:$0xff]  ;;  %v2566_v15 = vld [vmem:[#allocation2 + $0x90] sm:$0xff]  ;;  %v8673_v42 = vpack.c.bf16 %v5281_v34, %v5280_v30 }
 0x3dc   :  { %v2590_v30 = vld [vmem:[#allocation2 + $0x1e0] sm:$0xff] }
 0x3dd   :  { %v4709_v34 = vld [vmem:[#allocation2 + $0x1e1] sm:$0xff] }
 0x3de   :  { %7578 = vmatmul.mubr.f32.gmra.mrb[112].mxu0 %v12713_v50  ;;  %8087 = vmatmul.mubr.f32.gmra.mrb[46].mxu1 %v12714_v25  ;;  %v4685_v50 = vld [vmem:[#allocation2 + $0x91] sm:$0xff] }
 0x3df   :  { %7580 = vmatprep.mubr.f32.mxu0 %v12715_v31  ;;  %8089 = vmatprep.mubr.f32.mxu1 %v12716_v0  ;;  %v5282_v25 = vld [vmem:[#allocation8 + $0x450] sm:$0xff]  ;;  %v5283_v31 = vld [vmem:[#allocation8 + $0x458] sm:$0xff] }
 0x3e0   :  { %v2567_v0 = vld [vmem:[#allocation2 + $0x98] sm:$0xff] }
 0x3e2   :  { %7581 = vmatmul.mubr.f32.gmra.mrb[114].mxu0 %v12717_v36  ;;  %8090 = vmatmul.mubr.f32.gmra.mrb[48].mxu1 %v12718_v45  ;;  %v4686_v36 = vld [vmem:[#allocation2 + $0x99] sm:$0xff]  ;;  %v2568_v45 = vld [vmem:[#allocation2 + $0xa8] sm:$0xff] }
 0x3e3   :  { %7583 = vmatprep.mubr.f32.mxu0 %v12719_v62  ;;  %8092 = vmatprep.mubr.f32.mxu1 %v12720_v32  ;;  %v8677_v62 = vpack.c.bf16 %v5283_v31, %v5282_v25  ;;  %v4687_v32 = vld [vmem:[#allocation2 + $0xa9] sm:$0xff]  ;;  %v4713_v25 = vld [vmem:[#allocation2 + $0x211] sm:$0xff] }
 0x3e4   :  { %v2595_v31 = vld [vmem:[#allocation2 + $0x218] sm:$0xff] }
 0x3e6   :  { %7584 = vmatmul.mubr.f32.gmra.mrb[116].mxu0 %v12721_v38  ;;  %8093 = vmatmul.mubr.f32.gmra.mrb[50].mxu1 %v12722_v46  ;;  %v5284_v38 = vld [vmem:[#allocation8 + $0x460] sm:$0xff]  ;;  %v5285_v46 = vld [vmem:[#allocation8 + $0x468] sm:$0xff] }
 0x3e7   :  { %7586 = vmatprep.mubr.f32.mxu0 %v12723_v6  ;;  %8095 = vmatprep.mubr.f32.mxu1 %v12724_v16  ;;  %v2569_v6 = vld [vmem:[#allocation2 + $0xb0] sm:$0xff] }
 0x3e8   :  { %v4688_v16 = vld [vmem:[#allocation2 + $0xb1] sm:$0xff] }
 0x3ea   :  { %7587 = vmatmul.mubr.f32.gmra.mrb[118].mxu0 %v12725_v35  ;;  %8096 = vmatmul.mubr.f32.gmra.mrb[52].mxu1 %v12726_v55  ;;  %v2570_v35 = vld [vmem:[#allocation2 + $0xc0] sm:$0xff]  ;;  %v8681_v55 = vpack.c.bf16 %v5285_v46, %v5284_v38 }
 0x3eb   :  { %7589 = vmatprep.mubr.f32.mxu0 %v12727_v4  ;;  %8098 = vmatprep.mubr.f32.mxu1 %v12728_v63  ;;  %v4689_v4 = vld [vmem:[#allocation2 + $0xc1] sm:$0xff]  ;;  %v5286_v63 = vld [vmem:[#allocation8 + $0x470] sm:$0xff] }
 0x3ec   :  { %v2598_v38 = vld [vmem:[#allocation2 + $0x240] sm:$0xff] }
 0x3ed   :  { %v4717_v46 = vld [vmem:[#allocation2 + $0x241] sm:$0xff] }
 0x3ee   :  { %7590 = vmatmul.mubr.f32.gmra.mrb[120].mxu0 %v12729_v39  ;;  %8099 = vmatmul.mubr.f32.gmra.mrb[54].mxu1 %v12730_v24  ;;  %v5287_v39 = vld [vmem:[#allocation8 + $0x478] sm:$0xff]  ;;  %v2571_v24 = vld [vmem:[#allocation2 + $0xc8] sm:$0xff] }
 0x3ef   :  { %7592 = vmatprep.mubr.f32.mxu0 %v12731_v56  ;;  %8101 = vmatprep.mubr.f32.mxu1 %v12732_v28  ;;  %v4690_v56 = vld [vmem:[#allocation2 + $0xc9] sm:$0xff]  ;;  %v8685_v28 = vpack.c.bf16 %v5287_v39, %v5286_v63  ;;  %v4720_v63 = vld [vmem:[#allocation2 + $0x261] sm:$0xff] }
 0x3f0   :  { %v2602_v39 = vld [vmem:[#allocation2 + $0x270] sm:$0xff] }
 0x3f2   :  { %7593 = vmatmul.mubr.f32.gmra.mrb[122].mxu0 %v12733_v14  ;;  %8102 = vmatmul.mubr.f32.gmra.mrb[56].mxu1 %v12734_v10  ;;  %v2572_v14 = vld [vmem:[#allocation2 + $0xd8] sm:$0xff] }
 0x3f3   :  { %7595 = vmatprep.mubr.f32.mxu0 %v12735_v49  ;;  %8104 = vmatprep.mubr.f32.mxu1 %v12736_v57  ;;  %v4691_v10 = vld [vmem:[#allocation2 + $0xd9] sm:$0xff]  ;;  %v4692_v57 = vld [vmem:[#allocation2 + $0xe1] sm:$0xff] }
 0x3f4   :  { %v2573_v49 = vld [vmem:[#allocation2 + $0xe0] sm:$0xff] }
 0x3f6   :  { %7596 = vmatmul.mubr.f32.gmra.mrb[124].mxu0 %v12737_v59  ;;  %8105 = vmatmul.mubr.f32.gmra.mrb[58].mxu1 %v12738_v7  ;;  %v2574_v59 = vld [vmem:[#allocation2 + $0xf0] sm:$0xff] }
 0x3f7   :  { %7598 = vmatprep.mubr.f32.mxu0 %v12739_v21  ;;  %8107 = vmatprep.mubr.f32.mxu1 %v11203_v17  ;;  %v4693_v7 = vld [vmem:[#allocation2 + $0xf1] sm:$0xff] }
 0x3f8   :  { %v2575_v21 = vld [vmem:[#allocation2 + $0xf8] sm:$0xff] }
 0x3fa   :  { %7599 = vmatmul.mubr.f32.gmra.mrb[126].mxu0 %v12740_v54  ;;  %8108 = vmatmul.mubr.f32.gmra.mrb[60].mxu1 %v11207_v40  ;;  %v4694_v54 = vld [vmem:[#allocation2 + $0xf9] sm:$0xff] }
 0x3fb   :  { %7633 = vmatprep.mubr.f32.mxu0 %v2556_v8  ;;  %8110 = vmatprep.mubr.f32.mxu1 %v9213_v27  ;;  %v2576_v8 = vld [vmem:[#allocation2 + $0x108] sm:$0xff] }
 0x3fe   :  { %7634 = vmatmul.mubr.f32.vlgmr.msra.gmra.mrb[64].mxu0 %v2557_v52  ;;  %8111 = vmatmul.mubr.f32.gmra.mrb[62].mxu1 %v9213_v27  ;;  %v4695_v27 = vld [vmem:[#allocation2 + $0x109] sm:$0xff] }
 0x3ff   :  { %7636 = vmatprep.mubr.f32.mxu0 %v2558_v22  ;;  %8145 = vmatprep.mubr.f32.mxu1 %v4677_v47  ;;  %v2577_v52 = vld [vmem:[#allocation2 + $0x110] sm:$0xff]  ;;  %v4697_v22 = vld [vmem:[#allocation2 + $0x121] sm:$0xff] }
 0x400   :  { %v2579_v47 = vld [vmem:[#allocation2 + $0x128] sm:$0xff] }
 0x402   :  { %7637 = vmatmul.mubr.f32.gmra.mrb[66].mxu0 %v2559_v58  ;;  %8146 = vmatmul.mubr.f32.vlgmr.msra.gmra.mrb[0].mxu1 %v4678_v48  ;;  %v2580_v58 = vld [vmem:[#allocation2 + $0x138] sm:$0xff] }
 0x403   :  { %8660 = vmatpush3.bf16.msra.mxu1 %v11108_v33  ;;  %7639 = vmatprep.mubr.f32.mxu0 %v2560_v60  ;;  %v8669_v33 = vpack.c.bf16 %v5279_v1, %v5278_v2  ;;  %v4699_v48 = vld [vmem:[#allocation2 + $0x139] sm:$0xff]  ;;  %v4704_v2 = vld [vmem:[#allocation2 + $0x171] sm:$0xff]  ;;  %v4705_v1 = vld [vmem:[#allocation2 + $0x181] sm:$0xff] }
 0x404   :  { %8148 = vmatprep.mubr.f32.mxu1 %v4679_v20  ;;  %8662 = vmatprep.subr.bf16.mxu1 %v8661_v26  ;;  %v2581_v60 = vld [vmem:[#allocation2 + $0x140] sm:$0xff]  ;;  %v4701_v20 = vld [vmem:[#allocation2 + $0x151] sm:$0xff] }
 0x406   :  { %7640 = vmatmul.mubr.f32.gmra.mrb[68].mxu0 %v2561_v53  ;;  %8149 = vmatmul.mubr.f32.gmra.mrb[2].mxu1 %v4680_v41  ;;  %v2583_v53 = vld [vmem:[#allocation2 + $0x158] sm:$0xff] }
 0x407   :  { %7642 = vmatprep.mubr.f32.mxu0 %v2562_v29  ;;  %8151 = vmatprep.mubr.f32.mxu1 %v4681_v61  ;;  %v4702_v41 = vld [vmem:[#allocation2 + $0x159] sm:$0xff]  ;;  %v2584_v29 = vld [vmem:[#allocation2 + $0x168] sm:$0xff]  ;;  %v2585_v61 = vld [vmem:[#allocation2 + $0x170] sm:$0xff] }
 0x408   :  { %8664 = vmatpush3.bf16.msra.mxu1 %v8661_v26  ;;  %v4698_v26 = vld [vmem:[#allocation2 + $0x129] sm:$0xff] }
 0x409   :  { %8666 = vmatprep.subr.bf16.mxu1 %v8665_v43 }
 0x40a   :  { %7643 = vmatmul.mubr.f32.gmra.mrb[70].mxu0 %v2563_v51  ;;  %8152 = vmatmul.mubr.f32.gmra.mrb[4].mxu1 %v4682_v3  ;;  %v4707_v51 = vld [vmem:[#allocation2 + $0x199] sm:$0xff]  ;;  %v4706_v3 = vld [vmem:[#allocation2 + $0x189] sm:$0xff] }
 0x40b   :  { %7645 = vmatprep.mubr.f32.mxu0 %v2564_v5  ;;  %8154 = vmatprep.mubr.f32.mxu1 %v4683_v13  ;;  %v2588_v5 = vld [vmem:[#allocation2 + $0x1c8] sm:$0xff]  ;;  %v2589_v13 = vld [vmem:[#allocation2 + $0x1d0] sm:$0xff] }
 0x40c   :  { %8668 = vmatpush3.bf16.msra.mxu1 %v8665_v43  ;;  %v4703_v43 = vld [vmem:[#allocation2 + $0x169] sm:$0xff] }
 0x40d   :  { %8670 = vmatprep.subr.bf16.mxu1 %v8669_v33 }
 0x40e   :  { %7646 = vmatmul.mubr.f32.gmra.mrb[72].mxu0 %v2565_v9  ;;  %8155 = vmatmul.mubr.f32.gmra.mrb[6].mxu1 %v4684_v23  ;;  %v2591_v9 = vld [vmem:[#allocation2 + $0x1e8] sm:$0xff] }
 0x40f   :  { %7648 = vmatprep.mubr.f32.mxu0 %v2566_v15  ;;  %8157 = vmatprep.mubr.f32.mxu1 %v4685_v50  ;;  %v4710_v23 = vld [vmem:[#allocation2 + $0x1e9] sm:$0xff]  ;;  %v4711_v15 = vld [vmem:[#allocation2 + $0x1f9] sm:$0xff] }
 0x410   :  { %8672 = vmatpush3.bf16.msra.mxu1 %v8669_v33  ;;  %v4708_v33 = vld [vmem:[#allocation2 + $0x1a1] sm:$0xff]  ;;  %v2594_v50 = vld [vmem:[#allocation2 + $0x210] sm:$0xff] }
 0x411   :  { %8674 = vmatprep.subr.bf16.mxu1 %v8673_v42 }
 0x412   :  { %7649 = vmatmul.mubr.f32.gmra.mrb[74].mxu0 %v2567_v0  ;;  %8158 = vmatmul.mubr.f32.gmra.mrb[8].mxu1 %v4686_v36  ;;  %v4714_v0 = vld [vmem:[#allocation2 + $0x219] sm:$0xff]  ;;  %v2596_v36 = vld [vmem:[#allocation2 + $0x228] sm:$0xff] }
 0x413   :  { %7651 = vmatprep.mubr.f32.mxu0 %v2568_v45  ;;  %8160 = vmatprep.mubr.f32.mxu1 %v4687_v32  ;;  %v4715_v45 = vld [vmem:[#allocation2 + $0x229] sm:$0xff]  ;;  %v4716_v32 = vld [vmem:[#allocation2 + $0x231] sm:$0xff] }
 0x414   :  { %8676 = vmatpush3.bf16.msra.mxu1 %v8673_v42  ;;  %v4712_v42 = vld [vmem:[#allocation2 + $0x201] sm:$0xff] }
 0x415   :  { %8678 = vmatprep.subr.bf16.mxu1 %v8677_v62 }
 0x416   :  { %7652 = vmatmul.mubr.f32.gmra.mrb[76].mxu0 %v2569_v6  ;;  %8161 = vmatmul.mubr.f32.gmra.mrb[10].mxu1 %v4688_v16  ;;  %v2599_v6 = vld [vmem:[#allocation2 + $0x248] sm:$0xff] }
 0x417   :  { %7654 = vmatprep.mubr.f32.mxu0 %v2570_v35  ;;  %8163 = vmatprep.mubr.f32.mxu1 %v4689_v4  ;;  %v4718_v16 = vld [vmem:[#allocation2 + $0x249] sm:$0xff]  ;;  %v2600_v35 = vld [vmem:[#allocation2 + $0x258] sm:$0xff]  ;;  %v2601_v4 = vld [vmem:[#allocation2 + $0x260] sm:$0xff] }
 0x418   :  { %8680 = vmatpush3.bf16.msra.mxu1 %v8677_v62  ;;  %v2597_v62 = vld [vmem:[#allocation2 + $0x230] sm:$0xff] }
 0x419   :  { %8682 = vmatprep.subr.bf16.mxu1 %v8681_v55 }
 0x41a   :  { %7655 = vmatmul.mubr.f32.gmra.mrb[78].mxu0 %v2571_v24  ;;  %8164 = vmatmul.mubr.f32.gmra.mrb[12].mxu1 %v4690_v56  ;;  %v4721_v24 = vld [vmem:[#allocation2 + $0x271] sm:$0xff] }
 0x41b   :  { %7657 = vmatprep.mubr.f32.mxu0 %v2572_v14  ;;  %8166 = vmatprep.mubr.f32.mxu1 %v4691_v10  ;;  %v2603_v56 = vld [vmem:[#allocation2 + $0x278] sm:$0xff]  ;;  %v2604_v14 = vld [vmem:[#allocation2 + $0x288] sm:$0xff] }
 0x41c   :  { %8684 = vmatpush3.bf16.msra.mxu1 %v8681_v55  ;;  %v4719_v55 = vld [vmem:[#allocation2 + $0x259] sm:$0xff]  ;;  %v4723_v10 = vld [vmem:[#allocation2 + $0x289] sm:$0xff] }
 0x41d   :  { %8686 = vmatprep.subr.bf16.mxu1 %v8685_v28 }
 0x41e   :  { %7658 = vmatmul.mubr.f32.gmra.mrb[80].mxu0 %v2573_v49  ;;  %8167 = vmatmul.mubr.f32.gmra.mrb[14].mxu1 %v4692_v57  ;;  %v2605_v49 = vld [vmem:[#allocation2 + $0x290] sm:$0xff] }
 0x41f   :  { %7660 = vmatprep.mubr.f32.mxu0 %v2574_v59  ;;  %8169 = vmatprep.mubr.f32.mxu1 %v4693_v7  ;;  %v4724_v57 = vld [vmem:[#allocation2 + $0x291] sm:$0xff]  ;;  %v2606_v59 = vld [vmem:[#allocation2 + $0x2a0] sm:$0xff] }
 0x420   :  { %8688 = vmatpush3.bf16.msra.mxu1 %v8685_v28  ;;  %v4722_v28 = vld [vmem:[#allocation2 + $0x279] sm:$0xff]  ;;  %v4725_v7 = vld [vmem:[#allocation2 + $0x2a1] sm:$0xff] }
 0x422   :  { %7661 = vmatmul.mubr.f32.gmra.mrb[82].mxu0 %v2575_v21  ;;  %8170 = vmatmul.mubr.f32.gmra.mrb[16].mxu1 %v4694_v54  ;;  %v2607_v21 = vld [vmem:[#allocation2 + $0x2a8] sm:$0xff] }
 0x423   :  { %7663 = vmatprep.mubr.f32.mxu0 %v2576_v8  ;;  %8172 = vmatprep.mubr.f32.mxu1 %v4695_v27  ;;  %v4726_v54 = vld [vmem:[#allocation2 + $0x2a9] sm:$0xff]  ;;  %v2608_v8 = vld [vmem:[#allocation2 + $0x2b8] sm:$0xff] }
 0x424   :  { %v4727_v27 = vld [vmem:[#allocation2 + $0x2b9] sm:$0xff] }
 0x426   :  { %7664 = vmatmul.mubr.f32.gmra.mrb[84].mxu0 %v2577_v52  ;;  %8173 = vmatmul.mubr.f32.gmra.mrb[18].mxu1 %v4696_v44  ;;  %v2609_v52 = vld [vmem:[#allocation2 + $0x2c0] sm:$0xff] }
 0x427   :  { %7666 = vmatprep.mubr.f32.mxu0 %v2578_v18  ;;  %8175 = vmatprep.mubr.f32.mxu1 %v4697_v22  ;;  %v4728_v44 = vld [vmem:[#allocation2 + $0x2c1] sm:$0xff]  ;;  %v2610_v18 = vld [vmem:[#allocation2 + $0x2d0] sm:$0xff] }
 0x428   :  { %v4729_v22 = vld [vmem:[#allocation2 + $0x2d1] sm:$0xff] }
 0x42a   :  { %7667 = vmatmul.mubr.f32.gmra.mrb[86].mxu0 %v2579_v47  ;;  %8176 = vmatmul.mubr.f32.gmra.mrb[20].mxu1 %v4698_v26  ;;  %v2611_v47 = vld [vmem:[#allocation2 + $0x2d8] sm:$0xff] }
 0x42b   :  { %7669 = vmatprep.mubr.f32.mxu0 %v2580_v58  ;;  %8178 = vmatprep.mubr.f32.mxu1 %v4699_v48  ;;  %v4730_v26 = vld [vmem:[#allocation2 + $0x2d9] sm:$0xff]  ;;  %v2612_v58 = vld [vmem:[#allocation2 + $0x2e8] sm:$0xff] }
 0x42c   :  { %v4731_v48 = vld [vmem:[#allocation2 + $0x2e9] sm:$0xff] }
 0x42e   :  { %7670 = vmatmul.mubr.f32.gmra.mrb[88].mxu0 %v2581_v60  ;;  %8179 = vmatmul.mubr.f32.gmra.mrb[22].mxu1 %v4700_v37  ;;  %v2613_v60 = vld [vmem:[#allocation2 + $0x2f0] sm:$0xff] }
 0x42f   :  { %7672 = vmatprep.mubr.f32.mxu0 %v2582_v12  ;;  %8181 = vmatprep.mubr.f32.mxu1 %v4701_v20  ;;  %v4732_v37 = vld [vmem:[#allocation2 + $0x2f1] sm:$0xff]  ;;  %v2614_v12 = vld [vmem:[#allocation2 + $0x300] sm:$0xff] }
 0x430   :  { %v4733_v20 = vld [vmem:[#allocation2 + $0x301] sm:$0xff] }
 0x432   :  { %7673 = vmatmul.mubr.f32.gmra.mrb[90].mxu0 %v2583_v53  ;;  %8182 = vmatmul.mubr.f32.gmra.mrb[24].mxu1 %v4702_v41  ;;  %v2615_v53 = vld [vmem:[#allocation2 + $0x308] sm:$0xff] }
 0x433   :  { %7675 = vmatprep.mubr.f32.mxu0 %v2584_v29  ;;  %8184 = vmatprep.mubr.f32.mxu1 %v4703_v43  ;;  %v4734_v41 = vld [vmem:[#allocation2 + $0x309] sm:$0xff]  ;;  %v2616_v29 = vld [vmem:[#allocation2 + $0x318] sm:$0xff] }
 0x434   :  { %v4735_v43 = vld [vmem:[#allocation2 + $0x319] sm:$0xff] }
 0x436   :  { %7676 = vmatmul.mubr.f32.gmra.mrb[92].mxu0 %v2585_v61  ;;  %8185 = vmatmul.mubr.f32.gmra.mrb[26].mxu1 %v4704_v2  ;;  %v2617_v61 = vld [vmem:[#allocation2 + $0x320] sm:$0xff] }
 0x437   :  { %7678 = vmatprep.mubr.f32.mxu0 %v11137_v11  ;;  %8187 = vmatprep.mubr.f32.mxu1 %v4705_v1  ;;  %v2592_v11 = vld [vmem:[#allocation2 + $0x1f8] sm:$0xff]  ;;  %v4736_v2 = vld [vmem:[#allocation2 + $0x321] sm:$0xff] }
 0x438   :  { %v4737_v1 = vld [vmem:[#allocation2 + $0x331] sm:$0xff] }
 0x43a   :  { %7679 = vmatmul.mubr.f32.gmra.mrb[94].mxu0 %v11141_v19  ;;  %8188 = vmatmul.mubr.f32.gmra.mrb[28].mxu1 %v4706_v3  ;;  %v2593_v19 = vld [vmem:[#allocation2 + $0x200] sm:$0xff] }
 0x43b   :  { %7681 = vmatprep.mubr.f32.mxu0 %v2588_v5  ;;  %8190 = vmatprep.mubr.f32.mxu1 %v4707_v51  ;;  %v4739_v51 = vld [vmem:[#allocation2 + $0x349] sm:$0xff]  ;;  %v4738_v3 = vld [vmem:[#allocation2 + $0x339] sm:$0xff]  ;;  %v4740_v5 = vld [vmem:[#allocation2 + $0x351] sm:$0xff] }
 0x43e   :  { %7682 = vmatmul.mubr.f32.gmra.mrb[96].mxu0 %v2589_v13  ;;  %8191 = vmatmul.mubr.f32.gmra.mrb[30].mxu1 %v4708_v33  ;;  %v5207_v33 = vld [vmem:[#allocation2 + $0x32] sm:$0xff]  ;;  %v5208_v13 = vld [vmem:[#allocation2 + $0x3a] sm:$0xff] }
 0x43f   :  { %7684 = vmatprep.mubr.f32.mxu0 %v2590_v30  ;;  %8193 = vmatprep.mubr.f32.mxu1 %v4709_v34  ;;  %v5209_v30 = vld [vmem:[#allocation2 + $0x4a] sm:$0xff]  ;;  %v5210_v34 = vld [vmem:[#allocation2 + $0x52] sm:$0xff] }
 0x442   :  { %7685 = vmatmul.mubr.f32.gmra.mrb[98].mxu0 %v2591_v9  ;;  %8194 = vmatmul.mubr.f32.gmra.mrb[32].mxu1 %v4710_v23  ;;  %v5211_v9 = vld [vmem:[#allocation2 + $0x62] sm:$0xff]  ;;  %v5213_v23 = vld [vmem:[#allocation2 + $0x7a] sm:$0xff] }
 0x443   :  { %7687 = vmatprep.mubr.f32.mxu0 %v2592_v11  ;;  %8196 = vmatprep.mubr.f32.mxu1 %v4711_v15  ;;  %v5214_v11 = vld [vmem:[#allocation2 + $0x82] sm:$0xff]  ;;  %v5216_v15 = vld [vmem:[#allocation2 + $0x9a] sm:$0xff] }
 0x446   :  { %7688 = vmatmul.mubr.f32.gmra.mrb[100].mxu0 %v2593_v19  ;;  %8197 = vmatmul.mubr.f32.gmra.mrb[34].mxu1 %v4712_v42  ;;  %v5217_v19 = vld [vmem:[#allocation2 + $0xaa] sm:$0xff]  ;;  %v5218_v42 = vld [vmem:[#allocation2 + $0xb2] sm:$0xff] }
 0x447   :  { %7690 = vmatprep.mubr.f32.mxu0 %v2594_v50  ;;  %8199 = vmatprep.mubr.f32.mxu1 %v4713_v25  ;;  %v5219_v50 = vld [vmem:[#allocation2 + $0xc2] sm:$0xff]  ;;  %v5220_v25 = vld [vmem:[#allocation2 + $0xca] sm:$0xff] }
 0x44a   :  { %7691 = vmatmul.mubr.f32.gmra.mrb[102].mxu0 %v2595_v31  ;;  %8200 = vmatmul.mubr.f32.gmra.mrb[36].mxu1 %v4714_v0  ;;  %v5221_v31 = vld [vmem:[#allocation2 + $0xda] sm:$0xff]  ;;  %v5222_v0 = vld [vmem:[#allocation2 + $0xe2] sm:$0xff] }
 0x44b   :  { %7693 = vmatprep.mubr.f32.mxu0 %v2596_v36  ;;  %8202 = vmatprep.mubr.f32.mxu1 %v4715_v45  ;;  %v5223_v36 = vld [vmem:[#allocation2 + $0xf2] sm:$0xff]  ;;  %v5224_v45 = vld [vmem:[#allocation2 + $0xfa] sm:$0xff] }
 0x44e   :  { %7694 = vmatmul.mubr.f32.gmra.mrb[104].mxu0 %v2597_v62  ;;  %8203 = vmatmul.mubr.f32.gmra.mrb[38].mxu1 %v4716_v32  ;;  %v5225_v62 = vld [vmem:[#allocation2 + $0x10a] sm:$0xff]  ;;  %v5226_v32 = vld [vmem:[#allocation2 + $0x112] sm:$0xff] }
 0x44f   :  { %7696 = vmatprep.mubr.f32.mxu0 %v2598_v38  ;;  %8205 = vmatprep.mubr.f32.mxu1 %v4717_v46  ;;  %v5227_v38 = vld [vmem:[#allocation2 + $0x122] sm:$0xff]  ;;  %v5228_v46 = vld [vmem:[#allocation2 + $0x12a] sm:$0xff] }
 0x452   :  { %7697 = vmatmul.mubr.f32.gmra.mrb[106].mxu0 %v2599_v6  ;;  %8206 = vmatmul.mubr.f32.gmra.mrb[40].mxu1 %v4718_v16  ;;  %v5229_v6 = vld [vmem:[#allocation2 + $0x13a] sm:$0xff]  ;;  %v5230_v16 = vld [vmem:[#allocation2 + $0x142] sm:$0xff] }
 0x453   :  { %7699 = vmatprep.mubr.f32.mxu0 %v2600_v35  ;;  %8208 = vmatprep.mubr.f32.mxu1 %v4719_v55  ;;  %v5231_v35 = vld [vmem:[#allocation2 + $0x152] sm:$0xff]  ;;  %v5232_v55 = vld [vmem:[#allocation2 + $0x15a] sm:$0xff] }
 0x456   :  { %7700 = vmatmul.mubr.f32.gmra.mrb[108].mxu0 %v2601_v4  ;;  %8209 = vmatmul.mubr.f32.gmra.mrb[42].mxu1 %v4720_v63  ;;  %v5233_v4 = vld [vmem:[#allocation2 + $0x16a] sm:$0xff]  ;;  %v5234_v63 = vld [vmem:[#allocation2 + $0x172] sm:$0xff] }
 0x457   :  { %7702 = vmatprep.mubr.f32.mxu0 %v2602_v39  ;;  %8211 = vmatprep.mubr.f32.mxu1 %v4721_v24  ;;  %v5235_v39 = vld [vmem:[#allocation2 + $0x182] sm:$0xff]  ;;  %v5237_v24 = vld [vmem:[#allocation2 + $0x19a] sm:$0xff] }
 0x45a   :  { %7703 = vmatmul.mubr.f32.gmra.mrb[110].mxu0 %v2603_v56  ;;  %8212 = vmatmul.mubr.f32.gmra.mrb[44].mxu1 %v4722_v28  ;;  %v5236_v56 = vld [vmem:[#allocation2 + $0x18a] sm:$0xff]  ;;  %v5238_v28 = vld [vmem:[#allocation2 + $0x1a2] sm:$0xff] }
 0x45b   :  { %7705 = vmatprep.mubr.f32.mxu0 %v2604_v14  ;;  %8214 = vmatprep.mubr.f32.mxu1 %v4723_v10  ;;  %v5239_v14 = vld [vmem:[#allocation2 + $0x1e2] sm:$0xff]  ;;  %v5240_v10 = vld [vmem:[#allocation2 + $0x1ea] sm:$0xff] }
 0x45e   :  { %7706 = vmatmul.mubr.f32.gmra.mrb[112].mxu0 %v2605_v49  ;;  %8215 = vmatmul.mubr.f32.gmra.mrb[46].mxu1 %v4724_v57  ;;  %v5241_v49 = vld [vmem:[#allocation2 + $0x1fa] sm:$0xff]  ;;  %v5242_v57 = vld [vmem:[#allocation2 + $0x202] sm:$0xff] }
 0x45f   :  { %7708 = vmatprep.mubr.f32.mxu0 %v2606_v59  ;;  %8217 = vmatprep.mubr.f32.mxu1 %v4725_v7  ;;  %v5243_v59 = vld [vmem:[#allocation2 + $0x212] sm:$0xff]  ;;  %v5244_v7 = vld [vmem:[#allocation2 + $0x21a] sm:$0xff] }
 0x462   :  { %7709 = vmatmul.mubr.f32.gmra.mrb[114].mxu0 %v2607_v21  ;;  %8218 = vmatmul.mubr.f32.gmra.mrb[48].mxu1 %v4726_v54  ;;  %v5245_v21 = vld [vmem:[#allocation2 + $0x22a] sm:$0xff]  ;;  %v5246_v54 = vld [vmem:[#allocation2 + $0x232] sm:$0xff] }
 0x463   :  { %7711 = vmatprep.mubr.f32.mxu0 %v2608_v8  ;;  %8220 = vmatprep.mubr.f32.mxu1 %v4727_v27  ;;  %v5247_v8 = vld [vmem:[#allocation2 + $0x242] sm:$0xff] }
 0x466   :  { %7712 = vmatmul.mubr.f32.gmra.mrb[116].mxu0 %v2609_v52  ;;  %8221 = vmatmul.mubr.f32.gmra.mrb[50].mxu1 %v4728_v44  ;;  %v5248_v52 = vld [vmem:[#allocation2 + $0x24a] sm:$0xff] }
 0x467   :  { %7714 = vmatprep.mubr.f32.mxu0 %v2610_v18  ;;  %8223 = vmatprep.mubr.f32.mxu1 %v4729_v22  ;;  %v5249_v18 = vld [vmem:[#allocation2 + $0x25a] sm:$0xff] }
 0x46a   :  { %7715 = vmatmul.mubr.f32.gmra.mrb[118].mxu0 %v2611_v47  ;;  %8224 = vmatmul.mubr.f32.gmra.mrb[52].mxu1 %v4730_v26  ;;  %v5250_v47 = vld [vmem:[#allocation2 + $0x262] sm:$0xff] }
 0x46b   :  { %7717 = vmatprep.mubr.f32.mxu0 %v2612_v58  ;;  %8226 = vmatprep.mubr.f32.mxu1 %v4731_v48  ;;  %v5251_v58 = vld [vmem:[#allocation2 + $0x272] sm:$0xff] }
 0x46e   :  { %7718 = vmatmul.mubr.f32.gmra.mrb[120].mxu0 %v2613_v60  ;;  %8227 = vmatmul.mubr.f32.gmra.mrb[54].mxu1 %v4732_v37  ;;  %v5252_v60 = vld [vmem:[#allocation2 + $0x27a] sm:$0xff] }
 0x46f   :  { %7720 = vmatprep.mubr.f32.mxu0 %v2614_v12  ;;  %8229 = vmatprep.mubr.f32.mxu1 %v4733_v20  ;;  %v5253_v12 = vld [vmem:[#allocation2 + $0x28a] sm:$0xff] }
 0x472   :  { %7721 = vmatmul.mubr.f32.gmra.mrb[122].mxu0 %v2615_v53  ;;  %8230 = vmatmul.mubr.f32.gmra.mrb[56].mxu1 %v4734_v41  ;;  %v5254_v53 = vld [vmem:[#allocation2 + $0x292] sm:$0xff] }
 0x473   :  { %7723 = vmatprep.mubr.f32.mxu0 %v2616_v29  ;;  %8232 = vmatprep.mubr.f32.mxu1 %v4735_v43  ;;  %v5255_v29 = vld [vmem:[#allocation2 + $0x2a2] sm:$0xff] }
 0x476   :  { %7724 = vmatmul.mubr.f32.gmra.mrb[124].mxu0 %v2617_v61  ;;  %8233 = vmatmul.mubr.f32.gmra.mrb[58].mxu1 %v4736_v2  ;;  %v5256_v61 = vld [vmem:[#allocation2 + $0x2aa] sm:$0xff] }
 0x477   :  { %7726 = vmatprep.mubr.f32.mxu0 %v11203_v17  ;;  %8235 = vmatprep.mubr.f32.mxu1 %v4737_v1  ;;  %v5212_v17 = vld [vmem:[#allocation2 + $0x6a] sm:$0xff]  ;;  %v5257_v1 = vld [vmem:[#allocation2 + $0x2ba] sm:$0xff] }
 0x47a   :  { %7727 = vmatmul.mubr.f32.gmra.mrb[126].mxu0 %v11207_v40  ;;  %8236 = vmatmul.mubr.f32.gmra.mrb[60].mxu1 %v4738_v3  ;;  %v5215_v40 = vld [vmem:[#allocation2 + $0x92] sm:$0xff]  ;;  %v5258_v3 = vld [vmem:[#allocation2 + $0x2c2] sm:$0xff] }
 0x47b   :  { %8238 = vmatprep.mubr.f32.mxu1 %v4739_v51 }
 0x47e   :  { %8239 = vmatmul.mubr.f32.gmra.mrb[62].mxu1 %v4740_v5 }
 0x47f   :  { %8273 = vmatprep.mubr.f32.mxu1 %v5207_v33  ;;  %v5259_v33 = vld [vmem:[#allocation2 + $0x2d2] sm:$0xff] }
 0x482   :  { %8274 = vmatmul.mubr.f32.vlgmr.msra.gmra.mrb[0].mxu1 %v5208_v13 }
 0x483   :  { %8276 = vmatprep.mubr.f32.mxu1 %v5209_v30  ;;  %v5260_v30 = vld [vmem:[#allocation2 + $0x2da] sm:$0xff] }
 0x486   :  { %8277 = vmatmul.mubr.f32.gmra.mrb[2].mxu1 %v5210_v34 }
 0x487   :  { %8279 = vmatprep.mubr.f32.mxu1 %v5211_v9  ;;  %v5261_v9 = vld [vmem:[#allocation2 + $0x2ea] sm:$0xff] }
 0x48a   :  { %8280 = vmatmul.mubr.f32.gmra.mrb[4].mxu1 %v5212_v17 }
 0x48b   :  { %8282 = vmatprep.mubr.f32.mxu1 %v5213_v23  ;;  %v5262_v23 = vld [vmem:[#allocation2 + $0x2f2] sm:$0xff] }
 0x48e   :  { %8283 = vmatmul.mubr.f32.gmra.mrb[6].mxu1 %v5214_v11 }
 0x48f   :  { %8285 = vmatprep.mubr.f32.mxu1 %v5215_v40  ;;  %v5263_v40 = vld [vmem:[#allocation2 + $0x302] sm:$0xff] }
 0x492   :  { %8286 = vmatmul.mubr.f32.gmra.mrb[8].mxu1 %v5216_v15 }
 0x493   :  { %8288 = vmatprep.mubr.f32.mxu1 %v5217_v19  ;;  %v5264_v19 = vld [vmem:[#allocation2 + $0x30a] sm:$0xff] }
 0x496   :  { %8289 = vmatmul.mubr.f32.gmra.mrb[10].mxu1 %v5218_v42 }
 0x497   :  { %8291 = vmatprep.mubr.f32.mxu1 %v5219_v50  ;;  %v5265_v50 = vld [vmem:[#allocation2 + $0x31a] sm:$0xff] }
 0x49a   :  { %8292 = vmatmul.mubr.f32.gmra.mrb[12].mxu1 %v5220_v25 }
 0x49b   :  { %8294 = vmatprep.mubr.f32.mxu1 %v5221_v31  ;;  %v5266_v31 = vld [vmem:[#allocation2 + $0x322] sm:$0xff] }
 0x49e   :  { %8295 = vmatmul.mubr.f32.gmra.mrb[14].mxu1 %v5222_v0 }
 0x49f   :  { %8297 = vmatprep.mubr.f32.mxu1 %v5223_v36  ;;  %v5267_v36 = vld [vmem:[#allocation2 + $0x332] sm:$0xff] }
 0x4a2   :  { %8298 = vmatmul.mubr.f32.gmra.mrb[16].mxu1 %v5224_v45  ;;  %v5269_v45 = vld [vmem:[#allocation2 + $0x34a] sm:$0xff] }
 0x4a3   :  { %8300 = vmatprep.mubr.f32.mxu1 %v5225_v62 }
 0x4a6   :  { %8301 = vmatmul.mubr.f32.gmra.mrb[18].mxu1 %v5226_v32  ;;  %v5268_v32 = vld [vmem:[#allocation2 + $0x33a] sm:$0xff] }
 0x4a7   :  { %8303 = vmatprep.mubr.f32.mxu1 %v5227_v38 }
 0x4aa   :  { %8304 = vmatmul.mubr.f32.gmra.mrb[20].mxu1 %v5228_v46  ;;  %v5270_v46 = vld [vmem:[#allocation2 + $0x352] sm:$0xff] }
 0x4ab   :  { %8306 = vmatprep.mubr.f32.mxu1 %v5229_v6 }
 0x4ae   :  { %8307 = vmatmul.mubr.f32.gmra.mrb[22].mxu1 %v5230_v16 }
 0x4af   :  { %8309 = vmatprep.mubr.f32.mxu1 %v5231_v35 }
 0x4b2   :  { %8310 = vmatmul.mubr.f32.gmra.mrb[24].mxu1 %v5232_v55 }
 0x4b3   :  { %8312 = vmatprep.mubr.f32.mxu1 %v5233_v4 }
 0x4b6   :  { %8313 = vmatmul.mubr.f32.gmra.mrb[26].mxu1 %v5234_v63 }
 0x4b7   :  { %8315 = vmatprep.mubr.f32.mxu1 %v5235_v39 }
 0x4ba   :  { %8316 = vmatmul.mubr.f32.gmra.mrb[28].mxu1 %v5236_v56 }
 0x4bb   :  { %8318 = vmatprep.mubr.f32.mxu1 %v5237_v24 }
 0x4be   :  { %8319 = vmatmul.mubr.f32.gmra.mrb[30].mxu1 %v5238_v28 }
 0x4bf   :  { %8321 = vmatprep.mubr.f32.mxu1 %v5239_v14 }
 0x4c2   :  { %8322 = vmatmul.mubr.f32.gmra.mrb[32].mxu1 %v5240_v10 }
 0x4c3   :  { %8324 = vmatprep.mubr.f32.mxu1 %v5241_v49 }
 0x4c6   :  { %8325 = vmatmul.mubr.f32.gmra.mrb[34].mxu1 %v5242_v57 }
 0x4c7   :  { %8327 = vmatprep.mubr.f32.mxu1 %v5243_v59 }
 0x4ca   :  { %8328 = vmatmul.mubr.f32.gmra.mrb[36].mxu1 %v5244_v7 }
 0x4cb   :  { %8330 = vmatprep.mubr.f32.mxu1 %v5245_v21 }
 0x4ce   :  { %8331 = vmatmul.mubr.f32.gmra.mrb[38].mxu1 %v5246_v54 }
 0x4cf   :  { %8333 = vmatprep.mubr.f32.mxu1 %v5247_v8 }
 0x4d1   :  { %v11216_v27 = vpop.f32.mrb[64].mxu0 }
 0x4d2   :  { %v11218_v44 = vpop.f32.mrb[65].mxu0  ;;  %8334 = vmatmul.mubr.f32.gmra.mrb[40].mxu1 %v5248_v52 }
 0x4d3   :  { %8336 = vmatprep.mubr.f32.mxu1 %v5249_v18 }
 0x4d5   :  { %v11220_v22 = vpop.f32.mrb[66].mxu0 }
 0x4d6   :  { %v11222_v26 = vpop.f32.mrb[67].mxu0  ;;  %8337 = vmatmul.mubr.f32.gmra.mrb[42].mxu1 %v5250_v47 }
 0x4d7   :  { %8339 = vmatprep.mubr.f32.mxu1 %v5251_v58 }
 0x4d9   :  { %v11224_v48 = vpop.f32.mrb[68].mxu0 }
 0x4da   :  { %v11226_v37 = vpop.f32.mrb[69].mxu0  ;;  %8340 = vmatmul.mubr.f32.gmra.mrb[44].mxu1 %v5252_v60 }
 0x4db   :  { %8342 = vmatprep.mubr.f32.mxu1 %v5253_v12 }
 0x4dd   :  { %v11228_v20 = vpop.f32.mrb[70].mxu0 }
 0x4de   :  { %v11230_v41 = vpop.f32.mrb[71].mxu0  ;;  %8343 = vmatmul.mubr.f32.gmra.mrb[46].mxu1 %v5254_v53 }
 0x4df   :  { %8345 = vmatprep.mubr.f32.mxu1 %v5255_v29 }
 0x4e1   :  { %v11232_v43 = vpop.f32.mrb[72].mxu0 }
 0x4e2   :  { %v11234_v2 = vpop.f32.mrb[73].mxu0  ;;  %8346 = vmatmul.mubr.f32.gmra.mrb[48].mxu1 %v5256_v61 }
 0x4e3   :  { %8348 = vmatprep.mubr.f32.mxu1 %v5257_v1 }
 0x4e5   :  { %v11236_v51 = vpop.f32.mrb[74].mxu0 }
 0x4e6   :  { %v11238_v5 = vpop.f32.mrb[75].mxu0  ;;  %8349 = vmatmul.mubr.f32.gmra.mrb[50].mxu1 %v5258_v3 }
 0x4e7   :  { %8351 = vmatprep.mubr.f32.mxu1 %v5259_v33 }
 0x4e9   :  { %v11240_v13 = vpop.f32.mrb[76].mxu0 }
 0x4ea   :  { %v11242_v34 = vpop.f32.mrb[77].mxu0  ;;  %8352 = vmatmul.mubr.f32.gmra.mrb[52].mxu1 %v5260_v30 }
 0x4eb   :  { %8354 = vmatprep.mubr.f32.mxu1 %v5261_v9 }
 0x4ed   :  { %v11244_v17 = vpop.f32.mrb[78].mxu0 }
 0x4ee   :  { %v11246_v11 = vpop.f32.mrb[79].mxu0  ;;  %8355 = vmatmul.mubr.f32.gmra.mrb[54].mxu1 %v5262_v23 }
 0x4ef   :  { %8357 = vmatprep.mubr.f32.mxu1 %v5263_v40 }
 0x4f1   :  { %v11248_v15 = vpop.f32.mrb[80].mxu0 }
 0x4f2   :  { %v11250_v42 = vpop.f32.mrb[81].mxu0  ;;  %8358 = vmatmul.mubr.f32.gmra.mrb[56].mxu1 %v5264_v19 }
 0x4f3   :  { %8360 = vmatprep.mubr.f32.mxu1 %v5265_v50 }
 0x4f5   :  { %v11252_v25 = vpop.f32.mrb[82].mxu0 }
 0x4f6   :  { %v11254_v0 = vpop.f32.mrb[83].mxu0  ;;  %8361 = vmatmul.mubr.f32.gmra.mrb[58].mxu1 %v5266_v31 }
 0x4f7   :  { %8363 = vmatprep.mubr.f32.mxu1 %v5267_v36 }
 0x4f9   :  { %v11256_v62 = vpop.f32.mrb[84].mxu0 }
 0x4fa   :  { %v11258_v38 = vpop.f32.mrb[85].mxu0  ;;  %8364 = vmatmul.mubr.f32.gmra.mrb[60].mxu1 %v5268_v32 }
 0x4fb   :  { %8366 = vmatprep.mubr.f32.mxu1 %v5269_v45 }
 0x4fd   :  { %v11260_v6 = vpop.f32.mrb[86].mxu0 }
 0x4fe   :  { %v11262_v16 = vpop.f32.mrb[87].mxu0  ;;  %8367 = vmatmul.mubr.f32.gmra.mrb[62].mxu1 %v5270_v46 }
 0x501   :  { %v11264_v35 = vpop.f32.mrb[88].mxu0 }
 0x502   :  { %v11266_v55 = vpop.f32.mrb[89].mxu0 }
 0x505   :  { %v11268_v4 = vpop.f32.mrb[90].mxu0 }
 0x506   :  { %v11270_v63 = vpop.f32.mrb[91].mxu0 }
 0x509   :  { %v11272_v39 = vpop.f32.mrb[92].mxu0 }
 0x50a   :  { %v11274_v24 = vpop.f32.mrb[93].mxu0 }
 0x50d   :  { %v11276_v56 = vpop.f32.mrb[94].mxu0 }
 0x50e   :  { %v11278_v28 = vpop.f32.mrb[95].mxu0 }
 0x511   :  { %v11280_v14 = vpop.f32.mrb[96].mxu0 }
 0x512   :  { %v11282_v10 = vpop.f32.mrb[97].mxu0 }
 0x515   :  { %v11284_v49 = vpop.f32.mrb[98].mxu0 }
 0x516   :  { %v11286_v57 = vpop.f32.mrb[99].mxu0 }
 0x519   :  { %v11288_v59 = vpop.f32.mrb[100].mxu0 }
 0x51a   :  { %v11290_v7 = vpop.f32.mrb[101].mxu0 }
 0x51d   :  { %v11292_v21 = vpop.f32.mrb[102].mxu0 }
 0x51e   :  { %v11294_v54 = vpop.f32.mrb[103].mxu0 }
 0x521   :  { %v11296_v8 = vpop.f32.mrb[104].mxu0 }
 0x522   :  { %v11298_v52 = vpop.f32.mrb[105].mxu0 }
 0x525   :  { %v11300_v18 = vpop.f32.mrb[106].mxu0 }
 0x526   :  { %v11302_v47 = vpop.f32.mrb[107].mxu0 }
 0x529   :  { %v11304_v58 = vpop.f32.mrb[108].mxu0 }
 0x52a   :  { %v11306_v60 = vpop.f32.mrb[109].mxu0 }
 0x52d   :  { %v11308_v12 = vpop.f32.mrb[110].mxu0 }
 0x52e   :  { %v11310_v53 = vpop.f32.mrb[111].mxu0 }
 0x531   :  { %v11312_v29 = vpop.f32.mrb[112].mxu0 }
 0x532   :  { %v11314_v61 = vpop.f32.mrb[113].mxu0 }
 0x535   :  { %v11316_v1 = vpop.f32.mrb[114].mxu0 }
 0x536   :  { %v11318_v3 = vpop.f32.mrb[115].mxu0 }
 0x539   :  { %v11320_v33 = vpop.f32.mrb[116].mxu0 }
 0x53a   :  { %12741 = vst [vmem:[#allocation22_spill] sm:$0xff] %v11320_v33  ;;  %v11322_v30 = vpop.f32.mrb[117].mxu0 }
 0x53b   :  { %12742 = vst [vmem:[#allocation24_spill] sm:$0xff] %v11322_v30 }
 0x53d   :  { %v11324_v9 = vpop.f32.mrb[118].mxu0 }
 0x53e   :  { %12743 = vst [vmem:[#allocation21_spill] sm:$0xff] %v11324_v9  ;;  %v11326_v23 = vpop.f32.mrb[119].mxu0 }
 0x53f   :  { %12744 = vst [vmem:[#allocation33_spill] sm:$0xff] %v11326_v23 }
 0x541   :  { %v11328_v40 = vpop.f32.mrb[120].mxu0 }
 0x542   :  { %12745 = vst [vmem:[#allocation23_spill] sm:$0xff] %v11328_v40  ;;  %v11330_v19 = vpop.f32.mrb[121].mxu0  ;;  %v11348_v40 = vld [vmem:[%s12340_s3] ss:$0 sm:$0xff]  ;;  %s9314_s3 = smov [#allocation9]  }
 0x543   :  { %12746 = vst [vmem:[#allocation36_spill] sm:$0xff] %v11330_v19  ;;  %s6275_s26 = sshll.u32 %s9314_s3, 4  ;;  %s6276_s26 = int_to_ptr.vmem [resolvable:$true] %s6275_s26 }
 0x544   :  { %s9280_s29 = scalar_lea.vmem %s6276_s26, 8192  ;;  %p9285_p11 = scmp.lt.s32.totalorder %s6276_s26, %s6276_s26 }
 0x545   :  { %v11332_v50 = vpop.f32.mrb[122].mxu0  ;;  %p9281_p10 = scmp.ne.s32.totalorder %s6276_s26, %s9280_s29  ;;  %p9286_p12 = scmp.lt.s32.totalorder %s9280_s29, %s9280_s29 }
 0x546   :  { %12747 = vst [vmem:[#allocation34_spill] sm:$0xff] %v11332_v50  ;;  %v11334_v31 = vpop.f32.mrb[123].mxu0 }
 0x547   :  { %12748 = vst [vmem:[#allocation15_spill] sm:$0xff] %v11334_v31  ;;  %p9287_p13 = por %p9286_p12, %p9285_p11 }
 0x549   :  { %v11336_v36 = vpop.f32.mrb[124].mxu0  ;;  %p9288_p0 = pnand %p9287_p13, %p9281_p10 }
 0x54a   :  { %12749 = vst [vmem:[#allocation19_spill] sm:$0xff] %v11336_v36  ;;  %v11338_v45 = vpop.f32.mrb[125].mxu0 }
 0x54b   :  { %12750 = vst [vmem:[#allocation35_spill] sm:$0xff] %v11338_v45 }
 0x54d   :  { %v11340_v32 = vpop.f32.mrb[126].mxu0 }
 0x54e   :  { %12751 = vst [vmem:[#allocation26_spill] sm:$0xff] %v11340_v32  ;;  %v11342_v46 = vpop.f32.mrb[127].mxu0 }
 0x54f   :  { %12752 = vst [vmem:[#allocation25_spill] sm:$0xff] %v11342_v46 }
 0x555   :  { %v8275_v30 = vpop.f32.mrb[0].mxu1 }
 0x556   :  { %v8689_v9 = vadd.f32 %v8275_v30, %v11216_v27  ;;  %v5354_v19 = vpop.f32.mrb[1].mxu1 }
 0x557   :  { %v8690_v50 = vadd.f32 %v5354_v19, %v11218_v44 }
 0x558   :  { %v11352_v31 = vadd.f32 %v8689_v9, %v11348_v40 }
 0x559   :  { %v11355_v45 = vadd.f32 %v8690_v50, %v11348_v40  ;;  %v8278_v32 = vpop.f32.mrb[2].mxu1 }
 0x55a   :  { %12753 = vst [vmem:[#allocation28_spill] sm:$0xff] %v11352_v31  ;;  %v8691_v46 = vadd.f32 %v8278_v32, %v11220_v22  ;;  %v5364_v36 = vpop.f32.mrb[3].mxu1 }
 0x55b   :  { %12754 = vst [vmem:[#allocation27_spill] sm:$0xff] %v11355_v45  ;;  %v8692_v27 = vadd.f32 %v5364_v36, %v11222_v26  ;;  %v5808_v30 = vadd.f32 %v11352_v31, %v11355_v45 }
 0x55c   :  { %v11366_v19 = vadd.f32 %v8691_v46, %v11348_v40 }
 0x55d   :  { %v11362_v23 = vadd.f32 %v8692_v27, %v11348_v40  ;;  %v8281_v33 = vpop.f32.mrb[4].mxu1 }
 0x55e   :  { %v8693_v44 = vadd.f32 %v8281_v33, %v11224_v48  ;;  %v5374_v9 = vpop.f32.mrb[5].mxu1 }
 0x55f   :  { %v5809_v50 = vadd.f32 %v5808_v30, %v11362_v23  ;;  %v8694_v22 = vadd.f32 %v5374_v9, %v11226_v37 }
 0x560   :  { %v11376_v45 = vadd.f32 %v8693_v44, %v11348_v40 }
 0x561   :  { %v5810_v32 = vadd.f32 %v5809_v50, %v11366_v19  ;;  %v11372_v26 = vadd.f32 %v8694_v22, %v11348_v40  ;;  %v8284_v36 = vpop.f32.mrb[6].mxu1 }
 0x562   :  { %v8695_v27 = vadd.f32 %v8284_v36, %v11228_v20  ;;  %v5384_v31 = vpop.f32.mrb[7].mxu1 }
 0x563   :  { %v5811_v48 = vadd.f32 %v5810_v32, %v11372_v26  ;;  %v8696_v33 = vadd.f32 %v5384_v31, %v11230_v41 }
 0x564   :  { %v11386_v22 = vadd.f32 %v8695_v27, %v11348_v40 }
 0x565   :  { %v11381_v46 = vadd.f32 %v8696_v33, %v11348_v40  ;;  %v5812_v37 = vadd.f32 %v5811_v48, %v11376_v45  ;;  %v8287_v30 = vpop.f32.mrb[8].mxu1 }
 0x566   :  { %v8697_v9 = vadd.f32 %v8287_v30, %v11232_v43  ;;  %v5394_v50 = vpop.f32.mrb[9].mxu1 }
 0x567   :  { %v5813_v20 = vadd.f32 %v5812_v37, %v11381_v46  ;;  %v8698_v44 = vadd.f32 %v5394_v50, %v11234_v2 }
 0x568   :  { %v11396_v33 = vadd.f32 %v8697_v9, %v11348_v40 }
 0x569   :  { %v11391_v32 = vadd.f32 %v8698_v44, %v11348_v40  ;;  %v5814_v41 = vadd.f32 %v5813_v20, %v11386_v22  ;;  %v8290_v31 = vpop.f32.mrb[10].mxu1 }
 0x56a   :  { %v8699_v36 = vadd.f32 %v8290_v31, %v11236_v51  ;;  %v5404_v48 = vpop.f32.mrb[11].mxu1 }
 0x56b   :  { %v5815_v43 = vadd.f32 %v5814_v41, %v11391_v32  ;;  %v8700_v27 = vadd.f32 %v5404_v48, %v11238_v5 }
 0x56c   :  { %v11406_v44 = vadd.f32 %v8699_v36, %v11348_v40 }
 0x56d   :  { %v11401_v37 = vadd.f32 %v8700_v27, %v11348_v40  ;;  %v5816_v2 = vadd.f32 %v5815_v43, %v11396_v33  ;;  %v8293_v30 = vpop.f32.mrb[12].mxu1 }
 0x56e   :  { %v8701_v50 = vadd.f32 %v8293_v30, %v11240_v13  ;;  %v5414_v20 = vpop.f32.mrb[13].mxu1 }
 0x56f   :  { %v5817_v51 = vadd.f32 %v5816_v2, %v11401_v37  ;;  %v8702_v9 = vadd.f32 %v5414_v20, %v11242_v34 }
 0x570   :  { %v11416_v27 = vadd.f32 %v8701_v50, %v11348_v40 }
 0x571   :  { %v11411_v41 = vadd.f32 %v8702_v9, %v11348_v40  ;;  %v5818_v5 = vadd.f32 %v5817_v51, %v11406_v44  ;;  %v8296_v31 = vpop.f32.mrb[14].mxu1 }
 0x572   :  { %v8703_v48 = vadd.f32 %v8296_v31, %v11244_v17  ;;  %v5424_v43 = vpop.f32.mrb[15].mxu1 }
 0x573   :  { %v5819_v13 = vadd.f32 %v5818_v5, %v11411_v41  ;;  %v8704_v36 = vadd.f32 %v5424_v43, %v11246_v11 }
 0x574   :  { %v11426_v9 = vadd.f32 %v8703_v48, %v11348_v40 }
 0x575   :  { %v11421_v2 = vadd.f32 %v8704_v36, %v11348_v40  ;;  %v5820_v34 = vadd.f32 %v5819_v13, %v11416_v27  ;;  %v8299_v30 = vpop.f32.mrb[16].mxu1 }
 0x576   :  { %v8705_v20 = vadd.f32 %v8299_v30, %v11248_v15  ;;  %v5434_v51 = vpop.f32.mrb[17].mxu1 }
 0x577   :  { %v5821_v17 = vadd.f32 %v5820_v34, %v11421_v2  ;;  %v8706_v50 = vadd.f32 %v5434_v51, %v11250_v42 }
 0x578   :  { %v11436_v36 = vadd.f32 %v8705_v20, %v11348_v40 }
 0x579   :  { %v11431_v5 = vadd.f32 %v8706_v50, %v11348_v40  ;;  %v5822_v11 = vadd.f32 %v5821_v17, %v11426_v9  ;;  %v8302_v31 = vpop.f32.mrb[18].mxu1 }
 0x57a   :  { %v8707_v43 = vadd.f32 %v8302_v31, %v11252_v25  ;;  %v5444_v13 = vpop.f32.mrb[19].mxu1 }
 0x57b   :  { %v5823_v15 = vadd.f32 %v5822_v11, %v11431_v5  ;;  %v8708_v48 = vadd.f32 %v5444_v13, %v11254_v0 }
 0x57c   :  { %v11446_v50 = vadd.f32 %v8707_v43, %v11348_v40 }
 0x57d   :  { %v11441_v34 = vadd.f32 %v8708_v48, %v11348_v40  ;;  %v5824_v42 = vadd.f32 %v5823_v15, %v11436_v36  ;;  %v8305_v30 = vpop.f32.mrb[20].mxu1 }
 0x57e   :  { %v8709_v51 = vadd.f32 %v8305_v30, %v11256_v62  ;;  %v5454_v17 = vpop.f32.mrb[21].mxu1 }
 0x57f   :  { %v5825_v25 = vadd.f32 %v5824_v42, %v11441_v34  ;;  %v8710_v20 = vadd.f32 %v5454_v17, %v11258_v38 }
 0x580   :  { %v11456_v48 = vadd.f32 %v8709_v51, %v11348_v40 }
 0x581   :  { %v11451_v11 = vadd.f32 %v8710_v20, %v11348_v40  ;;  %v5826_v0 = vadd.f32 %v5825_v25, %v11446_v50  ;;  %v8308_v31 = vpop.f32.mrb[22].mxu1 }
 0x582   :  { %v8711_v13 = vadd.f32 %v8308_v31, %v11260_v6  ;;  %v5464_v15 = vpop.f32.mrb[23].mxu1 }
 0x583   :  { %v5827_v62 = vadd.f32 %v5826_v0, %v11451_v11  ;;  %v8712_v43 = vadd.f32 %v5464_v15, %v11262_v16 }
 0x584   :  { %v11466_v20 = vadd.f32 %v8711_v13, %v11348_v40 }
 0x585   :  { %v11461_v42 = vadd.f32 %v8712_v43, %v11348_v40  ;;  %v5828_v38 = vadd.f32 %v5827_v62, %v11456_v48  ;;  %v8311_v30 = vpop.f32.mrb[24].mxu1 }
 0x586   :  { %v8713_v17 = vadd.f32 %v8311_v30, %v11264_v35  ;;  %v5474_v25 = vpop.f32.mrb[25].mxu1 }
 0x587   :  { %v5829_v6 = vadd.f32 %v5828_v38, %v11461_v42  ;;  %v8714_v51 = vadd.f32 %v5474_v25, %v11266_v55 }
 0x588   :  { %v11476_v43 = vadd.f32 %v8713_v17, %v11348_v40 }
 0x589   :  { %v11471_v0 = vadd.f32 %v8714_v51, %v11348_v40  ;;  %v5830_v16 = vadd.f32 %v5829_v6, %v11466_v20  ;;  %v8314_v31 = vpop.f32.mrb[26].mxu1 }
 0x58a   :  { %v8715_v15 = vadd.f32 %v8314_v31, %v11268_v4  ;;  %v5484_v62 = vpop.f32.mrb[27].mxu1 }
 0x58b   :  { %v5831_v35 = vadd.f32 %v5830_v16, %v11471_v0  ;;  %v8716_v13 = vadd.f32 %v5484_v62, %v11270_v63 }
 0x58c   :  { %v11486_v51 = vadd.f32 %v8715_v15, %v11348_v40 }
 0x58d   :  { %v11481_v38 = vadd.f32 %v8716_v13, %v11348_v40  ;;  %v5832_v55 = vadd.f32 %v5831_v35, %v11476_v43  ;;  %v8317_v30 = vpop.f32.mrb[28].mxu1 }
 0x58e   :  { %v8717_v25 = vadd.f32 %v8317_v30, %v11272_v39  ;;  %v5494_v6 = vpop.f32.mrb[29].mxu1 }
 0x58f   :  { %v5833_v4 = vadd.f32 %v5832_v55, %v11481_v38  ;;  %v8718_v17 = vadd.f32 %v5494_v6, %v11274_v24 }
 0x590   :  { %v11496_v13 = vadd.f32 %v8717_v25, %v11348_v40 }
 0x591   :  { %v11491_v16 = vadd.f32 %v8718_v17, %v11348_v40  ;;  %v5834_v63 = vadd.f32 %v5833_v4, %v11486_v51  ;;  %v8320_v31 = vpop.f32.mrb[30].mxu1 }
 0x592   :  { %v8719_v62 = vadd.f32 %v8320_v31, %v11276_v56  ;;  %v5504_v35 = vpop.f32.mrb[31].mxu1  ;;  %12756 = vst [vmem:[#allocation29_spill] sm:$0xff] %v11496_v13 }
 0x593   :  { %12755 = vst [vmem:[#allocation30_spill] sm:$0xff] %v11491_v16  ;;  %v5835_v39 = vadd.f32 %v5834_v63, %v11491_v16  ;;  %v8720_v15 = vadd.f32 %v5504_v35, %v11278_v28 }
 0x594   :  { %v11506_v17 = vadd.f32 %v8719_v62, %v11348_v40 }
 0x595   :  { %v11501_v55 = vadd.f32 %v8720_v15, %v11348_v40  ;;  %v5836_v24 = vadd.f32 %v5835_v39, %v11496_v13  ;;  %v8323_v30 = vpop.f32.mrb[32].mxu1 }
 0x596   :  { %v8721_v6 = vadd.f32 %v8323_v30, %v11280_v14  ;;  %v5514_v4 = vpop.f32.mrb[33].mxu1  ;;  %12758 = vst [vmem:[#allocation31_spill] sm:$0xff] %v11506_v17 }
 0x597   :  { %12757 = vst [vmem:[#allocation13_spill] sm:$0xff] %v11501_v55  ;;  %v5837_v56 = vadd.f32 %v5836_v24, %v11501_v55  ;;  %v8722_v25 = vadd.f32 %v5514_v4, %v11282_v10 }
 0x598   :  { %v11516_v15 = vadd.f32 %v8721_v6, %v11348_v40 }
 0x599   :  { %v11511_v63 = vadd.f32 %v8722_v25, %v11348_v40  ;;  %v5838_v28 = vadd.f32 %v5837_v56, %v11506_v17  ;;  %v8326_v31 = vpop.f32.mrb[34].mxu1 }
 0x59a   :  { %v8723_v35 = vadd.f32 %v8326_v31, %v11284_v49  ;;  %v5524_v39 = vpop.f32.mrb[35].mxu1  ;;  %12760 = vst [vmem:[#allocation32_spill] sm:$0xff] %v11516_v15 }
 0x59b   :  { %12759 = vst [vmem:[#allocation16_spill] sm:$0xff] %v11511_v63  ;;  %v5839_v14 = vadd.f32 %v5838_v28, %v11511_v63  ;;  %v8724_v62 = vadd.f32 %v5524_v39, %v11286_v57 }
 0x59c   :  { %v11526_v25 = vadd.f32 %v8723_v35, %v11348_v40 }
 0x59d   :  { %v11521_v24 = vadd.f32 %v8724_v62, %v11348_v40  ;;  %v5840_v10 = vadd.f32 %v5839_v14, %v11516_v15  ;;  %v8329_v30 = vpop.f32.mrb[36].mxu1 }
 0x59e   :  { %v8725_v4 = vadd.f32 %v8329_v30, %v11288_v59  ;;  %v5534_v56 = vpop.f32.mrb[37].mxu1  ;;  %12762 = vst [vmem:[#allocation14_spill] sm:$0xff] %v11526_v25 }
 0x59f   :  { %12761 = vst [vmem:[#allocation18_spill] sm:$0xff] %v11521_v24  ;;  %v5841_v49 = vadd.f32 %v5840_v10, %v11521_v24  ;;  %v8726_v6 = vadd.f32 %v5534_v56, %v11290_v7 }
 0x5a0   :  { %v11536_v62 = vadd.f32 %v8725_v4, %v11348_v40 }
 0x5a1   :  { %v11531_v28 = vadd.f32 %v8726_v6, %v11348_v40  ;;  %v5842_v57 = vadd.f32 %v5841_v49, %v11526_v25  ;;  %v8332_v31 = vpop.f32.mrb[38].mxu1 }
 0x5a2   :  { %v8727_v39 = vadd.f32 %v8332_v31, %v11292_v21  ;;  %v5544_v14 = vpop.f32.mrb[39].mxu1  ;;  %12764 = vst [vmem:[#allocation17_spill] sm:$0xff] %v11536_v62 }
 0x5a3   :  { %12763 = vst [vmem:[#allocation20_spill] sm:$0xff] %v11531_v28  ;;  %v5843_v59 = vadd.f32 %v5842_v57, %v11531_v28  ;;  %v8728_v35 = vadd.f32 %v5544_v14, %v11294_v54 }
 0x5a4   :  { %v11546_v6 = vadd.f32 %v8727_v39, %v11348_v40 }
 0x5a5   :  { %v11541_v10 = vadd.f32 %v8728_v35, %v11348_v40  ;;  %v5844_v7 = vadd.f32 %v5843_v59, %v11536_v62  ;;  %v8335_v30 = vpop.f32.mrb[40].mxu1 }
 0x5a6   :  { %v8729_v56 = vadd.f32 %v8335_v30, %v11296_v8  ;;  %v5554_v49 = vpop.f32.mrb[41].mxu1  ;;  %12766 = vst [vmem:[#allocation37_spill] sm:$0xff] %v11546_v6 }
 0x5a7   :  { %12765 = vst [vmem:[#allocation38_spill] sm:$0xff] %v11541_v10  ;;  %v5845_v21 = vadd.f32 %v5844_v7, %v11541_v10  ;;  %v8730_v4 = vadd.f32 %v5554_v49, %v11298_v52  ;;  %v12776_v10 = vld [vmem:[#allocation23_spill] sm:$0xff] }
 0x5a8   :  { %v11556_v35 = vadd.f32 %v8729_v56, %v11348_v40 }
 0x5a9   :  { %v11551_v57 = vadd.f32 %v8730_v4, %v11348_v40  ;;  %v5846_v54 = vadd.f32 %v5845_v21, %v11546_v6  ;;  %v8338_v31 = vpop.f32.mrb[42].mxu1 }
 0x5aa   :  { %v8731_v14 = vadd.f32 %v8338_v31, %v11300_v18  ;;  %v5564_v59 = vpop.f32.mrb[43].mxu1  ;;  %12768 = vst [vmem:[#allocation39_spill] sm:$0xff] %v11556_v35 }
 0x5ab   :  { %12767 = vst [vmem:[#allocation40_spill] sm:$0xff] %v11551_v57  ;;  %v5847_v8 = vadd.f32 %v5846_v54, %v11551_v57  ;;  %v8732_v39 = vadd.f32 %v5564_v59, %v11302_v47  ;;  %v12775_v57 = vld [vmem:[#allocation33_spill] sm:$0xff] }
 0x5ac   :  { %v11566_v4 = vadd.f32 %v8731_v14, %v11348_v40 }
 0x5ad   :  { %v11561_v7 = vadd.f32 %v8732_v39, %v11348_v40  ;;  %v5848_v52 = vadd.f32 %v5847_v8, %v11556_v35  ;;  %v8341_v30 = vpop.f32.mrb[44].mxu1 }
 0x5ae   :  { %v8733_v49 = vadd.f32 %v8341_v30, %v11304_v58  ;;  %v5574_v21 = vpop.f32.mrb[45].mxu1  ;;  %12770 = vst [vmem:[#allocation41_spill] sm:$0xff] %v11566_v4 }
 0x5af   :  { %12769 = vst [vmem:[#allocation42_spill] sm:$0xff] %v11561_v7  ;;  %v5849_v18 = vadd.f32 %v5848_v52, %v11561_v7  ;;  %v8734_v56 = vadd.f32 %v5574_v21, %v11306_v60 }
 0x5b0   :  { %v11576_v39 = vadd.f32 %v8733_v49, %v11348_v40 }
 0x5b1   :  { %v11571_v54 = vadd.f32 %v8734_v56, %v11348_v40  ;;  %v5850_v47 = vadd.f32 %v5849_v18, %v11566_v4  ;;  %v8344_v31 = vpop.f32.mrb[46].mxu1 }
 0x5b2   :  { %v8735_v59 = vadd.f32 %v8344_v31, %v11308_v12  ;;  %v5584_v8 = vpop.f32.mrb[47].mxu1 }
 0x5b3   :  { %12771 = vst [vmem:[#allocation44_spill] sm:$0xff] %v11571_v54  ;;  %v5851_v58 = vadd.f32 %v5850_v47, %v11571_v54  ;;  %v8736_v14 = vadd.f32 %v5584_v8, %v11310_v53 }
 0x5b4   :  { %v11586_v56 = vadd.f32 %v8735_v59, %v11348_v40 }
 0x5b5   :  { %v11581_v52 = vadd.f32 %v8736_v14, %v11348_v40  ;;  %v5852_v60 = vadd.f32 %v5851_v58, %v11576_v39  ;;  %v8347_v30 = vpop.f32.mrb[48].mxu1 }
 0x5b6   :  { %v8737_v21 = vadd.f32 %v8347_v30, %v11312_v29  ;;  %v5594_v18 = vpop.f32.mrb[49].mxu1 }
 0x5b7   :  { %v5853_v12 = vadd.f32 %v5852_v60, %v11581_v52  ;;  %v8738_v49 = vadd.f32 %v5594_v18, %v11314_v61  ;;  %v12772_v18 = vld [vmem:[#allocation22_spill] sm:$0xff] }
 0x5b8   :  { %v11596_v14 = vadd.f32 %v8737_v21, %v11348_v40 }
 0x5b9   :  { %v11591_v47 = vadd.f32 %v8738_v49, %v11348_v40  ;;  %v5854_v53 = vadd.f32 %v5853_v12, %v11586_v56  ;;  %v8350_v31 = vpop.f32.mrb[50].mxu1 }
 0x5ba   :  { %v8739_v8 = vadd.f32 %v8350_v31, %v11316_v1  ;;  %v5604_v58 = vpop.f32.mrb[51].mxu1  ;;  %v12773_v31 = vld [vmem:[#allocation24_spill] sm:$0xff] }
 0x5bb   :  { %v5855_v29 = vadd.f32 %v5854_v53, %v11591_v47  ;;  %v8740_v59 = vadd.f32 %v5604_v58, %v11318_v3  ;;  %v12774_v3 = vld [vmem:[#allocation21_spill] sm:$0xff] }
 0x5bc   :  { %v5795_v54 = vadd.f32 %v8739_v8, %v11348_v40 }
 0x5bd   :  { %v11601_v60 = vadd.f32 %v8740_v59, %v11348_v40  ;;  %v5856_v61 = vadd.f32 %v5855_v29, %v11596_v14  ;;  %v8353_v30 = vpop.f32.mrb[52].mxu1 }
 0x5be   :  { %v8741_v49 = vadd.f32 %v8353_v30, %v12772_v18  ;;  %v5614_v12 = vpop.f32.mrb[53].mxu1 }
 0x5bf   :  { %v5857_v1 = vadd.f32 %v5856_v61, %v11601_v60  ;;  %v8742_v21 = vadd.f32 %v5614_v12, %v12773_v31 }
 0x5c0   :  { %v5797_v35 = vadd.f32 %v8741_v49, %v11348_v40  ;;  %v12778_v49 = vld [vmem:[#allocation34_spill] sm:$0xff] }
 0x5c1   :  { %v5796_v4 = vadd.f32 %v8742_v21, %v11348_v40  ;;  %v5858_v53 = vadd.f32 %v5857_v1, %v5795_v54  ;;  %v8356_v7 = vpop.f32.mrb[54].mxu1  ;;  %v12777_v1 = vld [vmem:[#allocation36_spill] sm:$0xff] }
 0x5c2   :  { %v8743_v58 = vadd.f32 %v8356_v7, %v12774_v3  ;;  %v5624_v59 = vpop.f32.mrb[55].mxu1 }
 0x5c3   :  { %v5859_v29 = vadd.f32 %v5858_v53, %v5796_v4  ;;  %v8744_v6 = vadd.f32 %v5624_v59, %v12775_v57  ;;  %v12779_v59 = vld [vmem:[#allocation15_spill] sm:$0xff] }
 0x5c4   :  { %v5799_v12 = vadd.f32 %v8743_v58, %v11348_v40  ;;  %v12780_v58 = vld [vmem:[#allocation19_spill] sm:$0xff] }
 0x5c5   :  { %v5798_v30 = vadd.f32 %v8744_v6, %v11348_v40  ;;  %v5860_v18 = vadd.f32 %v5859_v29, %v5797_v35  ;;  %v8359_v8 = vpop.f32.mrb[56].mxu1 }
 0x5c6   :  { %v8745_v61 = vadd.f32 %v8359_v8, %v12776_v10  ;;  %v5634_v62 = vpop.f32.mrb[57].mxu1 }
 0x5c7   :  { %v5861_v31 = vadd.f32 %v5860_v18, %v5798_v30  ;;  %v8746_v21 = vadd.f32 %v5634_v62, %v12777_v1 }
 0x5c8   :  { %v5801_v57 = vadd.f32 %v8745_v61, %v11348_v40  ;;  %v12782_v61 = vld [vmem:[#allocation26_spill] sm:$0xff] }
 0x5c9   :  { %v5800_v7 = vadd.f32 %v8746_v21, %v11348_v40  ;;  %v5862_v3 = vadd.f32 %v5861_v31, %v5799_v12  ;;  %v8362_v28 = vpop.f32.mrb[58].mxu1  ;;  %v12781_v31 = vld [vmem:[#allocation35_spill] sm:$0xff] }
 0x5ca   :  { %v8747_v53 = vadd.f32 %v8362_v28, %v12778_v49  ;;  %v5644_v25 = vpop.f32.mrb[59].mxu1 }
 0x5cb   :  { %v5863_v6 = vadd.f32 %v5862_v3, %v5800_v7  ;;  %v8748_v29 = vadd.f32 %v5644_v25, %v12779_v59 }
 0x5cc   :  { %v5803_v62 = vadd.f32 %v8747_v53, %v11348_v40 }
 0x5cd   :  { %v5802_v10 = vadd.f32 %v8748_v29, %v11348_v40  ;;  %v5864_v8 = vadd.f32 %v5863_v6, %v5801_v57  ;;  %v8365_v24 = vpop.f32.mrb[60].mxu1  ;;  %v12783_v6 = vld [vmem:[#allocation25_spill] sm:$0xff] }
 0x5ce   :  { %v8749_v18 = vadd.f32 %v8365_v24, %v12780_v58  ;;  %v5654_v15 = vpop.f32.mrb[61].mxu1 }
 0x5cf   :  { %v5865_v1 = vadd.f32 %v5864_v8, %v5802_v10  ;;  %v8750_v21 = vadd.f32 %v5654_v15, %v12781_v31 }
 0x5d0   :  { %v5805_v25 = vadd.f32 %v8749_v18, %v11348_v40 }
 0x5d1   :  { %v5804_v28 = vadd.f32 %v8750_v21, %v11348_v40  ;;  %v5866_v49 = vadd.f32 %v5865_v1, %v5803_v62  ;;  %v8368_v63 = vpop.f32.mrb[62].mxu1 }
 0x5d2   :  { %v8751_v3 = vadd.f32 %v8368_v63, %v12782_v61  ;;  %v5664_v17 = vpop.f32.mrb[63].mxu1 }
 0x5d3   :  { %v5867_v59 = vadd.f32 %v5866_v49, %v5804_v28  ;;  %v8752_v29 = vadd.f32 %v5664_v17, %v12783_v6 }
 0x5d4   :  { %v5807_v53 = vadd.f32 %v8751_v3, %v11348_v40 }
 0x5d5   :  { %v5806_v24 = vadd.f32 %v8752_v29, %v11348_v40  ;;  %v5868_v58 = vadd.f32 %v5867_v59, %v5805_v25 }
 0x5d7   :  { %v5869_v8 = vadd.f32 %v5868_v58, %v5806_v24 }
 0x5d9   :  { %v5870_v55 = vadd.f32 %v5869_v8, %v5807_v53 }
 0x5db   :  { %v5871_v15 = vrot.slane %v5870_v55, 4 }
 0x5dd   :  { %v5872_v31 = vadd.f32 %v5871_v15, %v5870_v55 }
 0x5df   :  { %v5873_v21 = vrot.slane %v5872_v31, 2 }
 0x5e1   :  { %v5874_v1 = vadd.f32 %v5873_v21, %v5872_v31 }
 0x5e3   :  { %v5875_v13 = vrot.slane %v5874_v1, 1 }
 0x5e5   :  { %v5876_v16 = vadd.f32 %v5875_v13, %v5874_v1 }
 0x5e7   :  { %v11630_v63 = vmul.f32 0.001953125, %v5876_v16 }
 0x5e9   :  { %v11634_v18 = vsub.f32 %v11576_v39, %v11630_v63  ;;  %v11638_v17 = vsub.f32 %v11581_v52, %v11630_v63  ;;  %v11642_v40 = vsub.f32 %v11586_v56, %v11630_v63  ;;  %v11646_v55 = vsub.f32 %v11591_v47, %v11630_v63 }
 0x5ea   :  { %v11650_v16 = vsub.f32 %v11596_v14, %v11630_v63  ;;  %v11654_v13 = vsub.f32 %v11601_v60, %v11630_v63  ;;  %v11657_v39 = vsub.f32 %v5795_v54, %v11630_v63  ;;  %v11660_v52 = vsub.f32 %v5796_v4, %v11630_v63 }
 0x5eb   :  { %v11663_v56 = vsub.f32 %v5797_v35, %v11630_v63  ;;  %v11666_v47 = vsub.f32 %v5798_v30, %v11630_v63  ;;  %v11669_v49 = vsub.f32 %v5799_v12, %v11630_v63  ;;  %v11672_v14 = vsub.f32 %v5800_v7, %v11630_v63 }
 0x5ec   :  { %v11675_v60 = vsub.f32 %v5801_v57, %v11630_v63  ;;  %v11678_v54 = vsub.f32 %v5802_v10, %v11630_v63  ;;  %v11681_v4 = vsub.f32 %v5803_v62, %v11630_v63  ;;  %v11684_v35 = vsub.f32 %v5804_v28, %v11630_v63  ;;  %v12789_v57 = vld [vmem:[#allocation27_spill] sm:$0xff]  ;;  %v12790_v10 = vld [vmem:[#allocation28_spill] sm:$0xff] }
 0x5ed   :  { %v11687_v30 = vsub.f32 %v5805_v25, %v11630_v63  ;;  %v11690_v12 = vsub.f32 %v5806_v24, %v11630_v63  ;;  %v11693_v7 = vsub.f32 %v5807_v53, %v11630_v63  ;;  %v11697_v61 = vsub.f32 %v12789_v57, %v11630_v63 }
 0x5ee   :  { %12784 = vst [vmem:[#allocation43_spill] sm:$0xff] %v11675_v60  ;;  %12785 = vst [vmem:[#allocation46_spill] sm:$0xff] %v11678_v54  ;;  %v11701_v62 = vsub.f32 %v12790_v10, %v11630_v63  ;;  %v11705_v28 = vsub.f32 %v11362_v23, %v11630_v63  ;;  %v11713_v59 = vsub.f32 %v11366_v19, %v11630_v63 }
 0x5ef   :  { %12786 = vst [vmem:[#allocation45_spill] sm:$0xff] %v11681_v4  ;;  %12787 = vst [vmem:[#allocation48_spill] sm:$0xff] %v11684_v35  ;;  %v5942_v3 = vmul.f32 %v11697_v61, %v11697_v61  ;;  %v11717_v6 = vsub.f32 %v11372_v26, %v11630_v63  ;;  %v11723_v23 = vsub.f32 %v11376_v45, %v11630_v63 }
 0x5f0   :  { %12788 = vst [vmem:[#allocation47_spill] sm:$0xff] %v11687_v30  ;;  %v5943_v25 = vmul.f32 %v11701_v62, %v11701_v62  ;;  %v5944_v29 = vmul.f32 %v11705_v28, %v11705_v28  ;;  %v5945_v58 = vmul.f32 %v11713_v59, %v11713_v59  ;;  %v11729_v19 = vsub.f32 %v11381_v46, %v11630_v63 }
 0x5f1   :  { %v5946_v26 = vmul.f32 %v11717_v6, %v11717_v6  ;;  %v11735_v15 = vsub.f32 %v11386_v22, %v11630_v63  ;;  %v5947_v45 = vmul.f32 %v11723_v23, %v11723_v23  ;;  %v11741_v21 = vsub.f32 %v11391_v32, %v11630_v63 }
 0x5f2   :  { %v6006_v24 = vadd.f32 %v5943_v25, %v5942_v3  ;;  %v5948_v46 = vmul.f32 %v11729_v19, %v11729_v19  ;;  %v11747_v57 = vsub.f32 %v11396_v33, %v11630_v63  ;;  %v11753_v3 = vsub.f32 %v11401_v37, %v11630_v63 }
 0x5f3   :  { %v5949_v22 = vmul.f32 %v11735_v15, %v11735_v15  ;;  %v5950_v32 = vmul.f32 %v11741_v21, %v11741_v21 }
 0x5f4   :  { %v6007_v53 = vadd.f32 %v6006_v24, %v5944_v29  ;;  %v11759_v29 = vsub.f32 %v11406_v44, %v11630_v63  ;;  %v5951_v33 = vmul.f32 %v11747_v57, %v11747_v57  ;;  %v5952_v37 = vmul.f32 %v11753_v3, %v11753_v3 }
 0x5f6   :  { %v6008_v8 = vadd.f32 %v6007_v53, %v5945_v58  ;;  %v11765_v58 = vsub.f32 %v11411_v41, %v11630_v63  ;;  %v5953_v44 = vmul.f32 %v11759_v29, %v11759_v29 }
 0x5f8   :  { %v6009_v31 = vadd.f32 %v6008_v8, %v5946_v26  ;;  %v11771_v26 = vsub.f32 %v11416_v27, %v11630_v63  ;;  %v5954_v41 = vmul.f32 %v11765_v58, %v11765_v58 }
 0x5fa   :  { %v6010_v1 = vadd.f32 %v6009_v31, %v5947_v45  ;;  %v11777_v45 = vsub.f32 %v11421_v2, %v11630_v63  ;;  %v5955_v27 = vmul.f32 %v11771_v26, %v11771_v26 }
 0x5fc   :  { %v6011_v10 = vadd.f32 %v6010_v1, %v5948_v46  ;;  %v11783_v46 = vsub.f32 %v11426_v9, %v11630_v63  ;;  %v5956_v2 = vmul.f32 %v11777_v45, %v11777_v45 }
 0x5fe   :  { %v6012_v25 = vadd.f32 %v6011_v10, %v5949_v22  ;;  %v11789_v22 = vsub.f32 %v11431_v5, %v11630_v63  ;;  %v5957_v9 = vmul.f32 %v11783_v46, %v11783_v46 }
 0x600   :  { %v6013_v24 = vadd.f32 %v6012_v25, %v5950_v32  ;;  %v11795_v32 = vsub.f32 %v11436_v36, %v11630_v63  ;;  %v5958_v5 = vmul.f32 %v11789_v22, %v11789_v22 }
 0x602   :  { %v6014_v53 = vadd.f32 %v6013_v24, %v5951_v33  ;;  %v11801_v33 = vsub.f32 %v11441_v34, %v11630_v63  ;;  %v5959_v36 = vmul.f32 %v11795_v32, %v11795_v32 }
 0x604   :  { %v6015_v8 = vadd.f32 %v6014_v53, %v5952_v37  ;;  %v11807_v37 = vsub.f32 %v11446_v50, %v11630_v63  ;;  %v5960_v34 = vmul.f32 %v11801_v33, %v11801_v33 }
 0x606   :  { %v6016_v31 = vadd.f32 %v6015_v8, %v5953_v44  ;;  %v11813_v44 = vsub.f32 %v11451_v11, %v11630_v63  ;;  %v5961_v50 = vmul.f32 %v11807_v37, %v11807_v37 }
 0x608   :  { %v6017_v1 = vadd.f32 %v6016_v31, %v5954_v41  ;;  %v11819_v41 = vsub.f32 %v11456_v48, %v11630_v63  ;;  %v5962_v11 = vmul.f32 %v11813_v44, %v11813_v44 }
 0x60a   :  { %v6018_v10 = vadd.f32 %v6017_v1, %v5955_v27  ;;  %v11825_v27 = vsub.f32 %v11461_v42, %v11630_v63  ;;  %v5963_v48 = vmul.f32 %v11819_v41, %v11819_v41 }
 0x60c   :  { %v6019_v25 = vadd.f32 %v6018_v10, %v5956_v2  ;;  %v11831_v2 = vsub.f32 %v11466_v20, %v11630_v63  ;;  %v5964_v42 = vmul.f32 %v11825_v27, %v11825_v27 }
 0x60e   :  { %v6020_v24 = vadd.f32 %v6019_v25, %v5957_v9  ;;  %v11837_v9 = vsub.f32 %v11471_v0, %v11630_v63  ;;  %v5965_v20 = vmul.f32 %v11831_v2, %v11831_v2 }
 0x610   :  { %v6021_v53 = vadd.f32 %v6020_v24, %v5958_v5  ;;  %v11843_v5 = vsub.f32 %v11476_v43, %v11630_v63  ;;  %v5966_v0 = vmul.f32 %v11837_v9, %v11837_v9 }
 0x612   :  { %v6022_v8 = vadd.f32 %v6021_v53, %v5959_v36  ;;  %v11849_v36 = vsub.f32 %v11481_v38, %v11630_v63  ;;  %v5967_v43 = vmul.f32 %v11843_v5, %v11843_v5 }
 0x614   :  { %v6023_v31 = vadd.f32 %v6022_v8, %v5960_v34  ;;  %v11855_v34 = vsub.f32 %v11486_v51, %v11630_v63  ;;  %v5968_v38 = vmul.f32 %v11849_v36, %v11849_v36 }
 0x616   :  { %v6024_v1 = vadd.f32 %v6023_v31, %v5961_v50  ;;  %v12791_v50 = vld [vmem:[#allocation30_spill] sm:$0xff]  ;;  %v5969_v51 = vmul.f32 %v11855_v34, %v11855_v34 }
 0x617   :  { %v11861_v31 = vsub.f32 %v12791_v50, %v11630_v63  ;;  %v12799_v50 = vld [vmem:[#allocation16_spill] sm:$0xff] }
 0x618   :  { %v6025_v10 = vadd.f32 %v6024_v1, %v5962_v11  ;;  %v12793_v1 = vld [vmem:[#allocation29_spill] sm:$0xff] }
 0x619   :  { %12792 = vst [vmem:[#allocation50_spill] sm:$0xff] %v11861_v31 }
 0x61a   :  { %v6026_v25 = vadd.f32 %v6025_v10, %v5963_v48  ;;  %v11867_v48 = vsub.f32 %v12793_v1, %v11630_v63  ;;  %v11885_v1 = vsub.f32 %v12799_v50, %v11630_v63  ;;  %v12805_v50 = vld [vmem:[#allocation14_spill] sm:$0xff] }
 0x61c   :  { %v6027_v24 = vadd.f32 %v6026_v25, %v5964_v42  ;;  %12794 = vst [vmem:[#allocation49_spill] sm:$0xff] %v11867_v48  ;;  %v12795_v42 = vld [vmem:[#allocation13_spill] sm:$0xff]  ;;  %12800 = vst [vmem:[#allocation54_spill] sm:$0xff] %v11885_v1 }
 0x61d   :  { %v11873_v25 = vsub.f32 %v12795_v42, %v11630_v63  ;;  %v12801_v42 = vld [vmem:[#allocation32_spill] sm:$0xff] }
 0x61e   :  { %v6028_v53 = vadd.f32 %v6027_v24, %v5965_v20  ;;  %v5970_v20 = vmul.f32 %v11861_v31, %v11861_v31  ;;  %v11891_v31 = vsub.f32 %v12801_v42, %v11630_v63  ;;  %v12807_v42 = vld [vmem:[#allocation20_spill] sm:$0xff] }
 0x61f   :  { %12796 = vst [vmem:[#allocation52_spill] sm:$0xff] %v11873_v25 }
 0x620   :  { %v6029_v8 = vadd.f32 %v6028_v53, %v5966_v0  ;;  %v12797_v0 = vld [vmem:[#allocation31_spill] sm:$0xff]  ;;  %12802 = vst [vmem:[#allocation53_spill] sm:$0xff] %v11891_v31 }
 0x621   :  { %v11879_v53 = vsub.f32 %v12797_v0, %v11630_v63  ;;  %v12803_v0 = vld [vmem:[#allocation18_spill] sm:$0xff] }
 0x622   :  { %v6030_v11 = vadd.f32 %v6029_v8, %v5967_v43  ;;  %v5971_v43 = vmul.f32 %v11867_v48, %v11867_v48  ;;  %v11897_v48 = vsub.f32 %v12803_v0, %v11630_v63  ;;  %v12809_v0 = vld [vmem:[#allocation17_spill] sm:$0xff] }
 0x623   :  { %12798 = vst [vmem:[#allocation51_spill] sm:$0xff] %v11879_v53 }
 0x624   :  { %v6031_v10 = vadd.f32 %v6030_v11, %v5968_v38  ;;  %v5972_v38 = vmul.f32 %v11873_v25, %v11873_v25  ;;  %12804 = vst [vmem:[#allocation56_spill] sm:$0xff] %v11897_v48  ;;  %v11903_v25 = vsub.f32 %v12805_v50, %v11630_v63  ;;  %v12811_v50 = vld [vmem:[#allocation38_spill] sm:$0xff] }
 0x626   :  { %v6032_v24 = vadd.f32 %v6031_v10, %v5969_v51  ;;  %v5973_v51 = vmul.f32 %v11879_v53, %v11879_v53  ;;  %12806 = vst [vmem:[#allocation55_spill] sm:$0xff] %v11903_v25  ;;  %v11909_v53 = vsub.f32 %v12807_v42, %v11630_v63  ;;  %v12813_v42 = vld [vmem:[#allocation37_spill] sm:$0xff] }
 0x628   :  { %v6033_v8 = vadd.f32 %v6032_v24, %v5970_v20  ;;  %v5974_v20 = vmul.f32 %v11885_v1, %v11885_v1  ;;  %12808 = vst [vmem:[#allocation58_spill] sm:$0xff] %v11909_v53  ;;  %v11915_v1 = vsub.f32 %v12809_v0, %v11630_v63  ;;  %v12815_v0 = vld [vmem:[#allocation40_spill] sm:$0xff] }
 0x62a   :  { %v6034_v11 = vadd.f32 %v6033_v8, %v5971_v43  ;;  %v5975_v43 = vmul.f32 %v11891_v31, %v11891_v31  ;;  %12810 = vst [vmem:[#allocation57_spill] sm:$0xff] %v11915_v1  ;;  %v11921_v31 = vsub.f32 %v12811_v50, %v11630_v63  ;;  %v12816_v50 = vld [vmem:[#allocation39_spill] sm:$0xff] }
 0x62c   :  { %v6035_v10 = vadd.f32 %v6034_v11, %v5972_v38  ;;  %v5976_v38 = vmul.f32 %v11897_v48, %v11897_v48  ;;  %12812 = vst [vmem:[#allocation60_spill] sm:$0xff] %v11921_v31  ;;  %v11927_v48 = vsub.f32 %v12813_v42, %v11630_v63  ;;  %v12818_v42 = vld [vmem:[#allocation42_spill] sm:$0xff] }
 0x62e   :  { %v6036_v24 = vadd.f32 %v6035_v10, %v5973_v51  ;;  %v5977_v51 = vmul.f32 %v11903_v25, %v11903_v25  ;;  %12814 = vst [vmem:[#allocation59_spill] sm:$0xff] %v11927_v48  ;;  %v11933_v25 = vsub.f32 %v12815_v0, %v11630_v63  ;;  %v12819_v0 = vld [vmem:[#allocation41_spill] sm:$0xff] }
 0x630   :  { %v6037_v8 = vadd.f32 %v6036_v24, %v5974_v20  ;;  %v5978_v20 = vmul.f32 %v11909_v53, %v11909_v53  ;;  %v11939_v53 = vsub.f32 %v12816_v50, %v11630_v63  ;;  %v12820_v50 = vld [vmem:[#allocation44_spill] sm:$0xff] }
 0x632   :  { %v6038_v11 = vadd.f32 %v6037_v8, %v5975_v43  ;;  %v5979_v43 = vmul.f32 %v11915_v1, %v11915_v1  ;;  %12817 = vst [vmem:[#allocation62_spill] sm:$0xff] %v11939_v53  ;;  %v11945_v1 = vsub.f32 %v12818_v42, %v11630_v63 }
 0x634   :  { %v6039_v10 = vadd.f32 %v6038_v11, %v5976_v38  ;;  %v5980_v38 = vmul.f32 %v11921_v31, %v11921_v31  ;;  %v11951_v31 = vsub.f32 %v12819_v0, %v11630_v63 }
 0x636   :  { %v6040_v24 = vadd.f32 %v6039_v10, %v5977_v51  ;;  %v5981_v51 = vmul.f32 %v11927_v48, %v11927_v48  ;;  %v11957_v48 = vsub.f32 %v12820_v50, %v11630_v63  ;;  %v5985_v42 = vmul.f32 %v11951_v31, %v11951_v31 }
 0x637   :  { %v5988_v63 = vmul.f32 %v11638_v17, %v11638_v17  ;;  %v5989_v50 = vmul.f32 %v11642_v40, %v11642_v40 }
 0x638   :  { %v6041_v8 = vadd.f32 %v6040_v24, %v5978_v20  ;;  %v5982_v20 = vmul.f32 %v11933_v25, %v11933_v25 }
 0x63a   :  { %v6042_v11 = vadd.f32 %v6041_v8, %v5979_v43  ;;  %v5983_v43 = vmul.f32 %v11939_v53, %v11939_v53  ;;  %v5987_v53 = vmul.f32 %v11634_v18, %v11634_v18 }
 0x63c   :  { %v6043_v10 = vadd.f32 %v6042_v11, %v5980_v38  ;;  %v5984_v38 = vmul.f32 %v11945_v1, %v11945_v1 }
 0x63e   :  { %v6044_v24 = vadd.f32 %v6043_v10, %v5981_v51  ;;  %v5986_v10 = vmul.f32 %v11957_v48, %v11957_v48 }
 0x640   :  { %v6045_v8 = vadd.f32 %v6044_v24, %v5982_v20 }
 0x642   :  { %v6046_v11 = vadd.f32 %v6045_v8, %v5983_v43  ;;  %v5990_v8 = vmul.f32 %v11646_v55, %v11646_v55 }
 0x644   :  { %v6047_v51 = vadd.f32 %v6046_v11, %v5984_v38  ;;  %v5991_v11 = vmul.f32 %v11650_v16, %v11650_v16 }
 0x646   :  { %v6048_v0 = vadd.f32 %v6047_v51, %v5985_v42  ;;  %v5992_v51 = vmul.f32 %v11654_v13, %v11654_v13 }
 0x648   :  { %v6049_v20 = vadd.f32 %v6048_v0, %v5986_v10  ;;  %v5993_v0 = vmul.f32 %v11657_v39, %v11657_v39 }
 0x64a   :  { %v6050_v24 = vadd.f32 %v6049_v20, %v5987_v53  ;;  %v5994_v20 = vmul.f32 %v11660_v52, %v11660_v52 }
 0x64c   :  { %v6051_v43 = vadd.f32 %v6050_v24, %v5988_v63  ;;  %v5995_v24 = vmul.f32 %v11663_v56, %v11663_v56 }
 0x64e   :  { %v6052_v38 = vadd.f32 %v6051_v43, %v5989_v50  ;;  %v5996_v43 = vmul.f32 %v11666_v47, %v11666_v47 }
 0x650   :  { %v6053_v42 = vadd.f32 %v6052_v38, %v5990_v8  ;;  %v5997_v38 = vmul.f32 %v11669_v49, %v11669_v49 }
 0x652   :  { %v6054_v10 = vadd.f32 %v6053_v42, %v5991_v11  ;;  %v5998_v42 = vmul.f32 %v11672_v14, %v11672_v14 }
 0x654   :  { %v6055_v53 = vadd.f32 %v6054_v10, %v5992_v51  ;;  %v5999_v10 = vmul.f32 %v11675_v60, %v11675_v60 }
 0x656   :  { %v6056_v63 = vadd.f32 %v6055_v53, %v5993_v0  ;;  %v6000_v53 = vmul.f32 %v11678_v54, %v11678_v54 }
 0x658   :  { %v6057_v50 = vadd.f32 %v6056_v63, %v5994_v20  ;;  %v6001_v63 = vmul.f32 %v11681_v4, %v11681_v4 }
 0x65a   :  { %v6058_v8 = vadd.f32 %v6057_v50, %v5995_v24  ;;  %v6002_v50 = vmul.f32 %v11684_v35, %v11684_v35 }
 0x65c   :  { %v6059_v11 = vadd.f32 %v6058_v8, %v5996_v43  ;;  %v6003_v8 = vmul.f32 %v11687_v30, %v11687_v30 }
 0x65e   :  { %v6060_v51 = vadd.f32 %v6059_v11, %v5997_v38  ;;  %v6004_v11 = vmul.f32 %v11690_v12, %v11690_v12 }
 0x660   :  { %v6061_v0 = vadd.f32 %v6060_v51, %v5998_v42  ;;  %v6005_v51 = vmul.f32 %v11693_v7, %v11693_v7 }
 0x662   :  { %v6062_v20 = vadd.f32 %v6061_v0, %v5999_v10 }
 0x664   :  { %v6063_v24 = vadd.f32 %v6062_v20, %v6000_v53 }
 0x666   :  { %v6064_v43 = vadd.f32 %v6063_v24, %v6001_v63 }
 0x668   :  { %v6065_v38 = vadd.f32 %v6064_v43, %v6002_v50 }
 0x66a   :  { %v6066_v42 = vadd.f32 %v6065_v38, %v6003_v8  ;;  %v12822_v38 = vld [vmem:[#allocation49_spill] sm:$0xff] }
 0x66c   :  { %v6067_v10 = vadd.f32 %v6066_v42, %v6004_v11  ;;  %v12823_v11 = vld [vmem:[#allocation52_spill] sm:$0xff]  ;;  %v12824_v42 = vld [vmem:[#allocation51_spill] sm:$0xff] }
 0x66e   :  { %v6068_v0 = vadd.f32 %v6067_v10, %v6005_v51  ;;  %v12825_v51 = vld [vmem:[#allocation54_spill] sm:$0xff]  ;;  %v12826_v10 = vld [vmem:[#allocation53_spill] sm:$0xff] }
 0x670   :  { %v6069_v54 = vrot.slane %v6068_v0, 4 }
 0x672   :  { %v6070_v4 = vadd.f32 %v6069_v54, %v6068_v0 }
 0x674   :  { %v6071_v53 = vrot.slane %v6070_v4, 2 }
 0x676   :  { %v6072_v20 = vadd.f32 %v6071_v53, %v6070_v4  ;;  %v12827_v53 = vld [vmem:[#allocation56_spill] sm:$0xff] }
 0x678   :  { %v6073_v60 = vrot.slane %v6072_v20, 1 }
 0x67a   :  { %v6074_v35 = vadd.f32 %v6073_v60, %v6072_v20 }
 0x67c   :  { %v6075_v63 = vmul.f32 0.001953125, %v6074_v35 }
 0x67e   :  { %v6076_v24 = vadd.f32 1e-05, %v6075_v63  ;;  %v12828_v63 = vld [vmem:[#allocation55_spill] sm:$0xff] }
 0x680   :  { %9210 = vrsqrt.f32 %v6076_v24 }
 0x68a   :  { %v12003_v30 = vpop.eup %9210 }
 0x68b   :  { %v6140_v50 = vmul.f32 %v12003_v30, %v11690_v12  ;;  %v12009_v43 = vmul.f32 %v12003_v30, %v11697_v61  ;;  %v12013_v8 = vmul.f32 %v12003_v30, %v11701_v62  ;;  %v12017_v54 = vmul.f32 %v12003_v30, %v11705_v28 }
 0x68c   :  { %v12021_v60 = vmul.f32 %v12003_v30, %v11713_v59  ;;  %v12025_v4 = vmul.f32 %v12003_v30, %v11717_v6  ;;  %v12029_v35 = vmul.f32 %v12003_v30, %v11723_v23  ;;  %v12033_v12 = vmul.f32 %v12003_v30, %v11729_v19 }
 0x68d   :  { %v6204_v61 = vmax.f32 %v6140_v50, 0.0  ;;  %v12037_v62 = vmul.f32 %v12003_v30, %v11735_v15  ;;  %v12041_v28 = vmul.f32 %v12003_v30, %v11741_v21  ;;  %v12045_v59 = vmul.f32 %v12003_v30, %v11747_v57  ;;  %v12829_v50 = vld [vmem:[#allocation58_spill] sm:$0xff] }
 0x68e   :  { %v12049_v6 = vmul.f32 %v12003_v30, %v11753_v3  ;;  %v12053_v23 = vmul.f32 %v12003_v30, %v11759_v29  ;;  %v12057_v19 = vmul.f32 %v12003_v30, %v11765_v58  ;;  %v12061_v15 = vmul.f32 %v12003_v30, %v11771_v26 }
 0x68f   :  { %6268 = vst [vmem:[#allocation9 + $0x1f0] sm:$0xff] %v6204_v61  ;;  %v12065_v21 = vmul.f32 %v12003_v30, %v11777_v45  ;;  %v12069_v57 = vmul.f32 %v12003_v30, %v11783_v46  ;;  %v12073_v3 = vmul.f32 %v12003_v30, %v11789_v22  ;;  %v12077_v29 = vmul.f32 %v12003_v30, %v11795_v32 }
 0x690   :  { %v12081_v58 = vmul.f32 %v12003_v30, %v11801_v33  ;;  %v12085_v26 = vmul.f32 %v12003_v30, %v11807_v37  ;;  %v12089_v45 = vmul.f32 %v12003_v30, %v11813_v44  ;;  %v12093_v46 = vmul.f32 %v12003_v30, %v11819_v41 }
 0x691   :  { %v12097_v22 = vmul.f32 %v12003_v30, %v11825_v27  ;;  %v12101_v32 = vmul.f32 %v12003_v30, %v11831_v2  ;;  %v12105_v33 = vmul.f32 %v12003_v30, %v11837_v9  ;;  %v12109_v37 = vmul.f32 %v12003_v30, %v11843_v5  ;;  %v12821_v27 = vld [vmem:[#allocation50_spill] sm:$0xff] }
 0x692   :  { %v12113_v44 = vmul.f32 %v12003_v30, %v11849_v36  ;;  %v12117_v41 = vmul.f32 %v12003_v30, %v11855_v34  ;;  %v12121_v2 = vmul.f32 %v12003_v30, %v12821_v27  ;;  %v12125_v9 = vmul.f32 %v12003_v30, %v12822_v38  ;;  %v12830_v27 = vld [vmem:[#allocation57_spill] sm:$0xff] }
 0x693   :  { %v12129_v5 = vmul.f32 %v12003_v30, %v12823_v11  ;;  %v12133_v36 = vmul.f32 %v12003_v30, %v12824_v42  ;;  %v12137_v34 = vmul.f32 %v12003_v30, %v12825_v51  ;;  %v12141_v0 = vmul.f32 %v12003_v30, %v12826_v10  ;;  %v12831_v11 = vld [vmem:[#allocation60_spill] sm:$0xff]  ;;  %v12832_v51 = vld [vmem:[#allocation59_spill] sm:$0xff] }
 0x694   :  { %v12145_v20 = vmul.f32 %v12003_v30, %v12827_v53  ;;  %v12149_v24 = vmul.f32 %v12003_v30, %v12828_v63  ;;  %v12153_v61 = vmul.f32 %v12003_v30, %v12829_v50  ;;  %v12157_v38 = vmul.f32 %v12003_v30, %v12830_v27  ;;  %v12833_v63 = vld [vmem:[#allocation62_spill] sm:$0xff] }
 0x695   :  { %v12161_v42 = vmul.f32 %v12003_v30, %v12831_v11  ;;  %v12165_v10 = vmul.f32 %v12003_v30, %v12832_v51  ;;  %v12169_v53 = vmul.f32 %v12003_v30, %v11933_v25  ;;  %v12173_v50 = vmul.f32 %v12003_v30, %v12833_v63 }
 0x696   :  { %v12177_v27 = vmul.f32 %v12003_v30, %v11945_v1  ;;  %v12181_v11 = vmul.f32 %v12003_v30, %v11951_v31  ;;  %v12185_v51 = vmul.f32 %v12003_v30, %v11957_v48  ;;  %v12189_v25 = vmul.f32 %v12003_v30, %v11634_v18 }
 0x697   :  { %v12193_v63 = vmul.f32 %v12003_v30, %v11638_v17  ;;  %v12197_v1 = vmul.f32 %v12003_v30, %v11642_v40  ;;  %v12201_v31 = vmul.f32 %v12003_v30, %v11646_v55  ;;  %v12205_v48 = vmul.f32 %v12003_v30, %v11650_v16 }
 0x698   :  { %v12209_v18 = vmul.f32 %v12003_v30, %v11654_v13  ;;  %v12213_v17 = vmul.f32 %v12003_v30, %v11657_v39  ;;  %v12217_v40 = vmul.f32 %v12003_v30, %v11660_v52  ;;  %v12221_v55 = vmul.f32 %v12003_v30, %v11663_v56 }
 0x699   :  { %v12225_v16 = vmul.f32 %v12003_v30, %v11666_v47  ;;  %v12229_v13 = vmul.f32 %v12003_v30, %v11669_v49  ;;  %v12233_v39 = vmul.f32 %v12003_v30, %v11672_v14 }
 0x69a   :  { %12834 = vst [vmem:[#allocation61_spill] sm:$0xff] %v12213_v17  ;;  %12835 = vst [vmem:[#allocation64_spill] sm:$0xff] %v12217_v40  ;;  %v12839_v17 = vld [vmem:[#allocation43_spill] sm:$0xff]  ;;  %v12841_v40 = vld [vmem:[#allocation46_spill] sm:$0xff] }
 0x69b   :  { %12836 = vst [vmem:[#allocation63_spill] sm:$0xff] %v12221_v55  ;;  %12837 = vst [vmem:[#allocation66_spill] sm:$0xff] %v12225_v16  ;;  %v12237_v52 = vmul.f32 %v12003_v30, %v12839_v17  ;;  %v12241_v56 = vmul.f32 %v12003_v30, %v12841_v40  ;;  %v12843_v55 = vld [vmem:[#allocation45_spill] sm:$0xff]  ;;  %v12845_v16 = vld [vmem:[#allocation48_spill] sm:$0xff]  ;;  %v12257_v17 = vmul.f32 %v12003_v30, %v11693_v7  ;;  %v6143_v40 = vmax.f32 %v12013_v8, 0.0 }
 0x69c   :  { %12838 = vst [vmem:[#allocation65_spill] sm:$0xff] %v12229_v13  ;;  %v12245_v47 = vmul.f32 %v12003_v30, %v12843_v55  ;;  %v12249_v49 = vmul.f32 %v12003_v30, %v12845_v16  ;;  %v12847_v13 = vld [vmem:[#allocation47_spill] sm:$0xff]  ;;  %v6145_v55 = vmax.f32 %v12021_v60, 0.0  ;;  %v6147_v16 = vmax.f32 %v12029_v35, 0.0 }
 0x69d   :  { %12840 = vst [vmem:[#allocation68_spill] sm:$0xff] %v12237_v52  ;;  %12842 = vst [vmem:[#allocation67_spill] sm:$0xff] %v12241_v56  ;;  %v12253_v14 = vmul.f32 %v12003_v30, %v12847_v13  ;;  %v6142_v52 = vmax.f32 %v12009_v43, 0.0  ;;  %v6144_v56 = vmax.f32 %v12017_v54, 0.0  ;;  %v6149_v13 = vmax.f32 %v12037_v62, 0.0 }
 0x69e   :  { %12844 = vst [vmem:[#allocation70_spill] sm:$0xff] %v12245_v47  ;;  %12846 = vst [vmem:[#allocation69_spill] sm:$0xff] %v12249_v49  ;;  %v6146_v47 = vmax.f32 %v12025_v4, 0.0  ;;  %v6148_v49 = vmax.f32 %v12033_v12, 0.0  ;;  %v6151_v30 = vmax.f32 %v12045_v59, 0.0  ;;  %v6152_v7 = vmax.f32 %v12049_v6, 0.0 }
 0x69f   :  { %12848 = vst [vmem:[#allocation72_spill] sm:$0xff] %v12253_v14  ;;  %v6150_v14 = vmax.f32 %v12041_v28, 0.0  ;;  %6206 = vst [vmem:[#allocation9] sm:$0xff] %v6142_v52  ;;  %v6153_v43 = vmax.f32 %v12053_v23, 0.0  ;;  %v6154_v8 = vmax.f32 %v12057_v19, 0.0  ;;  %v6155_v54 = vmax.f32 %v12061_v15, 0.0 }
 0x6a0   :  { %6207 = vst [vmem:[#allocation9 + $0x8] sm:$0xff] %v6143_v40  ;;  %6208 = vst [vmem:[#allocation9 + $0x10] sm:$0xff] %v6144_v56  ;;  %v6156_v60 = vmax.f32 %v12065_v21, 0.0  ;;  %v6157_v4 = vmax.f32 %v12069_v57, 0.0  ;;  %v6158_v35 = vmax.f32 %v12073_v3, 0.0  ;;  %v6159_v12 = vmax.f32 %v12077_v29, 0.0 }
 0x6a1   :  { %6209 = vst [vmem:[#allocation9 + $0x18] sm:$0xff] %v6145_v55  ;;  %6210 = vst [vmem:[#allocation9 + $0x20] sm:$0xff] %v6146_v47  ;;  %v6160_v62 = vmax.f32 %v12081_v58, 0.0  ;;  %v6161_v28 = vmax.f32 %v12085_v26, 0.0  ;;  %v6162_v59 = vmax.f32 %v12089_v45, 0.0  ;;  %v6163_v6 = vmax.f32 %v12093_v46, 0.0 }
 0x6a2   :  { %6211 = vst [vmem:[#allocation9 + $0x28] sm:$0xff] %v6147_v16  ;;  %6212 = vst [vmem:[#allocation9 + $0x30] sm:$0xff] %v6148_v49  ;;  %v6164_v23 = vmax.f32 %v12097_v22, 0.0  ;;  %v6165_v19 = vmax.f32 %v12101_v32, 0.0  ;;  %v6166_v15 = vmax.f32 %v12105_v33, 0.0  ;;  %v6167_v21 = vmax.f32 %v12109_v37, 0.0 }
 0x6a3   :  { %6213 = vst [vmem:[#allocation9 + $0x38] sm:$0xff] %v6149_v13  ;;  %6214 = vst [vmem:[#allocation9 + $0x40] sm:$0xff] %v6150_v14  ;;  %v6168_v57 = vmax.f32 %v12113_v44, 0.0  ;;  %v6169_v3 = vmax.f32 %v12117_v41, 0.0  ;;  %v6170_v29 = vmax.f32 %v12121_v2, 0.0  ;;  %v6171_v58 = vmax.f32 %v12125_v9, 0.0 }
 0x6a4   :  { %6215 = vst [vmem:[#allocation9 + $0x48] sm:$0xff] %v6151_v30  ;;  %6216 = vst [vmem:[#allocation9 + $0x50] sm:$0xff] %v6152_v7  ;;  %v6172_v26 = vmax.f32 %v12129_v5, 0.0  ;;  %v6173_v45 = vmax.f32 %v12133_v36, 0.0  ;;  %v6174_v46 = vmax.f32 %v12137_v34, 0.0  ;;  %v6175_v22 = vmax.f32 %v12141_v0, 0.0 }
 0x6a5   :  { %6217 = vst [vmem:[#allocation9 + $0x58] sm:$0xff] %v6153_v43  ;;  %6218 = vst [vmem:[#allocation9 + $0x60] sm:$0xff] %v6154_v8  ;;  %v6176_v32 = vmax.f32 %v12145_v20, 0.0  ;;  %v6177_v33 = vmax.f32 %v12149_v24, 0.0  ;;  %v6178_v37 = vmax.f32 %v12153_v61, 0.0  ;;  %v6179_v44 = vmax.f32 %v12157_v38, 0.0 }
 0x6a6   :  { %6219 = vst [vmem:[#allocation9 + $0x68] sm:$0xff] %v6155_v54  ;;  %6220 = vst [vmem:[#allocation9 + $0x70] sm:$0xff] %v6156_v60  ;;  %v6180_v41 = vmax.f32 %v12161_v42, 0.0  ;;  %v6181_v2 = vmax.f32 %v12165_v10, 0.0  ;;  %v6182_v9 = vmax.f32 %v12169_v53, 0.0  ;;  %v6183_v5 = vmax.f32 %v12173_v50, 0.0 }
 0x6a7   :  { %6221 = vst [vmem:[#allocation9 + $0x78] sm:$0xff] %v6157_v4  ;;  %6222 = vst [vmem:[#allocation9 + $0x80] sm:$0xff] %v6158_v35  ;;  %v6184_v36 = vmax.f32 %v12177_v27, 0.0  ;;  %v6185_v34 = vmax.f32 %v12181_v11, 0.0  ;;  %v6186_v0 = vmax.f32 %v12185_v51, 0.0  ;;  %v6187_v20 = vmax.f32 %v12189_v25, 0.0 }
 0x6a8   :  { %6223 = vst [vmem:[#allocation9 + $0x88] sm:$0xff] %v6159_v12  ;;  %6224 = vst [vmem:[#allocation9 + $0x90] sm:$0xff] %v6160_v62  ;;  %v6188_v24 = vmax.f32 %v12193_v63, 0.0  ;;  %v6189_v61 = vmax.f32 %v12197_v1, 0.0  ;;  %v6190_v38 = vmax.f32 %v12201_v31, 0.0  ;;  %v6191_v42 = vmax.f32 %v12205_v48, 0.0 }
 0x6a9   :  { %6225 = vst [vmem:[#allocation9 + $0x98] sm:$0xff] %v6161_v28  ;;  %6226 = vst [vmem:[#allocation9 + $0xa0] sm:$0xff] %v6162_v59  ;;  %v6192_v10 = vmax.f32 %v12209_v18, 0.0  ;;  %v12849_v53 = vld [vmem:[#allocation61_spill] sm:$0xff]  ;;  %v12850_v27 = vld [vmem:[#allocation64_spill] sm:$0xff]  ;;  %v6198_v18 = vmax.f32 %v12233_v39, 0.0 }
 0x6aa   :  { %6227 = vst [vmem:[#allocation9 + $0xa8] sm:$0xff] %v6163_v6  ;;  %6228 = vst [vmem:[#allocation9 + $0xb0] sm:$0xff] %v6164_v23  ;;  %v6193_v50 = vmax.f32 %v12849_v53, 0.0  ;;  %v6194_v11 = vmax.f32 %v12850_v27, 0.0  ;;  %v12851_v51 = vld [vmem:[#allocation63_spill] sm:$0xff]  ;;  %v12852_v63 = vld [vmem:[#allocation66_spill] sm:$0xff] }
 0x6ab   :  { %6229 = vst [vmem:[#allocation9 + $0xb8] sm:$0xff] %v6165_v19  ;;  %6230 = vst [vmem:[#allocation9 + $0xc0] sm:$0xff] %v6166_v15  ;;  %v6195_v25 = vmax.f32 %v12851_v51, 0.0  ;;  %v6196_v1 = vmax.f32 %v12852_v63, 0.0  ;;  %v12853_v31 = vld [vmem:[#allocation65_spill] sm:$0xff]  ;;  %v12854_v52 = vld [vmem:[#allocation68_spill] sm:$0xff] }
 0x6ac   :  { %6231 = vst [vmem:[#allocation9 + $0xc8] sm:$0xff] %v6167_v21  ;;  %6232 = vst [vmem:[#allocation9 + $0xd0] sm:$0xff] %v6168_v57  ;;  %v6197_v48 = vmax.f32 %v12853_v31, 0.0  ;;  %v6199_v56 = vmax.f32 %v12854_v52, 0.0  ;;  %v12855_v47 = vld [vmem:[#allocation67_spill] sm:$0xff]  ;;  %v12856_v14 = vld [vmem:[#allocation70_spill] sm:$0xff] }
 0x6ad   :  { %6233 = vst [vmem:[#allocation9 + $0xd8] sm:$0xff] %v6169_v3  ;;  %6234 = vst [vmem:[#allocation9 + $0xe0] sm:$0xff] %v6170_v29  ;;  %v6200_v49 = vmax.f32 %v12855_v47, 0.0  ;;  %v6201_v40 = vmax.f32 %v12856_v14, 0.0  ;;  %v12857_v55 = vld [vmem:[#allocation69_spill] sm:$0xff]  ;;  %v12858_v13 = vld [vmem:[#allocation72_spill] sm:$0xff] }
 0x6ae   :  { %6235 = vst [vmem:[#allocation9 + $0xe8] sm:$0xff] %v6171_v58  ;;  %6236 = vst [vmem:[#allocation9 + $0xf0] sm:$0xff] %v6172_v26  ;;  %v6202_v16 = vmax.f32 %v12857_v55, 0.0  ;;  %v6203_v30 = vmax.f32 %v12858_v13, 0.0  ;;  %v6205_v7 = vmax.f32 %v12257_v17, 0.0 }
 0x6af   :  { %6237 = vst [vmem:[#allocation9 + $0xf8] sm:$0xff] %v6173_v45  ;;  %6238 = vst [vmem:[#allocation9 + $0x100] sm:$0xff] %v6174_v46 }
 0x6b0   :  { %6239 = vst [vmem:[#allocation9 + $0x108] sm:$0xff] %v6175_v22  ;;  %6240 = vst [vmem:[#allocation9 + $0x110] sm:$0xff] %v6176_v32 }
 0x6b1   :  { %6241 = vst [vmem:[#allocation9 + $0x118] sm:$0xff] %v6177_v33  ;;  %6242 = vst [vmem:[#allocation9 + $0x120] sm:$0xff] %v6178_v37 }
 0x6b2   :  { %6243 = vst [vmem:[#allocation9 + $0x128] sm:$0xff] %v6179_v44  ;;  %6244 = vst [vmem:[#allocation9 + $0x130] sm:$0xff] %v6180_v41 }
 0x6b3   :  { %6245 = vst [vmem:[#allocation9 + $0x138] sm:$0xff] %v6181_v2  ;;  %6246 = vst [vmem:[#allocation9 + $0x140] sm:$0xff] %v6182_v9 }
 0x6b4   :  { %6247 = vst [vmem:[#allocation9 + $0x148] sm:$0xff] %v6183_v5  ;;  %6248 = vst [vmem:[#allocation9 + $0x150] sm:$0xff] %v6184_v36 }
 0x6b5   :  { %6249 = vst [vmem:[#allocation9 + $0x158] sm:$0xff] %v6185_v34  ;;  %6250 = vst [vmem:[#allocation9 + $0x160] sm:$0xff] %v6186_v0 }
 0x6b6   :  { %6251 = vst [vmem:[#allocation9 + $0x168] sm:$0xff] %v6187_v20  ;;  %6252 = vst [vmem:[#allocation9 + $0x170] sm:$0xff] %v6188_v24 }
 0x6b7   :  { %6253 = vst [vmem:[#allocation9 + $0x178] sm:$0xff] %v6189_v61  ;;  %6254 = vst [vmem:[#allocation9 + $0x180] sm:$0xff] %v6190_v38 }
 0x6b8   :  { %6255 = vst [vmem:[#allocation9 + $0x188] sm:$0xff] %v6191_v42  ;;  %6256 = vst [vmem:[#allocation9 + $0x190] sm:$0xff] %v6192_v10 }
 0x6b9   :  { %6257 = vst [vmem:[#allocation9 + $0x198] sm:$0xff] %v6193_v50  ;;  %6258 = vst [vmem:[#allocation9 + $0x1a0] sm:$0xff] %v6194_v11 }
 0x6ba   :  { %6259 = vst [vmem:[#allocation9 + $0x1a8] sm:$0xff] %v6195_v25  ;;  %6260 = vst [vmem:[#allocation9 + $0x1b0] sm:$0xff] %v6196_v1 }
 0x6bb   :  { %6261 = vst [vmem:[#allocation9 + $0x1b8] sm:$0xff] %v6197_v48  ;;  %6262 = vst [vmem:[#allocation9 + $0x1c0] sm:$0xff] %v6198_v18 }
 0x6bc   :  { %6263 = vst [vmem:[#allocation9 + $0x1c8] sm:$0xff] %v6199_v56  ;;  %6264 = vst [vmem:[#allocation9 + $0x1d0] sm:$0xff] %v6200_v49 }
 0x6bd   :  { %6265 = vst [vmem:[#allocation9 + $0x1d8] sm:$0xff] %v6201_v40  ;;  %6266 = vst [vmem:[#allocation9 + $0x1e0] sm:$0xff] %v6202_v16 }
 0x6be   :  { %6267 = vst [vmem:[#allocation9 + $0x1e8] sm:$0xff] %v6203_v30  ;;  %6269 = vst [vmem:[#allocation9 + $0x1f8] sm:$0xff] %v6205_v7 }
 0x6bf   :  { %9291 = shalt.err (!%p9288_p0)
}
 0x6c0   :  { %s9292_s6 = scalar_lea.hbm %s12341_s4, 8192 }
 0x6c1   :  { %p9293_p1 = scmp.ne.s32.totalorder %s12341_s4, %s9292_s6  ;;  %p9296_p2 = scmp.lt.u32.totalorder %s9292_s6, %s12341_s4 }
 0x6c3   :  { %p9298_p3 = pnand %p9296_p2, %p9293_p1 }
 0x6c5   :  { %9301 = shalt.err (!%p9298_p3)
}
 0x6c6   :  { %6281 = dma.vmem_to_hbm [thread:$0]  %s6276_s26, 8192, %s12341_s4, [#allocation5], %s9310_s27, %s9310_s27, %s9311_s28  }
 0x6c7   :  { %9306 = dma.done.wait [#allocation5], 8192  }
 0x6c8   :  { %9307 = vsyncadd [#allocation5], 4294959104 }
 0x6c9   :  { %6285 = vsyncpa [#allocation4], 1 }
 0x6ca   :  { %6286 = vsyncpa [#allocation7], 1 }
 0x6cb   :  { %6287 = vsyncpa [#allocation5], 1 }

</bundles_post_ra>
